<compile_context>
chip_gen: v6e
topology: v6e:2x2x1
jax: 0.10.0
libtpu: 0.0.40
codegen_flags: <defaults>
</compile_context>

<pallas_src>
import jax
import jax.numpy as jnp
from jax import lax
from jax.experimental import pallas as pl
from jax.experimental.pallas import tpu as pltpu


def _round_up(a, m):
    return (a + m - 1) // m * m


# ----------------------------------------------------------------------------
# Pallas kernel: 2-layer GRU recurrence + Linear(H, 1) head.
# ----------------------------------------------------------------------------
def gru2_reg_kernel(
    x_ref,                       # (T_BLK, B_BLK, D)      time-major input block
    wih0_ref, bi0_ref,           # (D,  3*Hp), (1, 3*Hp)  layer-0 packed input weights / fused biases
    whh0_ref, bhn0_ref,          # (Hp, 3*Hp), (1, Hp)    layer-0 packed recurrent weights / n-gate bias
    wih1_ref, bi1_ref,           # (Hp, 3*Hp), (1, 3*Hp)
    whh1_ref, bhn1_ref,          # (Hp, 3*Hp), (1, Hp)
    wreg_ref, breg_ref,          # (1, Hp), (1, 1)
    out_ref,                     # (1, B_BLK, T_BLK)      lane-dense output slab
    gi_scr,                      # (T_BLK, B_BLK, 3*Hp)   packed hoisted input projections
    hseq_scr,                    # (T_BLK, B_BLK, Hp)     per-layer hidden sequence
    h0_scr, h1_scr,              # (B_BLK, Hp)            hidden carry across time blocks
):
    t_blk, b_blk, _ = x_ref.shape
    hp = hseq_scr.shape[-1]
    unroll = min(t_blk, 8)       # bounded unroll: keeps vreg pressure in check

    # New batch block: reset the carried hidden states.
    @pl.when(pl.program_id(1) == 0)
    def _():
        h0_scr[...] = jnp.zeros_like(h0_scr)
        h1_scr[...] = jnp.zeros_like(h1_scr)

    def input_proj(seq, wih_ref, bi_ref):
        # One block-wide MXU matmul covering all three gates, hoisted out of
        # the serial recurrence.  Flattening (T, B, Din) -> (T*B, Din) is
        # layout-trivial because B_BLK is a multiple of 8 (sublane tile).
        din = seq.shape[-1]
        flat = seq.reshape(t_blk * b_blk, din)
        gi = jnp.dot(flat, wih_ref[...], preferred_element_type=jnp.float32)
        gi = gi + bi_ref[...]
        gi_scr[...] = gi.reshape(t_blk, b_blk, 3 * hp)

    def recurrence(h_init, whh_ref, bhn_ref):
        # Loop-invariant reads / broadcasts hoisted out of the serial loop.
        whh = whh_ref[...]                                     # (Hp, 3*Hp)
        bhn = jnp.broadcast_to(bhn_ref[...], (b_blk, hp))      # (B_BLK, Hp)

        def step(t, h):
            # Single fused recurrent matmul per step (r|z|n packed on lanes);
            # b_ih + b_hh already folded into gi for the r/z gates.
            gh = jnp.dot(h, whh, preferred_element_type=jnp.float32)   # (B, 3*Hp)
            gi = gi_scr[t]                                             # (B, 3*Hp)
            r = jax.nn.sigmoid(gi[:, 0 * hp:1 * hp] + gh[:, 0 * hp:1 * hp])
            z = jax.nn.sigmoid(gi[:, 1 * hp:2 * hp] + gh[:, 1 * hp:2 * hp])
            n = jnp.tanh(gi[:, 2 * hp:3 * hp] + r * (gh[:, 2 * hp:3 * hp] + bhn))
            h_new = (1.0 - z) * n + z * h
            hseq_scr[t] = h_new
            return h_new

        return lax.fori_loop(0, t_blk, step, h_init, unroll=unroll)

    # ---- layer 0 ----
    input_proj(x_ref[...], wih0_ref, bi0_ref)
    h0_scr[...] = recurrence(h0_scr[...], whh0_ref, bhn0_ref)

    # ---- layer 1 (consumes layer-0 hidden sequence) ----
    input_proj(hseq_scr[...], wih1_ref, bi1_ref)
    h1_scr[...] = recurrence(h1_scr[...], whh1_ref, bhn1_ref)

    # ---- final Linear(Hp, 1): VPU lane reduction, lane-dense (B, T) store ----
    # TODO(synk): generalize to output_size > 1 with an MXU head if needed.
    y = jnp.sum(hseq_scr[...] * wreg_ref[...], axis=-1) + breg_ref[...]  # (T_BLK, B_BLK)
    out_ref[0] = y.T.astype(out_ref.dtype)                               # (B_BLK, T_BLK)


# ----------------------------------------------------------------------------
# Wrapper: parameter packing, padding/blocking, pallas_call.
# ----------------------------------------------------------------------------
def lstm_reg_forward(x, params):
    """x: (B, T, D) float32 (batch_first, as in the PyTorch module).
    Returns (B, T, 1), matching the module's `x.view(s, b, -1)` output."""
    B, T, D = x.shape
    H = params["weight_hh_l0"].shape[1]
    O = params["reg_weight"].shape[0]
    assert O == 1, "kernel implements the module default output_size=1"

    # Hidden padded to a full 128-lane vreg; padded lanes provably stay 0.
    Hp = _round_up(H, 128)

    # --- blocking / padding ---
    # Cap B_BLK at 128 (fills v5e's 128-wide MXU; keeps scratch <= ~34 MiB on
    # v7x's 64 MiB VMEM).  Prefer >= 2 batch blocks so the "parallel" axis can
    # shard across the two v7x TensorCores when each block still half-fills M.
    B_BLK = min(128, _round_up(B, 8))
    if _round_up(B, B_BLK) // B_BLK < 2 and B_BLK > 64:
        B_BLK = max(64, _round_up((B + 1) // 2, 8))
    B_pad = _round_up(B, B_BLK)
    nb = B_pad // B_BLK

    T_BLK = T if T <= 128 else 128
    T_pad = _round_up(T, T_BLK)
    nt = T_pad // T_BLK

    # Time-major, batch/time zero-padded input.
    x_tm = jnp.transpose(x, (1, 0, 2)).astype(jnp.float32)            # (T, B, D)
    x_tm = jnp.pad(x_tm, ((0, T_pad - T), (0, B_pad - B), (0, 0)))

    # --- parameter packing: gates concatenated on lanes at Hp-aligned offsets,
    #     `x @ W` form, hidden dims zero-padded to Hp ---
    def pack_ih(w):      # (3H, Din) -> (Din, 3*Hp)
        w3 = jnp.transpose(w.reshape(3, H, -1), (2, 0, 1))            # (Din, 3, H)
        w3 = jnp.pad(w3, ((0, 0), (0, 0), (0, Hp - H)))
        return w3.reshape(-1, 3 * Hp).astype(jnp.float32)

    def pack_hh(w):      # (3H, H) -> (Hp, 3*Hp)
        w3 = jnp.transpose(w.reshape(3, H, H), (2, 0, 1))             # (H_in, 3, H_out)
        w3 = jnp.pad(w3, ((0, Hp - H), (0, 0), (0, Hp - H)))
        return w3.reshape(Hp, 3 * Hp).astype(jnp.float32)

    def pack_input_bias(b_ih, b_hh):
        # r/z gates: b_ih + b_hh pre-summed; n gate keeps only b_ih here
        # (its b_hh term is applied inside r * (gh_n + b_hn)).
        bih = b_ih.reshape(3, H)
        bi = bih + b_hh.reshape(3, H)
        bi = bi.at[2].set(bih[2])
        bi = jnp.pad(bi, ((0, 0), (0, Hp - H)))
        return bi.reshape(1, 3 * Hp).astype(jnp.float32)

    def pack_bhn(b_hh):
        return jnp.pad(b_hh[2 * H:], (0, Hp - H)).reshape(1, Hp).astype(jnp.float32)

    wih0 = pack_ih(params["weight_ih_l0"])
    whh0 = pack_hh(params["weight_hh_l0"])
    bi0 = pack_input_bias(params["bias_ih_l0"], params["bias_hh_l0"])
    bhn0 = pack_bhn(params["bias_hh_l0"])

    wih1 = pack_hh(params["weight_ih_l1"])      # layer-1 input dim is H -> pad like hh
    whh1 = pack_hh(params["weight_hh_l1"])
    bi1 = pack_input_bias(params["bias_ih_l1"], params["bias_hh_l1"])
    bhn1 = pack_bhn(params["bias_hh_l1"])

    wreg = jnp.pad(params["reg_weight"].reshape(1, H),
                   ((0, 0), (0, Hp - H))).astype(jnp.float32)
    breg = params["reg_bias"].reshape(1, 1).astype(jnp.float32)

    weights = (wih0, bi0, whh0, bhn0, wih1, bi1, whh1, bhn1, wreg, breg)

    # --- specs ---
    def full(arr):
        shp = arr.shape
        return pl.BlockSpec(shp, lambda bb, tb: (0,) * len(shp))

    in_specs = [pl.BlockSpec((T_BLK, B_BLK, D), lambda bb, tb: (tb, bb, 0))]
    in_specs += [full(w) for w in weights]
    out_spec = pl.BlockSpec((1, B_BLK, T_BLK), lambda bb, tb: (bb, 0, tb))

    scratch_shapes = [
        pltpu.VMEM((T_BLK, B_BLK, 3 * Hp), jnp.float32),   # packed gi (r|z|n)
        pltpu.VMEM((T_BLK, B_BLK, Hp), jnp.float32),       # hidden sequence
        pltpu.VMEM((B_BLK, Hp), jnp.float32),              # h carry, layer 0
        pltpu.VMEM((B_BLK, Hp), jnp.float32),              # h carry, layer 1
    ]

    # VMEM budget derived from actual tile sizes (v7x has only 64 MiB physical;
    # with B_BLK <= 128 / T_BLK <= 128 / Hp = 128 this stays <= ~40 MiB).
    vmem_needed = 4 * (
        T_BLK * B_BLK * (4 * Hp)                   # gi + hseq scratch
        + 2 * B_BLK * Hp                           # hidden carries
        + 2 * T_BLK * B_BLK * D                    # x double-buffer
        + 2 * B_BLK * T_BLK                        # out double-buffer
        + 2 * sum(int(w.size) for w in weights)    # weights (conservative 2x)
    )
    vmem_limit = int(min(96 * 2**20, max(32 * 2**20, vmem_needed + (4 << 20))))

    flops = (2 * T_pad * B_pad * 3 * Hp * (D + Hp)       # input projections (L0 + L1)
             + 2 * 2 * T_pad * B_pad * 3 * Hp * Hp        # recurrent matmuls (2 layers)
             + 2 * T_pad * B_pad * Hp)                    # reg head
    cost = pl.CostEstimate(
        flops=int(flops),
        transcendentals=int(2 * 3 * T_pad * B_pad * Hp),
        bytes_accessed=int(4 * (x_tm.size + sum(int(w.size) for w in weights)
                                + B_pad * T_pad)),
    )

    out = pl.pallas_call(
        gru2_reg_kernel,
        out_shape=jax.ShapeDtypeStruct((nb, B_BLK, T_pad), jnp.float32),
        grid=(nb, nt),
        in_specs=in_specs,
        out_specs=out_spec,
        scratch_shapes=scratch_shapes,
        compiler_params=pltpu.CompilerParams(
            dimension_semantics=("parallel", "arbitrary"),
            vmem_limit_bytes=vmem_limit,
        ),
        cost_estimate=cost,
    )(x_tm, *weights)

    # (nb, B_BLK, T_pad) -> (B_pad, T_pad) -> (B, T, 1)
    y = out.reshape(B_pad, T_pad)[:B, :T]
    return y[:, :, None]


# ----------------------------------------------------------------------------
# Deterministic parameter init (PyTorch-style uniform(-1/sqrt(H), 1/sqrt(H))).
# ----------------------------------------------------------------------------
def init_params(key, input_size, hidden_size, output_size):
    H, D, O = hidden_size, input_size, output_size
    bound = 1.0 / jnp.sqrt(jnp.float32(H))
    shapes = {
        "weight_ih_l0": (3 * H, D), "weight_hh_l0": (3 * H, H),
        "bias_ih_l0": (3 * H,),     "bias_hh_l0": (3 * H,),
        "weight_ih_l1": (3 * H, H), "weight_hh_l1": (3 * H, H),
        "bias_ih_l1": (3 * H,),     "bias_hh_l1": (3 * H,),
        "reg_weight": (O, H),       "reg_bias": (O,),
    }
    params = {}
    keys = jax.random.split(key, len(shapes))
    for k, (name, shp) in zip(keys, shapes.items()):
        params[name] = jax.random.uniform(k, shp, jnp.float32, -bound, bound)
    return params


# ----------------------------------------------------------------------------
# Pure-JAX reference (for correctness check).
# ----------------------------------------------------------------------------
def reference_forward(x, p):
    B, T, D = x.shape
    H = p["weight_hh_l0"].shape[1]

    def gru_cell(x_t, h, wih, whh, bih, bhh):
        gi = x_t @ wih.T + bih
        gh = h @ whh.T + bhh
        r = jax.nn.sigmoid(gi[:, :H] + gh[:, :H])
        z = jax.nn.sigmoid(gi[:, H:2 * H] + gh[:, H:2 * H])
        n = jnp.tanh(gi[:, 2 * H:] + r * gh[:, 2 * H:])
        return (1.0 - z) * n + z * h

    def run_layer(xs, wih, whh, bih, bhh):
        def step(h, x_t):
            h_new = gru_cell(x_t, h, wih, whh, bih, bhh)
            return h_new, h_new
        h0 = jnp.zeros((B, H), jnp.float32)
        _, ys = lax.scan(step, h0, jnp.transpose(xs, (1, 0, 2)))
        return jnp.transpose(ys, (1, 0, 2))

    y0 = run_layer(x, p["weight_ih_l0"], p["weight_hh_l0"],
                   p["bias_ih_l0"], p["bias_hh_l0"])
    y1 = run_layer(y0, p["weight_ih_l1"], p["weight_hh_l1"],
                   p["bias_ih_l1"], p["bias_hh_l1"])
    return y1 @ p["reg_weight"].T + p["reg_bias"]


if __name__ == "__main__":
    B, T, D, H, O = 2, 8, 4, 32, 1  # batch, seq, input_size, hidden_size, output_size

    root = jax.random.PRNGKey(0)
    kx, kp = jax.random.split(root)
    x = jax.random.normal(kx, (B, T, D), jnp.float32)
    params = init_params(kp, D, H, O)

    y = lstm_reg_forward(x, params)
    y = jax.block_until_ready(y)

    y_ref = reference_forward(x, params)
    assert y.shape == (B, T, O), f"bad output shape {y.shape}"
    max_err = float(jnp.max(jnp.abs(y - y_ref)))
    if max_err < 1e-4:
        print("KERNEL_OK")
    else:
        print(f"MISMATCH max_abs_err={max_err}")
</pallas_src>

<mosaic_0001>
module attributes {stable_mosaic.version = 11 : i64} {
  func.func @gru2_reg_kernel(%arg0: i32, %arg1: i32, %arg2: memref<8x8x4xf32, #tpu.memory_space<vmem>>, %arg3: memref<4x384xf32, #tpu.memory_space<vmem>>, %arg4: memref<1x384xf32, #tpu.memory_space<vmem>>, %arg5: memref<128x384xf32, #tpu.memory_space<vmem>>, %arg6: memref<1x128xf32, #tpu.memory_space<vmem>>, %arg7: memref<128x384xf32, #tpu.memory_space<vmem>>, %arg8: memref<1x384xf32, #tpu.memory_space<vmem>>, %arg9: memref<128x384xf32, #tpu.memory_space<vmem>>, %arg10: memref<1x128xf32, #tpu.memory_space<vmem>>, %arg11: memref<1x128xf32, #tpu.memory_space<vmem>>, %arg12: memref<1x1xf32, #tpu.memory_space<vmem>>, %arg13: memref<1x8x8xf32, #tpu.memory_space<vmem>>, %arg14: memref<8x8x384xf32, #tpu.memory_space<vmem>>, %arg15: memref<8x8x128xf32, #tpu.memory_space<vmem>>, %arg16: memref<8x128xf32, #tpu.memory_space<vmem>>, %arg17: memref<8x128xf32, #tpu.memory_space<vmem>>) attributes {dimension_semantics = [#tpu.dimension_semantics<parallel>, #tpu.dimension_semantics<arbitrary>], iteration_bounds = array<i64: 1, 1>, scalar_prefetch = 0 : i64, scratch_operands = 4 : i64, tpu.core_type = #tpu.core_type<tc>, window_params = [{transform_indices = @transform_0, window_bounds = array<i64: 8, 8, 4>}, {pipeline_mode = #tpu.pipeline_mode<synchronous>, transform_indices = @transform_1, window_bounds = array<i64: 4, 384>}, {pipeline_mode = #tpu.pipeline_mode<synchronous>, transform_indices = @transform_2, window_bounds = array<i64: 1, 384>}, {pipeline_mode = #tpu.pipeline_mode<synchronous>, transform_indices = @transform_3, window_bounds = array<i64: 128, 384>}, {pipeline_mode = #tpu.pipeline_mode<synchronous>, transform_indices = @transform_4, window_bounds = array<i64: 1, 128>}, {pipeline_mode = #tpu.pipeline_mode<synchronous>, transform_indices = @transform_5, window_bounds = array<i64: 128, 384>}, {pipeline_mode = #tpu.pipeline_mode<synchronous>, transform_indices = @transform_6, window_bounds = array<i64: 1, 384>}, {pipeline_mode = #tpu.pipeline_mode<synchronous>, transform_indices = @transform_7, window_bounds = array<i64: 128, 384>}, {pipeline_mode = #tpu.pipeline_mode<synchronous>, transform_indices = @transform_8, window_bounds = array<i64: 1, 128>}, {pipeline_mode = #tpu.pipeline_mode<synchronous>, transform_indices = @transform_9, window_bounds = array<i64: 1, 128>}, {pipeline_mode = #tpu.pipeline_mode<synchronous>, transform_indices = @transform_10, window_bounds = array<i64: 1, 1>}, {transform_indices = @transform_11, window_bounds = array<i64: 1, 8, 8>}]} {
    %c0_i32 = arith.constant 0 : i32
    %0 = arith.cmpi eq, %arg1, %c0_i32 : i32
    %1 = arith.extui %0 : i1 to i32
    %c0_i32_0 = arith.constant 0 : i32
    %2 = arith.cmpi ne, %1, %c0_i32_0 : i32
    scf.if %2 {
      %cst_186 = arith.constant 0.000000e+00 : f32
      %606 = vector.broadcast %cst_186 : f32 to vector<8x128xf32>
      %c0_187 = arith.constant 0 : index
      %c0_188 = arith.constant 0 : index
      %607 = vector.load %arg16[%c0_187, %c0_188] : memref<8x128xf32, #tpu.memory_space<vmem>>, vector<8x128xf32>
      tpu.vector_store %arg16[%c0_187, %c0_188], %606 {strides = array<i32>} : memref<8x128xf32, #tpu.memory_space<vmem>>, vector<8x128xf32>,
      %cst_189 = arith.constant 0.000000e+00 : f32
      %608 = vector.broadcast %cst_189 : f32 to vector<8x128xf32>
      %c0_190 = arith.constant 0 : index
      %c0_191 = arith.constant 0 : index
      %609 = vector.load %arg17[%c0_190, %c0_191] : memref<8x128xf32, #tpu.memory_space<vmem>>, vector<8x128xf32>
      tpu.vector_store %arg17[%c0_190, %c0_191], %608 {strides = array<i32>} : memref<8x128xf32, #tpu.memory_space<vmem>>, vector<8x128xf32>,
    } else {
    }
    %c0 = arith.constant 0 : index
    %c0_1 = arith.constant 0 : index
    %c0_2 = arith.constant 0 : index
    %3 = vector.load %arg2[%c0, %c0_1, %c0_2] : memref<8x8x4xf32, #tpu.memory_space<vmem>>, vector<8x8x4xf32>
    %4 = vector.shape_cast %3 : vector<8x8x4xf32> to vector<64x4xf32>
    %c0_3 = arith.constant 0 : index
    %c0_4 = arith.constant 0 : index
    %5 = vector.load %arg3[%c0_3, %c0_4] : memref<4x384xf32, #tpu.memory_space<vmem>>, vector<4x384xf32>
    %cst = arith.constant dense<0.000000e+00> : vector<64x384xf32>
    %6 = tpu.matmul %4, %5, %cst {dimension_numbers = #tpu.dot_dimension_numbers<[1], [0], [0], [1], [0, 0, 1, 1], [], []>} : vector<64x4xf32>, vector<4x384xf32>, vector<64x384xf32> -> vector<64x384xf32>
    %c0_5 = arith.constant 0 : index
    %c0_6 = arith.constant 0 : index
    %7 = vector.load %arg4[%c0_5, %c0_6] : memref<1x384xf32, #tpu.memory_space<vmem>>, vector<1x384xf32>
    %8 = vector.broadcast %7 : vector<1x384xf32> to vector<64x384xf32>
    %9 = arith.addf %6, %8 : vector<64x384xf32>
    %10 = vector.shape_cast %9 : vector<64x384xf32> to vector<8x8x384xf32>
    %c0_7 = arith.constant 0 : index
    %c0_8 = arith.constant 0 : index
    %c0_9 = arith.constant 0 : index
    %11 = vector.load %arg14[%c0_7, %c0_8, %c0_9] : memref<8x8x384xf32, #tpu.memory_space<vmem>>, vector<8x8x384xf32>
    tpu.vector_store %arg14[%c0_7, %c0_8, %c0_9], %10 {strides = array<i32>} : memref<8x8x384xf32, #tpu.memory_space<vmem>>, vector<8x8x384xf32>,
    %c0_10 = arith.constant 0 : index
    %c0_11 = arith.constant 0 : index
    %12 = vector.load %arg16[%c0_10, %c0_11] : memref<8x128xf32, #tpu.memory_space<vmem>>, vector<8x128xf32>
    %c0_12 = arith.constant 0 : index
    %c0_13 = arith.constant 0 : index
    %13 = vector.load %arg5[%c0_12, %c0_13] : memref<128x384xf32, #tpu.memory_space<vmem>>, vector<128x384xf32>
    %c0_14 = arith.constant 0 : index
    %c0_15 = arith.constant 0 : index
    %14 = vector.load %arg6[%c0_14, %c0_15] : memref<1x128xf32, #tpu.memory_space<vmem>>, vector<1x128xf32>
    %15 = vector.shape_cast %14 : vector<1x128xf32> to vector<1x128xf32>
    %16 = vector.broadcast %15 : vector<1x128xf32> to vector<8x128xf32>
    %c0_i32_16 = arith.constant 0 : i32
    %cst_17 = arith.constant dense<0.000000e+00> : vector<8x384xf32>
    %17 = tpu.matmul %12, %13, %cst_17 {dimension_numbers = #tpu.dot_dimension_numbers<[1], [0], [0], [1], [0, 0, 1, 1], [], []>} : vector<8x128xf32>, vector<128x384xf32>, vector<8x384xf32> -> vector<8x384xf32>
    %18 = arith.index_cast %c0_i32_16 : i32 to index
    %c0_18 = arith.constant 0 : index
    %c0_19 = arith.constant 0 : index
    %19 = vector.load %arg14[%18, %c0_18, %c0_19] : memref<8x8x384xf32, #tpu.memory_space<vmem>>, vector<1x8x384xf32>
    %20 = vector.shape_cast %19 : vector<1x8x384xf32> to vector<8x384xf32>
    %21 = vector.extract_strided_slice %20 {offsets = [0, 0], sizes = [8, 128], strides = [1, 1]} : vector<8x384xf32> to vector<8x128xf32>
    %22 = vector.extract_strided_slice %17 {offsets = [0, 0], sizes = [8, 128], strides = [1, 1]} : vector<8x384xf32> to vector<8x128xf32>
    %23 = arith.addf %21, %22 : vector<8x128xf32>
    %24 = arith.negf %23 : vector<8x128xf32>
    %25 = math.exp %24 : vector<8x128xf32>
    %cst_20 = arith.constant 1.000000e+00 : f32
    %26 = vector.broadcast %cst_20 : f32 to vector<8x128xf32>
    %27 = arith.addf %26, %25 : vector<8x128xf32>
    %28 = arith.divf %26, %27 : vector<8x128xf32>
    %29 = vector.extract_strided_slice %20 {offsets = [0, 128], sizes = [8, 128], strides = [1, 1]} : vector<8x384xf32> to vector<8x128xf32>
    %30 = vector.extract_strided_slice %17 {offsets = [0, 128], sizes = [8, 128], strides = [1, 1]} : vector<8x384xf32> to vector<8x128xf32>
    %31 = arith.addf %29, %30 : vector<8x128xf32>
    %32 = arith.negf %31 : vector<8x128xf32>
    %33 = math.exp %32 : vector<8x128xf32>
    %cst_21 = arith.constant 1.000000e+00 : f32
    %34 = vector.broadcast %cst_21 : f32 to vector<8x128xf32>
    %35 = arith.addf %34, %33 : vector<8x128xf32>
    %36 = arith.divf %34, %35 : vector<8x128xf32>
    %37 = vector.extract_strided_slice %20 {offsets = [0, 256], sizes = [8, 128], strides = [1, 1]} : vector<8x384xf32> to vector<8x128xf32>
    %38 = vector.extract_strided_slice %17 {offsets = [0, 256], sizes = [8, 128], strides = [1, 1]} : vector<8x384xf32> to vector<8x128xf32>
    %39 = arith.addf %38, %16 : vector<8x128xf32>
    %40 = arith.mulf %28, %39 : vector<8x128xf32>
    %41 = arith.addf %37, %40 : vector<8x128xf32>
    %42 = math.tanh %41 : vector<8x128xf32>
    %cst_22 = arith.constant 1.000000e+00 : f32
    %43 = vector.broadcast %cst_22 : f32 to vector<8x128xf32>
    %44 = arith.subf %43, %36 : vector<8x128xf32>
    %45 = arith.mulf %44, %42 : vector<8x128xf32>
    %46 = arith.mulf %36, %12 : vector<8x128xf32>
    %47 = arith.addf %45, %46 : vector<8x128xf32>
    %48 = arith.index_cast %c0_i32_16 : i32 to index
    %c0_23 = arith.constant 0 : index
    %c0_24 = arith.constant 0 : index
    %49 = vector.load %arg15[%48, %c0_23, %c0_24] : memref<8x8x128xf32, #tpu.memory_space<vmem>>, vector<1x8x128xf32>
    %50 = vector.shape_cast %49 : vector<1x8x128xf32> to vector<8x128xf32>
    %51 = vector.shape_cast %47 : vector<8x128xf32> to vector<1x8x128xf32>
    tpu.vector_store %arg15[%48, %c0_23, %c0_24], %51 {strides = array<i32>} : memref<8x8x128xf32, #tpu.memory_space<vmem>>, vector<1x8x128xf32>,
    %c1_i32 = arith.constant 1 : i32
    %cst_25 = arith.constant dense<0.000000e+00> : vector<8x384xf32>
    %52 = tpu.matmul %47, %13, %cst_25 {dimension_numbers = #tpu.dot_dimension_numbers<[1], [0], [0], [1], [0, 0, 1, 1], [], []>} : vector<8x128xf32>, vector<128x384xf32>, vector<8x384xf32> -> vector<8x384xf32>
    %53 = arith.index_cast %c1_i32 : i32 to index
    %c0_26 = arith.constant 0 : index
    %c0_27 = arith.constant 0 : index
    %54 = vector.load %arg14[%53, %c0_26, %c0_27] : memref<8x8x384xf32, #tpu.memory_space<vmem>>, vector<1x8x384xf32>
    %55 = vector.shape_cast %54 : vector<1x8x384xf32> to vector<8x384xf32>
    %56 = vector.extract_strided_slice %55 {offsets = [0, 0], sizes = [8, 128], strides = [1, 1]} : vector<8x384xf32> to vector<8x128xf32>
    %57 = vector.extract_strided_slice %52 {offsets = [0, 0], sizes = [8, 128], strides = [1, 1]} : vector<8x384xf32> to vector<8x128xf32>
    %58 = arith.addf %56, %57 : vector<8x128xf32>
    %59 = arith.negf %58 : vector<8x128xf32>
    %60 = math.exp %59 : vector<8x128xf32>
    %cst_28 = arith.constant 1.000000e+00 : f32
    %61 = vector.broadcast %cst_28 : f32 to vector<8x128xf32>
    %62 = arith.addf %61, %60 : vector<8x128xf32>
    %63 = arith.divf %61, %62 : vector<8x128xf32>
    %64 = vector.extract_strided_slice %55 {offsets = [0, 128], sizes = [8, 128], strides = [1, 1]} : vector<8x384xf32> to vector<8x128xf32>
    %65 = vector.extract_strided_slice %52 {offsets = [0, 128], sizes = [8, 128], strides = [1, 1]} : vector<8x384xf32> to vector<8x128xf32>
    %66 = arith.addf %64, %65 : vector<8x128xf32>
    %67 = arith.negf %66 : vector<8x128xf32>
    %68 = math.exp %67 : vector<8x128xf32>
    %cst_29 = arith.constant 1.000000e+00 : f32
    %69 = vector.broadcast %cst_29 : f32 to vector<8x128xf32>
    %70 = arith.addf %69, %68 : vector<8x128xf32>
    %71 = arith.divf %69, %70 : vector<8x128xf32>
    %72 = vector.extract_strided_slice %55 {offsets = [0, 256], sizes = [8, 128], strides = [1, 1]} : vector<8x384xf32> to vector<8x128xf32>
    %73 = vector.extract_strided_slice %52 {offsets = [0, 256], sizes = [8, 128], strides = [1, 1]} : vector<8x384xf32> to vector<8x128xf32>
    %74 = arith.addf %73, %16 : vector<8x128xf32>
    %75 = arith.mulf %63, %74 : vector<8x128xf32>
    %76 = arith.addf %72, %75 : vector<8x128xf32>
    %77 = math.tanh %76 : vector<8x128xf32>
    %cst_30 = arith.constant 1.000000e+00 : f32
    %78 = vector.broadcast %cst_30 : f32 to vector<8x128xf32>
    %79 = arith.subf %78, %71 : vector<8x128xf32>
    %80 = arith.mulf %79, %77 : vector<8x128xf32>
    %81 = arith.mulf %71, %47 : vector<8x128xf32>
    %82 = arith.addf %80, %81 : vector<8x128xf32>
    %83 = arith.index_cast %c1_i32 : i32 to index
    %c0_31 = arith.constant 0 : index
    %c0_32 = arith.constant 0 : index
    %84 = vector.load %arg15[%83, %c0_31, %c0_32] : memref<8x8x128xf32, #tpu.memory_space<vmem>>, vector<1x8x128xf32>
    %85 = vector.shape_cast %84 : vector<1x8x128xf32> to vector<8x128xf32>
    %86 = vector.shape_cast %82 : vector<8x128xf32> to vector<1x8x128xf32>
    tpu.vector_store %arg15[%83, %c0_31, %c0_32], %86 {strides = array<i32>} : memref<8x8x128xf32, #tpu.memory_space<vmem>>, vector<1x8x128xf32>,
    %c2_i32 = arith.constant 2 : i32
    %cst_33 = arith.constant dense<0.000000e+00> : vector<8x384xf32>
    %87 = tpu.matmul %82, %13, %cst_33 {dimension_numbers = #tpu.dot_dimension_numbers<[1], [0], [0], [1], [0, 0, 1, 1], [], []>} : vector<8x128xf32>, vector<128x384xf32>, vector<8x384xf32> -> vector<8x384xf32>
    %88 = arith.index_cast %c2_i32 : i32 to index
    %c0_34 = arith.constant 0 : index
    %c0_35 = arith.constant 0 : index
    %89 = vector.load %arg14[%88, %c0_34, %c0_35] : memref<8x8x384xf32, #tpu.memory_space<vmem>>, vector<1x8x384xf32>
    %90 = vector.shape_cast %89 : vector<1x8x384xf32> to vector<8x384xf32>
    %91 = vector.extract_strided_slice %90 {offsets = [0, 0], sizes = [8, 128], strides = [1, 1]} : vector<8x384xf32> to vector<8x128xf32>
    %92 = vector.extract_strided_slice %87 {offsets = [0, 0], sizes = [8, 128], strides = [1, 1]} : vector<8x384xf32> to vector<8x128xf32>
    %93 = arith.addf %91, %92 : vector<8x128xf32>
    %94 = arith.negf %93 : vector<8x128xf32>
    %95 = math.exp %94 : vector<8x128xf32>
    %cst_36 = arith.constant 1.000000e+00 : f32
    %96 = vector.broadcast %cst_36 : f32 to vector<8x128xf32>
    %97 = arith.addf %96, %95 : vector<8x128xf32>
    %98 = arith.divf %96, %97 : vector<8x128xf32>
    %99 = vector.extract_strided_slice %90 {offsets = [0, 128], sizes = [8, 128], strides = [1, 1]} : vector<8x384xf32> to vector<8x128xf32>
    %100 = vector.extract_strided_slice %87 {offsets = [0, 128], sizes = [8, 128], strides = [1, 1]} : vector<8x384xf32> to vector<8x128xf32>
    %101 = arith.addf %99, %100 : vector<8x128xf32>
    %102 = arith.negf %101 : vector<8x128xf32>
    %103 = math.exp %102 : vector<8x128xf32>
    %cst_37 = arith.constant 1.000000e+00 : f32
    %104 = vector.broadcast %cst_37 : f32 to vector<8x128xf32>
    %105 = arith.addf %104, %103 : vector<8x128xf32>
    %106 = arith.divf %104, %105 : vector<8x128xf32>
    %107 = vector.extract_strided_slice %90 {offsets = [0, 256], sizes = [8, 128], strides = [1, 1]} : vector<8x384xf32> to vector<8x128xf32>
    %108 = vector.extract_strided_slice %87 {offsets = [0, 256], sizes = [8, 128], strides = [1, 1]} : vector<8x384xf32> to vector<8x128xf32>
    %109 = arith.addf %108, %16 : vector<8x128xf32>
    %110 = arith.mulf %98, %109 : vector<8x128xf32>
    %111 = arith.addf %107, %110 : vector<8x128xf32>
    %112 = math.tanh %111 : vector<8x128xf32>
    %cst_38 = arith.constant 1.000000e+00 : f32
    %113 = vector.broadcast %cst_38 : f32 to vector<8x128xf32>
    %114 = arith.subf %113, %106 : vector<8x128xf32>
    %115 = arith.mulf %114, %112 : vector<8x128xf32>
    %116 = arith.mulf %106, %82 : vector<8x128xf32>
    %117 = arith.addf %115, %116 : vector<8x128xf32>
    %118 = arith.index_cast %c2_i32 : i32 to index
    %c0_39 = arith.constant 0 : index
    %c0_40 = arith.constant 0 : index
    %119 = vector.load %arg15[%118, %c0_39, %c0_40] : memref<8x8x128xf32, #tpu.memory_space<vmem>>, vector<1x8x128xf32>
    %120 = vector.shape_cast %119 : vector<1x8x128xf32> to vector<8x128xf32>
    %121 = vector.shape_cast %117 : vector<8x128xf32> to vector<1x8x128xf32>
    tpu.vector_store %arg15[%118, %c0_39, %c0_40], %121 {strides = array<i32>} : memref<8x8x128xf32, #tpu.memory_space<vmem>>, vector<1x8x128xf32>,
    %c3_i32 = arith.constant 3 : i32
    %cst_41 = arith.constant dense<0.000000e+00> : vector<8x384xf32>
    %122 = tpu.matmul %117, %13, %cst_41 {dimension_numbers = #tpu.dot_dimension_numbers<[1], [0], [0], [1], [0, 0, 1, 1], [], []>} : vector<8x128xf32>, vector<128x384xf32>, vector<8x384xf32> -> vector<8x384xf32>
    %123 = arith.index_cast %c3_i32 : i32 to index
    %c0_42 = arith.constant 0 : index
    %c0_43 = arith.constant 0 : index
    %124 = vector.load %arg14[%123, %c0_42, %c0_43] : memref<8x8x384xf32, #tpu.memory_space<vmem>>, vector<1x8x384xf32>
    %125 = vector.shape_cast %124 : vector<1x8x384xf32> to vector<8x384xf32>
    %126 = vector.extract_strided_slice %125 {offsets = [0, 0], sizes = [8, 128], strides = [1, 1]} : vector<8x384xf32> to vector<8x128xf32>
    %127 = vector.extract_strided_slice %122 {offsets = [0, 0], sizes = [8, 128], strides = [1, 1]} : vector<8x384xf32> to vector<8x128xf32>
    %128 = arith.addf %126, %127 : vector<8x128xf32>
    %129 = arith.negf %128 : vector<8x128xf32>
    %130 = math.exp %129 : vector<8x128xf32>
    %cst_44 = arith.constant 1.000000e+00 : f32
    %131 = vector.broadcast %cst_44 : f32 to vector<8x128xf32>
    %132 = arith.addf %131, %130 : vector<8x128xf32>
    %133 = arith.divf %131, %132 : vector<8x128xf32>
    %134 = vector.extract_strided_slice %125 {offsets = [0, 128], sizes = [8, 128], strides = [1, 1]} : vector<8x384xf32> to vector<8x128xf32>
    %135 = vector.extract_strided_slice %122 {offsets = [0, 128], sizes = [8, 128], strides = [1, 1]} : vector<8x384xf32> to vector<8x128xf32>
    %136 = arith.addf %134, %135 : vector<8x128xf32>
    %137 = arith.negf %136 : vector<8x128xf32>
    %138 = math.exp %137 : vector<8x128xf32>
    %cst_45 = arith.constant 1.000000e+00 : f32
    %139 = vector.broadcast %cst_45 : f32 to vector<8x128xf32>
    %140 = arith.addf %139, %138 : vector<8x128xf32>
    %141 = arith.divf %139, %140 : vector<8x128xf32>
    %142 = vector.extract_strided_slice %125 {offsets = [0, 256], sizes = [8, 128], strides = [1, 1]} : vector<8x384xf32> to vector<8x128xf32>
    %143 = vector.extract_strided_slice %122 {offsets = [0, 256], sizes = [8, 128], strides = [1, 1]} : vector<8x384xf32> to vector<8x128xf32>
    %144 = arith.addf %143, %16 : vector<8x128xf32>
    %145 = arith.mulf %133, %144 : vector<8x128xf32>
    %146 = arith.addf %142, %145 : vector<8x128xf32>
    %147 = math.tanh %146 : vector<8x128xf32>
    %cst_46 = arith.constant 1.000000e+00 : f32
    %148 = vector.broadcast %cst_46 : f32 to vector<8x128xf32>
    %149 = arith.subf %148, %141 : vector<8x128xf32>
    %150 = arith.mulf %149, %147 : vector<8x128xf32>
    %151 = arith.mulf %141, %117 : vector<8x128xf32>
    %152 = arith.addf %150, %151 : vector<8x128xf32>
    %153 = arith.index_cast %c3_i32 : i32 to index
    %c0_47 = arith.constant 0 : index
    %c0_48 = arith.constant 0 : index
    %154 = vector.load %arg15[%153, %c0_47, %c0_48] : memref<8x8x128xf32, #tpu.memory_space<vmem>>, vector<1x8x128xf32>
    %155 = vector.shape_cast %154 : vector<1x8x128xf32> to vector<8x128xf32>
    %156 = vector.shape_cast %152 : vector<8x128xf32> to vector<1x8x128xf32>
    tpu.vector_store %arg15[%153, %c0_47, %c0_48], %156 {strides = array<i32>} : memref<8x8x128xf32, #tpu.memory_space<vmem>>, vector<1x8x128xf32>,
    %c4_i32 = arith.constant 4 : i32
    %cst_49 = arith.constant dense<0.000000e+00> : vector<8x384xf32>
    %157 = tpu.matmul %152, %13, %cst_49 {dimension_numbers = #tpu.dot_dimension_numbers<[1], [0], [0], [1], [0, 0, 1, 1], [], []>} : vector<8x128xf32>, vector<128x384xf32>, vector<8x384xf32> -> vector<8x384xf32>
    %158 = arith.index_cast %c4_i32 : i32 to index
    %c0_50 = arith.constant 0 : index
    %c0_51 = arith.constant 0 : index
    %159 = vector.load %arg14[%158, %c0_50, %c0_51] : memref<8x8x384xf32, #tpu.memory_space<vmem>>, vector<1x8x384xf32>
    %160 = vector.shape_cast %159 : vector<1x8x384xf32> to vector<8x384xf32>
    %161 = vector.extract_strided_slice %160 {offsets = [0, 0], sizes = [8, 128], strides = [1, 1]} : vector<8x384xf32> to vector<8x128xf32>
    %162 = vector.extract_strided_slice %157 {offsets = [0, 0], sizes = [8, 128], strides = [1, 1]} : vector<8x384xf32> to vector<8x128xf32>
    %163 = arith.addf %161, %162 : vector<8x128xf32>
    %164 = arith.negf %163 : vector<8x128xf32>
    %165 = math.exp %164 : vector<8x128xf32>
    %cst_52 = arith.constant 1.000000e+00 : f32
    %166 = vector.broadcast %cst_52 : f32 to vector<8x128xf32>
    %167 = arith.addf %166, %165 : vector<8x128xf32>
    %168 = arith.divf %166, %167 : vector<8x128xf32>
    %169 = vector.extract_strided_slice %160 {offsets = [0, 128], sizes = [8, 128], strides = [1, 1]} : vector<8x384xf32> to vector<8x128xf32>
    %170 = vector.extract_strided_slice %157 {offsets = [0, 128], sizes = [8, 128], strides = [1, 1]} : vector<8x384xf32> to vector<8x128xf32>
    %171 = arith.addf %169, %170 : vector<8x128xf32>
    %172 = arith.negf %171 : vector<8x128xf32>
    %173 = math.exp %172 : vector<8x128xf32>
    %cst_53 = arith.constant 1.000000e+00 : f32
    %174 = vector.broadcast %cst_53 : f32 to vector<8x128xf32>
    %175 = arith.addf %174, %173 : vector<8x128xf32>
    %176 = arith.divf %174, %175 : vector<8x128xf32>
    %177 = vector.extract_strided_slice %160 {offsets = [0, 256], sizes = [8, 128], strides = [1, 1]} : vector<8x384xf32> to vector<8x128xf32>
    %178 = vector.extract_strided_slice %157 {offsets = [0, 256], sizes = [8, 128], strides = [1, 1]} : vector<8x384xf32> to vector<8x128xf32>
    %179 = arith.addf %178, %16 : vector<8x128xf32>
    %180 = arith.mulf %168, %179 : vector<8x128xf32>
    %181 = arith.addf %177, %180 : vector<8x128xf32>
    %182 = math.tanh %181 : vector<8x128xf32>
    %cst_54 = arith.constant 1.000000e+00 : f32
    %183 = vector.broadcast %cst_54 : f32 to vector<8x128xf32>
    %184 = arith.subf %183, %176 : vector<8x128xf32>
    %185 = arith.mulf %184, %182 : vector<8x128xf32>
    %186 = arith.mulf %176, %152 : vector<8x128xf32>
    %187 = arith.addf %185, %186 : vector<8x128xf32>
    %188 = arith.index_cast %c4_i32 : i32 to index
    %c0_55 = arith.constant 0 : index
    %c0_56 = arith.constant 0 : index
    %189 = vector.load %arg15[%188, %c0_55, %c0_56] : memref<8x8x128xf32, #tpu.memory_space<vmem>>, vector<1x8x128xf32>
    %190 = vector.shape_cast %189 : vector<1x8x128xf32> to vector<8x128xf32>
    %191 = vector.shape_cast %187 : vector<8x128xf32> to vector<1x8x128xf32>
    tpu.vector_store %arg15[%188, %c0_55, %c0_56], %191 {strides = array<i32>} : memref<8x8x128xf32, #tpu.memory_space<vmem>>, vector<1x8x128xf32>,
    %c5_i32 = arith.constant 5 : i32
    %cst_57 = arith.constant dense<0.000000e+00> : vector<8x384xf32>
    %192 = tpu.matmul %187, %13, %cst_57 {dimension_numbers = #tpu.dot_dimension_numbers<[1], [0], [0], [1], [0, 0, 1, 1], [], []>} : vector<8x128xf32>, vector<128x384xf32>, vector<8x384xf32> -> vector<8x384xf32>
    %193 = arith.index_cast %c5_i32 : i32 to index
    %c0_58 = arith.constant 0 : index
    %c0_59 = arith.constant 0 : index
    %194 = vector.load %arg14[%193, %c0_58, %c0_59] : memref<8x8x384xf32, #tpu.memory_space<vmem>>, vector<1x8x384xf32>
    %195 = vector.shape_cast %194 : vector<1x8x384xf32> to vector<8x384xf32>
    %196 = vector.extract_strided_slice %195 {offsets = [0, 0], sizes = [8, 128], strides = [1, 1]} : vector<8x384xf32> to vector<8x128xf32>
    %197 = vector.extract_strided_slice %192 {offsets = [0, 0], sizes = [8, 128], strides = [1, 1]} : vector<8x384xf32> to vector<8x128xf32>
    %198 = arith.addf %196, %197 : vector<8x128xf32>
    %199 = arith.negf %198 : vector<8x128xf32>
    %200 = math.exp %199 : vector<8x128xf32>
    %cst_60 = arith.constant 1.000000e+00 : f32
    %201 = vector.broadcast %cst_60 : f32 to vector<8x128xf32>
    %202 = arith.addf %201, %200 : vector<8x128xf32>
    %203 = arith.divf %201, %202 : vector<8x128xf32>
    %204 = vector.extract_strided_slice %195 {offsets = [0, 128], sizes = [8, 128], strides = [1, 1]} : vector<8x384xf32> to vector<8x128xf32>
    %205 = vector.extract_strided_slice %192 {offsets = [0, 128], sizes = [8, 128], strides = [1, 1]} : vector<8x384xf32> to vector<8x128xf32>
    %206 = arith.addf %204, %205 : vector<8x128xf32>
    %207 = arith.negf %206 : vector<8x128xf32>
    %208 = math.exp %207 : vector<8x128xf32>
    %cst_61 = arith.constant 1.000000e+00 : f32
    %209 = vector.broadcast %cst_61 : f32 to vector<8x128xf32>
    %210 = arith.addf %209, %208 : vector<8x128xf32>
    %211 = arith.divf %209, %210 : vector<8x128xf32>
    %212 = vector.extract_strided_slice %195 {offsets = [0, 256], sizes = [8, 128], strides = [1, 1]} : vector<8x384xf32> to vector<8x128xf32>
    %213 = vector.extract_strided_slice %192 {offsets = [0, 256], sizes = [8, 128], strides = [1, 1]} : vector<8x384xf32> to vector<8x128xf32>
    %214 = arith.addf %213, %16 : vector<8x128xf32>
    %215 = arith.mulf %203, %214 : vector<8x128xf32>
    %216 = arith.addf %212, %215 : vector<8x128xf32>
    %217 = math.tanh %216 : vector<8x128xf32>
    %cst_62 = arith.constant 1.000000e+00 : f32
    %218 = vector.broadcast %cst_62 : f32 to vector<8x128xf32>
    %219 = arith.subf %218, %211 : vector<8x128xf32>
    %220 = arith.mulf %219, %217 : vector<8x128xf32>
    %221 = arith.mulf %211, %187 : vector<8x128xf32>
    %222 = arith.addf %220, %221 : vector<8x128xf32>
    %223 = arith.index_cast %c5_i32 : i32 to index
    %c0_63 = arith.constant 0 : index
    %c0_64 = arith.constant 0 : index
    %224 = vector.load %arg15[%223, %c0_63, %c0_64] : memref<8x8x128xf32, #tpu.memory_space<vmem>>, vector<1x8x128xf32>
    %225 = vector.shape_cast %224 : vector<1x8x128xf32> to vector<8x128xf32>
    %226 = vector.shape_cast %222 : vector<8x128xf32> to vector<1x8x128xf32>
    tpu.vector_store %arg15[%223, %c0_63, %c0_64], %226 {strides = array<i32>} : memref<8x8x128xf32, #tpu.memory_space<vmem>>, vector<1x8x128xf32>,
    %c6_i32 = arith.constant 6 : i32
    %cst_65 = arith.constant dense<0.000000e+00> : vector<8x384xf32>
    %227 = tpu.matmul %222, %13, %cst_65 {dimension_numbers = #tpu.dot_dimension_numbers<[1], [0], [0], [1], [0, 0, 1, 1], [], []>} : vector<8x128xf32>, vector<128x384xf32>, vector<8x384xf32> -> vector<8x384xf32>
    %228 = arith.index_cast %c6_i32 : i32 to index
    %c0_66 = arith.constant 0 : index
    %c0_67 = arith.constant 0 : index
    %229 = vector.load %arg14[%228, %c0_66, %c0_67] : memref<8x8x384xf32, #tpu.memory_space<vmem>>, vector<1x8x384xf32>
    %230 = vector.shape_cast %229 : vector<1x8x384xf32> to vector<8x384xf32>
    %231 = vector.extract_strided_slice %230 {offsets = [0, 0], sizes = [8, 128], strides = [1, 1]} : vector<8x384xf32> to vector<8x128xf32>
    %232 = vector.extract_strided_slice %227 {offsets = [0, 0], sizes = [8, 128], strides = [1, 1]} : vector<8x384xf32> to vector<8x128xf32>
    %233 = arith.addf %231, %232 : vector<8x128xf32>
    %234 = arith.negf %233 : vector<8x128xf32>
    %235 = math.exp %234 : vector<8x128xf32>
    %cst_68 = arith.constant 1.000000e+00 : f32
    %236 = vector.broadcast %cst_68 : f32 to vector<8x128xf32>
    %237 = arith.addf %236, %235 : vector<8x128xf32>
    %238 = arith.divf %236, %237 : vector<8x128xf32>
    %239 = vector.extract_strided_slice %230 {offsets = [0, 128], sizes = [8, 128], strides = [1, 1]} : vector<8x384xf32> to vector<8x128xf32>
    %240 = vector.extract_strided_slice %227 {offsets = [0, 128], sizes = [8, 128], strides = [1, 1]} : vector<8x384xf32> to vector<8x128xf32>
    %241 = arith.addf %239, %240 : vector<8x128xf32>
    %242 = arith.negf %241 : vector<8x128xf32>
    %243 = math.exp %242 : vector<8x128xf32>
    %cst_69 = arith.constant 1.000000e+00 : f32
    %244 = vector.broadcast %cst_69 : f32 to vector<8x128xf32>
    %245 = arith.addf %244, %243 : vector<8x128xf32>
    %246 = arith.divf %244, %245 : vector<8x128xf32>
    %247 = vector.extract_strided_slice %230 {offsets = [0, 256], sizes = [8, 128], strides = [1, 1]} : vector<8x384xf32> to vector<8x128xf32>
    %248 = vector.extract_strided_slice %227 {offsets = [0, 256], sizes = [8, 128], strides = [1, 1]} : vector<8x384xf32> to vector<8x128xf32>
    %249 = arith.addf %248, %16 : vector<8x128xf32>
    %250 = arith.mulf %238, %249 : vector<8x128xf32>
    %251 = arith.addf %247, %250 : vector<8x128xf32>
    %252 = math.tanh %251 : vector<8x128xf32>
    %cst_70 = arith.constant 1.000000e+00 : f32
    %253 = vector.broadcast %cst_70 : f32 to vector<8x128xf32>
    %254 = arith.subf %253, %246 : vector<8x128xf32>
    %255 = arith.mulf %254, %252 : vector<8x128xf32>
    %256 = arith.mulf %246, %222 : vector<8x128xf32>
    %257 = arith.addf %255, %256 : vector<8x128xf32>
    %258 = arith.index_cast %c6_i32 : i32 to index
    %c0_71 = arith.constant 0 : index
    %c0_72 = arith.constant 0 : index
    %259 = vector.load %arg15[%258, %c0_71, %c0_72] : memref<8x8x128xf32, #tpu.memory_space<vmem>>, vector<1x8x128xf32>
    %260 = vector.shape_cast %259 : vector<1x8x128xf32> to vector<8x128xf32>
    %261 = vector.shape_cast %257 : vector<8x128xf32> to vector<1x8x128xf32>
    tpu.vector_store %arg15[%258, %c0_71, %c0_72], %261 {strides = array<i32>} : memref<8x8x128xf32, #tpu.memory_space<vmem>>, vector<1x8x128xf32>,
    %c7_i32 = arith.constant 7 : i32
    %cst_73 = arith.constant dense<0.000000e+00> : vector<8x384xf32>
    %262 = tpu.matmul %257, %13, %cst_73 {dimension_numbers = #tpu.dot_dimension_numbers<[1], [0], [0], [1], [0, 0, 1, 1], [], []>} : vector<8x128xf32>, vector<128x384xf32>, vector<8x384xf32> -> vector<8x384xf32>
    %263 = arith.index_cast %c7_i32 : i32 to index
    %c0_74 = arith.constant 0 : index
    %c0_75 = arith.constant 0 : index
    %264 = vector.load %arg14[%263, %c0_74, %c0_75] : memref<8x8x384xf32, #tpu.memory_space<vmem>>, vector<1x8x384xf32>
    %265 = vector.shape_cast %264 : vector<1x8x384xf32> to vector<8x384xf32>
    %266 = vector.extract_strided_slice %265 {offsets = [0, 0], sizes = [8, 128], strides = [1, 1]} : vector<8x384xf32> to vector<8x128xf32>
    %267 = vector.extract_strided_slice %262 {offsets = [0, 0], sizes = [8, 128], strides = [1, 1]} : vector<8x384xf32> to vector<8x128xf32>
    %268 = arith.addf %266, %267 : vector<8x128xf32>
    %269 = arith.negf %268 : vector<8x128xf32>
    %270 = math.exp %269 : vector<8x128xf32>
    %cst_76 = arith.constant 1.000000e+00 : f32
    %271 = vector.broadcast %cst_76 : f32 to vector<8x128xf32>
    %272 = arith.addf %271, %270 : vector<8x128xf32>
    %273 = arith.divf %271, %272 : vector<8x128xf32>
    %274 = vector.extract_strided_slice %265 {offsets = [0, 128], sizes = [8, 128], strides = [1, 1]} : vector<8x384xf32> to vector<8x128xf32>
    %275 = vector.extract_strided_slice %262 {offsets = [0, 128], sizes = [8, 128], strides = [1, 1]} : vector<8x384xf32> to vector<8x128xf32>
    %276 = arith.addf %274, %275 : vector<8x128xf32>
    %277 = arith.negf %276 : vector<8x128xf32>
    %278 = math.exp %277 : vector<8x128xf32>
    %cst_77 = arith.constant 1.000000e+00 : f32
    %279 = vector.broadcast %cst_77 : f32 to vector<8x128xf32>
    %280 = arith.addf %279, %278 : vector<8x128xf32>
    %281 = arith.divf %279, %280 : vector<8x128xf32>
    %282 = vector.extract_strided_slice %265 {offsets = [0, 256], sizes = [8, 128], strides = [1, 1]} : vector<8x384xf32> to vector<8x128xf32>
    %283 = vector.extract_strided_slice %262 {offsets = [0, 256], sizes = [8, 128], strides = [1, 1]} : vector<8x384xf32> to vector<8x128xf32>
    %284 = arith.addf %283, %16 : vector<8x128xf32>
    %285 = arith.mulf %273, %284 : vector<8x128xf32>
    %286 = arith.addf %282, %285 : vector<8x128xf32>
    %287 = math.tanh %286 : vector<8x128xf32>
    %cst_78 = arith.constant 1.000000e+00 : f32
    %288 = vector.broadcast %cst_78 : f32 to vector<8x128xf32>
    %289 = arith.subf %288, %281 : vector<8x128xf32>
    %290 = arith.mulf %289, %287 : vector<8x128xf32>
    %291 = arith.mulf %281, %257 : vector<8x128xf32>
    %292 = arith.addf %290, %291 : vector<8x128xf32>
    %293 = arith.index_cast %c7_i32 : i32 to index
    %c0_79 = arith.constant 0 : index
    %c0_80 = arith.constant 0 : index
    %294 = vector.load %arg15[%293, %c0_79, %c0_80] : memref<8x8x128xf32, #tpu.memory_space<vmem>>, vector<1x8x128xf32>
    %295 = vector.shape_cast %294 : vector<1x8x128xf32> to vector<8x128xf32>
    %296 = vector.shape_cast %292 : vector<8x128xf32> to vector<1x8x128xf32>
    tpu.vector_store %arg15[%293, %c0_79, %c0_80], %296 {strides = array<i32>} : memref<8x8x128xf32, #tpu.memory_space<vmem>>, vector<1x8x128xf32>,
    %c8_i32 = arith.constant 8 : i32
    %c0_81 = arith.constant 0 : index
    %c0_82 = arith.constant 0 : index
    %297 = vector.load %arg16[%c0_81, %c0_82] : memref<8x128xf32, #tpu.memory_space<vmem>>, vector<8x128xf32>
    tpu.vector_store %arg16[%c0_81, %c0_82], %292 {strides = array<i32>} : memref<8x128xf32, #tpu.memory_space<vmem>>, vector<8x128xf32>,
    %c0_83 = arith.constant 0 : index
    %c0_84 = arith.constant 0 : index
    %c0_85 = arith.constant 0 : index
    %298 = vector.load %arg15[%c0_83, %c0_84, %c0_85] : memref<8x8x128xf32, #tpu.memory_space<vmem>>, vector<8x8x128xf32>
    %299 = vector.shape_cast %298 : vector<8x8x128xf32> to vector<64x128xf32>
    %c0_86 = arith.constant 0 : index
    %c0_87 = arith.constant 0 : index
    %300 = vector.load %arg7[%c0_86, %c0_87] : memref<128x384xf32, #tpu.memory_space<vmem>>, vector<128x384xf32>
    %cst_88 = arith.constant dense<0.000000e+00> : vector<64x384xf32>
    %301 = tpu.matmul %299, %300, %cst_88 {dimension_numbers = #tpu.dot_dimension_numbers<[1], [0], [0], [1], [0, 0, 1, 1], [], []>} : vector<64x128xf32>, vector<128x384xf32>, vector<64x384xf32> -> vector<64x384xf32>
    %c0_89 = arith.constant 0 : index
    %c0_90 = arith.constant 0 : index
    %302 = vector.load %arg8[%c0_89, %c0_90] : memref<1x384xf32, #tpu.memory_space<vmem>>, vector<1x384xf32>
    %303 = vector.broadcast %302 : vector<1x384xf32> to vector<64x384xf32>
    %304 = arith.addf %301, %303 : vector<64x384xf32>
    %305 = vector.shape_cast %304 : vector<64x384xf32> to vector<8x8x384xf32>
    %c0_91 = arith.constant 0 : index
    %c0_92 = arith.constant 0 : index
    %c0_93 = arith.constant 0 : index
    %306 = vector.load %arg14[%c0_91, %c0_92, %c0_93] : memref<8x8x384xf32, #tpu.memory_space<vmem>>, vector<8x8x384xf32>
    tpu.vector_store %arg14[%c0_91, %c0_92, %c0_93], %305 {strides = array<i32>} : memref<8x8x384xf32, #tpu.memory_space<vmem>>, vector<8x8x384xf32>,
    %c0_94 = arith.constant 0 : index
    %c0_95 = arith.constant 0 : index
    %307 = vector.load %arg17[%c0_94, %c0_95] : memref<8x128xf32, #tpu.memory_space<vmem>>, vector<8x128xf32>
    %c0_96 = arith.constant 0 : index
    %c0_97 = arith.constant 0 : index
    %308 = vector.load %arg9[%c0_96, %c0_97] : memref<128x384xf32, #tpu.memory_space<vmem>>, vector<128x384xf32>
    %c0_98 = arith.constant 0 : index
    %c0_99 = arith.constant 0 : index
    %309 = vector.load %arg10[%c0_98, %c0_99] : memref<1x128xf32, #tpu.memory_space<vmem>>, vector<1x128xf32>
    %310 = vector.shape_cast %309 : vector<1x128xf32> to vector<1x128xf32>
    %311 = vector.broadcast %310 : vector<1x128xf32> to vector<8x128xf32>
    %c0_i32_100 = arith.constant 0 : i32
    %cst_101 = arith.constant dense<0.000000e+00> : vector<8x384xf32>
    %312 = tpu.matmul %307, %308, %cst_101 {dimension_numbers = #tpu.dot_dimension_numbers<[1], [0], [0], [1], [0, 0, 1, 1], [], []>} : vector<8x128xf32>, vector<128x384xf32>, vector<8x384xf32> -> vector<8x384xf32>
    %313 = arith.index_cast %c0_i32_100 : i32 to index
    %c0_102 = arith.constant 0 : index
    %c0_103 = arith.constant 0 : index
    %314 = vector.load %arg14[%313, %c0_102, %c0_103] : memref<8x8x384xf32, #tpu.memory_space<vmem>>, vector<1x8x384xf32>
    %315 = vector.shape_cast %314 : vector<1x8x384xf32> to vector<8x384xf32>
    %316 = vector.extract_strided_slice %315 {offsets = [0, 0], sizes = [8, 128], strides = [1, 1]} : vector<8x384xf32> to vector<8x128xf32>
    %317 = vector.extract_strided_slice %312 {offsets = [0, 0], sizes = [8, 128], strides = [1, 1]} : vector<8x384xf32> to vector<8x128xf32>
    %318 = arith.addf %316, %317 : vector<8x128xf32>
    %319 = arith.negf %318 : vector<8x128xf32>
    %320 = math.exp %319 : vector<8x128xf32>
    %cst_104 = arith.constant 1.000000e+00 : f32
    %321 = vector.broadcast %cst_104 : f32 to vector<8x128xf32>
    %322 = arith.addf %321, %320 : vector<8x128xf32>
    %323 = arith.divf %321, %322 : vector<8x128xf32>
    %324 = vector.extract_strided_slice %315 {offsets = [0, 128], sizes = [8, 128], strides = [1, 1]} : vector<8x384xf32> to vector<8x128xf32>
    %325 = vector.extract_strided_slice %312 {offsets = [0, 128], sizes = [8, 128], strides = [1, 1]} : vector<8x384xf32> to vector<8x128xf32>
    %326 = arith.addf %324, %325 : vector<8x128xf32>
    %327 = arith.negf %326 : vector<8x128xf32>
    %328 = math.exp %327 : vector<8x128xf32>
    %cst_105 = arith.constant 1.000000e+00 : f32
    %329 = vector.broadcast %cst_105 : f32 to vector<8x128xf32>
    %330 = arith.addf %329, %328 : vector<8x128xf32>
    %331 = arith.divf %329, %330 : vector<8x128xf32>
    %332 = vector.extract_strided_slice %315 {offsets = [0, 256], sizes = [8, 128], strides = [1, 1]} : vector<8x384xf32> to vector<8x128xf32>
    %333 = vector.extract_strided_slice %312 {offsets = [0, 256], sizes = [8, 128], strides = [1, 1]} : vector<8x384xf32> to vector<8x128xf32>
    %334 = arith.addf %333, %311 : vector<8x128xf32>
    %335 = arith.mulf %323, %334 : vector<8x128xf32>
    %336 = arith.addf %332, %335 : vector<8x128xf32>
    %337 = math.tanh %336 : vector<8x128xf32>
    %cst_106 = arith.constant 1.000000e+00 : f32
    %338 = vector.broadcast %cst_106 : f32 to vector<8x128xf32>
    %339 = arith.subf %338, %331 : vector<8x128xf32>
    %340 = arith.mulf %339, %337 : vector<8x128xf32>
    %341 = arith.mulf %331, %307 : vector<8x128xf32>
    %342 = arith.addf %340, %341 : vector<8x128xf32>
    %343 = arith.index_cast %c0_i32_100 : i32 to index
    %c0_107 = arith.constant 0 : index
    %c0_108 = arith.constant 0 : index
    %344 = vector.load %arg15[%343, %c0_107, %c0_108] : memref<8x8x128xf32, #tpu.memory_space<vmem>>, vector<1x8x128xf32>
    %345 = vector.shape_cast %344 : vector<1x8x128xf32> to vector<8x128xf32>
    %346 = vector.shape_cast %342 : vector<8x128xf32> to vector<1x8x128xf32>
    tpu.vector_store %arg15[%343, %c0_107, %c0_108], %346 {strides = array<i32>} : memref<8x8x128xf32, #tpu.memory_space<vmem>>, vector<1x8x128xf32>,
    %c1_i32_109 = arith.constant 1 : i32
    %cst_110 = arith.constant dense<0.000000e+00> : vector<8x384xf32>
    %347 = tpu.matmul %342, %308, %cst_110 {dimension_numbers = #tpu.dot_dimension_numbers<[1], [0], [0], [1], [0, 0, 1, 1], [], []>} : vector<8x128xf32>, vector<128x384xf32>, vector<8x384xf32> -> vector<8x384xf32>
    %348 = arith.index_cast %c1_i32_109 : i32 to index
    %c0_111 = arith.constant 0 : index
    %c0_112 = arith.constant 0 : index
    %349 = vector.load %arg14[%348, %c0_111, %c0_112] : memref<8x8x384xf32, #tpu.memory_space<vmem>>, vector<1x8x384xf32>
    %350 = vector.shape_cast %349 : vector<1x8x384xf32> to vector<8x384xf32>
    %351 = vector.extract_strided_slice %350 {offsets = [0, 0], sizes = [8, 128], strides = [1, 1]} : vector<8x384xf32> to vector<8x128xf32>
    %352 = vector.extract_strided_slice %347 {offsets = [0, 0], sizes = [8, 128], strides = [1, 1]} : vector<8x384xf32> to vector<8x128xf32>
    %353 = arith.addf %351, %352 : vector<8x128xf32>
    %354 = arith.negf %353 : vector<8x128xf32>
    %355 = math.exp %354 : vector<8x128xf32>
    %cst_113 = arith.constant 1.000000e+00 : f32
    %356 = vector.broadcast %cst_113 : f32 to vector<8x128xf32>
    %357 = arith.addf %356, %355 : vector<8x128xf32>
    %358 = arith.divf %356, %357 : vector<8x128xf32>
    %359 = vector.extract_strided_slice %350 {offsets = [0, 128], sizes = [8, 128], strides = [1, 1]} : vector<8x384xf32> to vector<8x128xf32>
    %360 = vector.extract_strided_slice %347 {offsets = [0, 128], sizes = [8, 128], strides = [1, 1]} : vector<8x384xf32> to vector<8x128xf32>
    %361 = arith.addf %359, %360 : vector<8x128xf32>
    %362 = arith.negf %361 : vector<8x128xf32>
    %363 = math.exp %362 : vector<8x128xf32>
    %cst_114 = arith.constant 1.000000e+00 : f32
    %364 = vector.broadcast %cst_114 : f32 to vector<8x128xf32>
    %365 = arith.addf %364, %363 : vector<8x128xf32>
    %366 = arith.divf %364, %365 : vector<8x128xf32>
    %367 = vector.extract_strided_slice %350 {offsets = [0, 256], sizes = [8, 128], strides = [1, 1]} : vector<8x384xf32> to vector<8x128xf32>
    %368 = vector.extract_strided_slice %347 {offsets = [0, 256], sizes = [8, 128], strides = [1, 1]} : vector<8x384xf32> to vector<8x128xf32>
    %369 = arith.addf %368, %311 : vector<8x128xf32>
    %370 = arith.mulf %358, %369 : vector<8x128xf32>
    %371 = arith.addf %367, %370 : vector<8x128xf32>
    %372 = math.tanh %371 : vector<8x128xf32>
    %cst_115 = arith.constant 1.000000e+00 : f32
    %373 = vector.broadcast %cst_115 : f32 to vector<8x128xf32>
    %374 = arith.subf %373, %366 : vector<8x128xf32>
    %375 = arith.mulf %374, %372 : vector<8x128xf32>
    %376 = arith.mulf %366, %342 : vector<8x128xf32>
    %377 = arith.addf %375, %376 : vector<8x128xf32>
    %378 = arith.index_cast %c1_i32_109 : i32 to index
    %c0_116 = arith.constant 0 : index
    %c0_117 = arith.constant 0 : index
    %379 = vector.load %arg15[%378, %c0_116, %c0_117] : memref<8x8x128xf32, #tpu.memory_space<vmem>>, vector<1x8x128xf32>
    %380 = vector.shape_cast %379 : vector<1x8x128xf32> to vector<8x128xf32>
    %381 = vector.shape_cast %377 : vector<8x128xf32> to vector<1x8x128xf32>
    tpu.vector_store %arg15[%378, %c0_116, %c0_117], %381 {strides = array<i32>} : memref<8x8x128xf32, #tpu.memory_space<vmem>>, vector<1x8x128xf32>,
    %c2_i32_118 = arith.constant 2 : i32
    %cst_119 = arith.constant dense<0.000000e+00> : vector<8x384xf32>
    %382 = tpu.matmul %377, %308, %cst_119 {dimension_numbers = #tpu.dot_dimension_numbers<[1], [0], [0], [1], [0, 0, 1, 1], [], []>} : vector<8x128xf32>, vector<128x384xf32>, vector<8x384xf32> -> vector<8x384xf32>
    %383 = arith.index_cast %c2_i32_118 : i32 to index
    %c0_120 = arith.constant 0 : index
    %c0_121 = arith.constant 0 : index
    %384 = vector.load %arg14[%383, %c0_120, %c0_121] : memref<8x8x384xf32, #tpu.memory_space<vmem>>, vector<1x8x384xf32>
    %385 = vector.shape_cast %384 : vector<1x8x384xf32> to vector<8x384xf32>
    %386 = vector.extract_strided_slice %385 {offsets = [0, 0], sizes = [8, 128], strides = [1, 1]} : vector<8x384xf32> to vector<8x128xf32>
    %387 = vector.extract_strided_slice %382 {offsets = [0, 0], sizes = [8, 128], strides = [1, 1]} : vector<8x384xf32> to vector<8x128xf32>
    %388 = arith.addf %386, %387 : vector<8x128xf32>
    %389 = arith.negf %388 : vector<8x128xf32>
    %390 = math.exp %389 : vector<8x128xf32>
    %cst_122 = arith.constant 1.000000e+00 : f32
    %391 = vector.broadcast %cst_122 : f32 to vector<8x128xf32>
    %392 = arith.addf %391, %390 : vector<8x128xf32>
    %393 = arith.divf %391, %392 : vector<8x128xf32>
    %394 = vector.extract_strided_slice %385 {offsets = [0, 128], sizes = [8, 128], strides = [1, 1]} : vector<8x384xf32> to vector<8x128xf32>
    %395 = vector.extract_strided_slice %382 {offsets = [0, 128], sizes = [8, 128], strides = [1, 1]} : vector<8x384xf32> to vector<8x128xf32>
    %396 = arith.addf %394, %395 : vector<8x128xf32>
    %397 = arith.negf %396 : vector<8x128xf32>
    %398 = math.exp %397 : vector<8x128xf32>
    %cst_123 = arith.constant 1.000000e+00 : f32
    %399 = vector.broadcast %cst_123 : f32 to vector<8x128xf32>
    %400 = arith.addf %399, %398 : vector<8x128xf32>
    %401 = arith.divf %399, %400 : vector<8x128xf32>
    %402 = vector.extract_strided_slice %385 {offsets = [0, 256], sizes = [8, 128], strides = [1, 1]} : vector<8x384xf32> to vector<8x128xf32>
    %403 = vector.extract_strided_slice %382 {offsets = [0, 256], sizes = [8, 128], strides = [1, 1]} : vector<8x384xf32> to vector<8x128xf32>
    %404 = arith.addf %403, %311 : vector<8x128xf32>
    %405 = arith.mulf %393, %404 : vector<8x128xf32>
    %406 = arith.addf %402, %405 : vector<8x128xf32>
    %407 = math.tanh %406 : vector<8x128xf32>
    %cst_124 = arith.constant 1.000000e+00 : f32
    %408 = vector.broadcast %cst_124 : f32 to vector<8x128xf32>
    %409 = arith.subf %408, %401 : vector<8x128xf32>
    %410 = arith.mulf %409, %407 : vector<8x128xf32>
    %411 = arith.mulf %401, %377 : vector<8x128xf32>
    %412 = arith.addf %410, %411 : vector<8x128xf32>
    %413 = arith.index_cast %c2_i32_118 : i32 to index
    %c0_125 = arith.constant 0 : index
    %c0_126 = arith.constant 0 : index
    %414 = vector.load %arg15[%413, %c0_125, %c0_126] : memref<8x8x128xf32, #tpu.memory_space<vmem>>, vector<1x8x128xf32>
    %415 = vector.shape_cast %414 : vector<1x8x128xf32> to vector<8x128xf32>
    %416 = vector.shape_cast %412 : vector<8x128xf32> to vector<1x8x128xf32>
    tpu.vector_store %arg15[%413, %c0_125, %c0_126], %416 {strides = array<i32>} : memref<8x8x128xf32, #tpu.memory_space<vmem>>, vector<1x8x128xf32>,
    %c3_i32_127 = arith.constant 3 : i32
    %cst_128 = arith.constant dense<0.000000e+00> : vector<8x384xf32>
    %417 = tpu.matmul %412, %308, %cst_128 {dimension_numbers = #tpu.dot_dimension_numbers<[1], [0], [0], [1], [0, 0, 1, 1], [], []>} : vector<8x128xf32>, vector<128x384xf32>, vector<8x384xf32> -> vector<8x384xf32>
    %418 = arith.index_cast %c3_i32_127 : i32 to index
    %c0_129 = arith.constant 0 : index
    %c0_130 = arith.constant 0 : index
    %419 = vector.load %arg14[%418, %c0_129, %c0_130] : memref<8x8x384xf32, #tpu.memory_space<vmem>>, vector<1x8x384xf32>
    %420 = vector.shape_cast %419 : vector<1x8x384xf32> to vector<8x384xf32>
    %421 = vector.extract_strided_slice %420 {offsets = [0, 0], sizes = [8, 128], strides = [1, 1]} : vector<8x384xf32> to vector<8x128xf32>
    %422 = vector.extract_strided_slice %417 {offsets = [0, 0], sizes = [8, 128], strides = [1, 1]} : vector<8x384xf32> to vector<8x128xf32>
    %423 = arith.addf %421, %422 : vector<8x128xf32>
    %424 = arith.negf %423 : vector<8x128xf32>
    %425 = math.exp %424 : vector<8x128xf32>
    %cst_131 = arith.constant 1.000000e+00 : f32
    %426 = vector.broadcast %cst_131 : f32 to vector<8x128xf32>
    %427 = arith.addf %426, %425 : vector<8x128xf32>
    %428 = arith.divf %426, %427 : vector<8x128xf32>
    %429 = vector.extract_strided_slice %420 {offsets = [0, 128], sizes = [8, 128], strides = [1, 1]} : vector<8x384xf32> to vector<8x128xf32>
    %430 = vector.extract_strided_slice %417 {offsets = [0, 128], sizes = [8, 128], strides = [1, 1]} : vector<8x384xf32> to vector<8x128xf32>
    %431 = arith.addf %429, %430 : vector<8x128xf32>
    %432 = arith.negf %431 : vector<8x128xf32>
    %433 = math.exp %432 : vector<8x128xf32>
    %cst_132 = arith.constant 1.000000e+00 : f32
    %434 = vector.broadcast %cst_132 : f32 to vector<8x128xf32>
    %435 = arith.addf %434, %433 : vector<8x128xf32>
    %436 = arith.divf %434, %435 : vector<8x128xf32>
    %437 = vector.extract_strided_slice %420 {offsets = [0, 256], sizes = [8, 128], strides = [1, 1]} : vector<8x384xf32> to vector<8x128xf32>
    %438 = vector.extract_strided_slice %417 {offsets = [0, 256], sizes = [8, 128], strides = [1, 1]} : vector<8x384xf32> to vector<8x128xf32>
    %439 = arith.addf %438, %311 : vector<8x128xf32>
    %440 = arith.mulf %428, %439 : vector<8x128xf32>
    %441 = arith.addf %437, %440 : vector<8x128xf32>
    %442 = math.tanh %441 : vector<8x128xf32>
    %cst_133 = arith.constant 1.000000e+00 : f32
    %443 = vector.broadcast %cst_133 : f32 to vector<8x128xf32>
    %444 = arith.subf %443, %436 : vector<8x128xf32>
    %445 = arith.mulf %444, %442 : vector<8x128xf32>
    %446 = arith.mulf %436, %412 : vector<8x128xf32>
    %447 = arith.addf %445, %446 : vector<8x128xf32>
    %448 = arith.index_cast %c3_i32_127 : i32 to index
    %c0_134 = arith.constant 0 : index
    %c0_135 = arith.constant 0 : index
    %449 = vector.load %arg15[%448, %c0_134, %c0_135] : memref<8x8x128xf32, #tpu.memory_space<vmem>>, vector<1x8x128xf32>
    %450 = vector.shape_cast %449 : vector<1x8x128xf32> to vector<8x128xf32>
    %451 = vector.shape_cast %447 : vector<8x128xf32> to vector<1x8x128xf32>
    tpu.vector_store %arg15[%448, %c0_134, %c0_135], %451 {strides = array<i32>} : memref<8x8x128xf32, #tpu.memory_space<vmem>>, vector<1x8x128xf32>,
    %c4_i32_136 = arith.constant 4 : i32
    %cst_137 = arith.constant dense<0.000000e+00> : vector<8x384xf32>
    %452 = tpu.matmul %447, %308, %cst_137 {dimension_numbers = #tpu.dot_dimension_numbers<[1], [0], [0], [1], [0, 0, 1, 1], [], []>} : vector<8x128xf32>, vector<128x384xf32>, vector<8x384xf32> -> vector<8x384xf32>
    %453 = arith.index_cast %c4_i32_136 : i32 to index
    %c0_138 = arith.constant 0 : index
    %c0_139 = arith.constant 0 : index
    %454 = vector.load %arg14[%453, %c0_138, %c0_139] : memref<8x8x384xf32, #tpu.memory_space<vmem>>, vector<1x8x384xf32>
    %455 = vector.shape_cast %454 : vector<1x8x384xf32> to vector<8x384xf32>
    %456 = vector.extract_strided_slice %455 {offsets = [0, 0], sizes = [8, 128], strides = [1, 1]} : vector<8x384xf32> to vector<8x128xf32>
    %457 = vector.extract_strided_slice %452 {offsets = [0, 0], sizes = [8, 128], strides = [1, 1]} : vector<8x384xf32> to vector<8x128xf32>
    %458 = arith.addf %456, %457 : vector<8x128xf32>
    %459 = arith.negf %458 : vector<8x128xf32>
    %460 = math.exp %459 : vector<8x128xf32>
    %cst_140 = arith.constant 1.000000e+00 : f32
    %461 = vector.broadcast %cst_140 : f32 to vector<8x128xf32>
    %462 = arith.addf %461, %460 : vector<8x128xf32>
    %463 = arith.divf %461, %462 : vector<8x128xf32>
    %464 = vector.extract_strided_slice %455 {offsets = [0, 128], sizes = [8, 128], strides = [1, 1]} : vector<8x384xf32> to vector<8x128xf32>
    %465 = vector.extract_strided_slice %452 {offsets = [0, 128], sizes = [8, 128], strides = [1, 1]} : vector<8x384xf32> to vector<8x128xf32>
    %466 = arith.addf %464, %465 : vector<8x128xf32>
    %467 = arith.negf %466 : vector<8x128xf32>
    %468 = math.exp %467 : vector<8x128xf32>
    %cst_141 = arith.constant 1.000000e+00 : f32
    %469 = vector.broadcast %cst_141 : f32 to vector<8x128xf32>
    %470 = arith.addf %469, %468 : vector<8x128xf32>
    %471 = arith.divf %469, %470 : vector<8x128xf32>
    %472 = vector.extract_strided_slice %455 {offsets = [0, 256], sizes = [8, 128], strides = [1, 1]} : vector<8x384xf32> to vector<8x128xf32>
    %473 = vector.extract_strided_slice %452 {offsets = [0, 256], sizes = [8, 128], strides = [1, 1]} : vector<8x384xf32> to vector<8x128xf32>
    %474 = arith.addf %473, %311 : vector<8x128xf32>
    %475 = arith.mulf %463, %474 : vector<8x128xf32>
    %476 = arith.addf %472, %475 : vector<8x128xf32>
    %477 = math.tanh %476 : vector<8x128xf32>
    %cst_142 = arith.constant 1.000000e+00 : f32
    %478 = vector.broadcast %cst_142 : f32 to vector<8x128xf32>
    %479 = arith.subf %478, %471 : vector<8x128xf32>
    %480 = arith.mulf %479, %477 : vector<8x128xf32>
    %481 = arith.mulf %471, %447 : vector<8x128xf32>
    %482 = arith.addf %480, %481 : vector<8x128xf32>
    %483 = arith.index_cast %c4_i32_136 : i32 to index
    %c0_143 = arith.constant 0 : index
    %c0_144 = arith.constant 0 : index
    %484 = vector.load %arg15[%483, %c0_143, %c0_144] : memref<8x8x128xf32, #tpu.memory_space<vmem>>, vector<1x8x128xf32>
    %485 = vector.shape_cast %484 : vector<1x8x128xf32> to vector<8x128xf32>
    %486 = vector.shape_cast %482 : vector<8x128xf32> to vector<1x8x128xf32>
    tpu.vector_store %arg15[%483, %c0_143, %c0_144], %486 {strides = array<i32>} : memref<8x8x128xf32, #tpu.memory_space<vmem>>, vector<1x8x128xf32>,
    %c5_i32_145 = arith.constant 5 : i32
    %cst_146 = arith.constant dense<0.000000e+00> : vector<8x384xf32>
    %487 = tpu.matmul %482, %308, %cst_146 {dimension_numbers = #tpu.dot_dimension_numbers<[1], [0], [0], [1], [0, 0, 1, 1], [], []>} : vector<8x128xf32>, vector<128x384xf32>, vector<8x384xf32> -> vector<8x384xf32>
    %488 = arith.index_cast %c5_i32_145 : i32 to index
    %c0_147 = arith.constant 0 : index
    %c0_148 = arith.constant 0 : index
    %489 = vector.load %arg14[%488, %c0_147, %c0_148] : memref<8x8x384xf32, #tpu.memory_space<vmem>>, vector<1x8x384xf32>
    %490 = vector.shape_cast %489 : vector<1x8x384xf32> to vector<8x384xf32>
    %491 = vector.extract_strided_slice %490 {offsets = [0, 0], sizes = [8, 128], strides = [1, 1]} : vector<8x384xf32> to vector<8x128xf32>
    %492 = vector.extract_strided_slice %487 {offsets = [0, 0], sizes = [8, 128], strides = [1, 1]} : vector<8x384xf32> to vector<8x128xf32>
    %493 = arith.addf %491, %492 : vector<8x128xf32>
    %494 = arith.negf %493 : vector<8x128xf32>
    %495 = math.exp %494 : vector<8x128xf32>
    %cst_149 = arith.constant 1.000000e+00 : f32
    %496 = vector.broadcast %cst_149 : f32 to vector<8x128xf32>
    %497 = arith.addf %496, %495 : vector<8x128xf32>
    %498 = arith.divf %496, %497 : vector<8x128xf32>
    %499 = vector.extract_strided_slice %490 {offsets = [0, 128], sizes = [8, 128], strides = [1, 1]} : vector<8x384xf32> to vector<8x128xf32>
    %500 = vector.extract_strided_slice %487 {offsets = [0, 128], sizes = [8, 128], strides = [1, 1]} : vector<8x384xf32> to vector<8x128xf32>
    %501 = arith.addf %499, %500 : vector<8x128xf32>
    %502 = arith.negf %501 : vector<8x128xf32>
    %503 = math.exp %502 : vector<8x128xf32>
    %cst_150 = arith.constant 1.000000e+00 : f32
    %504 = vector.broadcast %cst_150 : f32 to vector<8x128xf32>
    %505 = arith.addf %504, %503 : vector<8x128xf32>
    %506 = arith.divf %504, %505 : vector<8x128xf32>
    %507 = vector.extract_strided_slice %490 {offsets = [0, 256], sizes = [8, 128], strides = [1, 1]} : vector<8x384xf32> to vector<8x128xf32>
    %508 = vector.extract_strided_slice %487 {offsets = [0, 256], sizes = [8, 128], strides = [1, 1]} : vector<8x384xf32> to vector<8x128xf32>
    %509 = arith.addf %508, %311 : vector<8x128xf32>
    %510 = arith.mulf %498, %509 : vector<8x128xf32>
    %511 = arith.addf %507, %510 : vector<8x128xf32>
    %512 = math.tanh %511 : vector<8x128xf32>
    %cst_151 = arith.constant 1.000000e+00 : f32
    %513 = vector.broadcast %cst_151 : f32 to vector<8x128xf32>
    %514 = arith.subf %513, %506 : vector<8x128xf32>
    %515 = arith.mulf %514, %512 : vector<8x128xf32>
    %516 = arith.mulf %506, %482 : vector<8x128xf32>
    %517 = arith.addf %515, %516 : vector<8x128xf32>
    %518 = arith.index_cast %c5_i32_145 : i32 to index
    %c0_152 = arith.constant 0 : index
    %c0_153 = arith.constant 0 : index
    %519 = vector.load %arg15[%518, %c0_152, %c0_153] : memref<8x8x128xf32, #tpu.memory_space<vmem>>, vector<1x8x128xf32>
    %520 = vector.shape_cast %519 : vector<1x8x128xf32> to vector<8x128xf32>
    %521 = vector.shape_cast %517 : vector<8x128xf32> to vector<1x8x128xf32>
    tpu.vector_store %arg15[%518, %c0_152, %c0_153], %521 {strides = array<i32>} : memref<8x8x128xf32, #tpu.memory_space<vmem>>, vector<1x8x128xf32>,
    %c6_i32_154 = arith.constant 6 : i32
    %cst_155 = arith.constant dense<0.000000e+00> : vector<8x384xf32>
    %522 = tpu.matmul %517, %308, %cst_155 {dimension_numbers = #tpu.dot_dimension_numbers<[1], [0], [0], [1], [0, 0, 1, 1], [], []>} : vector<8x128xf32>, vector<128x384xf32>, vector<8x384xf32> -> vector<8x384xf32>
    %523 = arith.index_cast %c6_i32_154 : i32 to index
    %c0_156 = arith.constant 0 : index
    %c0_157 = arith.constant 0 : index
    %524 = vector.load %arg14[%523, %c0_156, %c0_157] : memref<8x8x384xf32, #tpu.memory_space<vmem>>, vector<1x8x384xf32>
    %525 = vector.shape_cast %524 : vector<1x8x384xf32> to vector<8x384xf32>
    %526 = vector.extract_strided_slice %525 {offsets = [0, 0], sizes = [8, 128], strides = [1, 1]} : vector<8x384xf32> to vector<8x128xf32>
    %527 = vector.extract_strided_slice %522 {offsets = [0, 0], sizes = [8, 128], strides = [1, 1]} : vector<8x384xf32> to vector<8x128xf32>
    %528 = arith.addf %526, %527 : vector<8x128xf32>
    %529 = arith.negf %528 : vector<8x128xf32>
    %530 = math.exp %529 : vector<8x128xf32>
    %cst_158 = arith.constant 1.000000e+00 : f32
    %531 = vector.broadcast %cst_158 : f32 to vector<8x128xf32>
    %532 = arith.addf %531, %530 : vector<8x128xf32>
    %533 = arith.divf %531, %532 : vector<8x128xf32>
    %534 = vector.extract_strided_slice %525 {offsets = [0, 128], sizes = [8, 128], strides = [1, 1]} : vector<8x384xf32> to vector<8x128xf32>
    %535 = vector.extract_strided_slice %522 {offsets = [0, 128], sizes = [8, 128], strides = [1, 1]} : vector<8x384xf32> to vector<8x128xf32>
    %536 = arith.addf %534, %535 : vector<8x128xf32>
    %537 = arith.negf %536 : vector<8x128xf32>
    %538 = math.exp %537 : vector<8x128xf32>
    %cst_159 = arith.constant 1.000000e+00 : f32
    %539 = vector.broadcast %cst_159 : f32 to vector<8x128xf32>
    %540 = arith.addf %539, %538 : vector<8x128xf32>
    %541 = arith.divf %539, %540 : vector<8x128xf32>
    %542 = vector.extract_strided_slice %525 {offsets = [0, 256], sizes = [8, 128], strides = [1, 1]} : vector<8x384xf32> to vector<8x128xf32>
    %543 = vector.extract_strided_slice %522 {offsets = [0, 256], sizes = [8, 128], strides = [1, 1]} : vector<8x384xf32> to vector<8x128xf32>
    %544 = arith.addf %543, %311 : vector<8x128xf32>
    %545 = arith.mulf %533, %544 : vector<8x128xf32>
    %546 = arith.addf %542, %545 : vector<8x128xf32>
    %547 = math.tanh %546 : vector<8x128xf32>
    %cst_160 = arith.constant 1.000000e+00 : f32
    %548 = vector.broadcast %cst_160 : f32 to vector<8x128xf32>
    %549 = arith.subf %548, %541 : vector<8x128xf32>
    %550 = arith.mulf %549, %547 : vector<8x128xf32>
    %551 = arith.mulf %541, %517 : vector<8x128xf32>
    %552 = arith.addf %550, %551 : vector<8x128xf32>
    %553 = arith.index_cast %c6_i32_154 : i32 to index
    %c0_161 = arith.constant 0 : index
    %c0_162 = arith.constant 0 : index
    %554 = vector.load %arg15[%553, %c0_161, %c0_162] : memref<8x8x128xf32, #tpu.memory_space<vmem>>, vector<1x8x128xf32>
    %555 = vector.shape_cast %554 : vector<1x8x128xf32> to vector<8x128xf32>
    %556 = vector.shape_cast %552 : vector<8x128xf32> to vector<1x8x128xf32>
    tpu.vector_store %arg15[%553, %c0_161, %c0_162], %556 {strides = array<i32>} : memref<8x8x128xf32, #tpu.memory_space<vmem>>, vector<1x8x128xf32>,
    %c7_i32_163 = arith.constant 7 : i32
    %cst_164 = arith.constant dense<0.000000e+00> : vector<8x384xf32>
    %557 = tpu.matmul %552, %308, %cst_164 {dimension_numbers = #tpu.dot_dimension_numbers<[1], [0], [0], [1], [0, 0, 1, 1], [], []>} : vector<8x128xf32>, vector<128x384xf32>, vector<8x384xf32> -> vector<8x384xf32>
    %558 = arith.index_cast %c7_i32_163 : i32 to index
    %c0_165 = arith.constant 0 : index
    %c0_166 = arith.constant 0 : index
    %559 = vector.load %arg14[%558, %c0_165, %c0_166] : memref<8x8x384xf32, #tpu.memory_space<vmem>>, vector<1x8x384xf32>
    %560 = vector.shape_cast %559 : vector<1x8x384xf32> to vector<8x384xf32>
    %561 = vector.extract_strided_slice %560 {offsets = [0, 0], sizes = [8, 128], strides = [1, 1]} : vector<8x384xf32> to vector<8x128xf32>
    %562 = vector.extract_strided_slice %557 {offsets = [0, 0], sizes = [8, 128], strides = [1, 1]} : vector<8x384xf32> to vector<8x128xf32>
    %563 = arith.addf %561, %562 : vector<8x128xf32>
    %564 = arith.negf %563 : vector<8x128xf32>
    %565 = math.exp %564 : vector<8x128xf32>
    %cst_167 = arith.constant 1.000000e+00 : f32
    %566 = vector.broadcast %cst_167 : f32 to vector<8x128xf32>
    %567 = arith.addf %566, %565 : vector<8x128xf32>
    %568 = arith.divf %566, %567 : vector<8x128xf32>
    %569 = vector.extract_strided_slice %560 {offsets = [0, 128], sizes = [8, 128], strides = [1, 1]} : vector<8x384xf32> to vector<8x128xf32>
    %570 = vector.extract_strided_slice %557 {offsets = [0, 128], sizes = [8, 128], strides = [1, 1]} : vector<8x384xf32> to vector<8x128xf32>
    %571 = arith.addf %569, %570 : vector<8x128xf32>
    %572 = arith.negf %571 : vector<8x128xf32>
    %573 = math.exp %572 : vector<8x128xf32>
    %cst_168 = arith.constant 1.000000e+00 : f32
    %574 = vector.broadcast %cst_168 : f32 to vector<8x128xf32>
    %575 = arith.addf %574, %573 : vector<8x128xf32>
    %576 = arith.divf %574, %575 : vector<8x128xf32>
    %577 = vector.extract_strided_slice %560 {offsets = [0, 256], sizes = [8, 128], strides = [1, 1]} : vector<8x384xf32> to vector<8x128xf32>
    %578 = vector.extract_strided_slice %557 {offsets = [0, 256], sizes = [8, 128], strides = [1, 1]} : vector<8x384xf32> to vector<8x128xf32>
    %579 = arith.addf %578, %311 : vector<8x128xf32>
    %580 = arith.mulf %568, %579 : vector<8x128xf32>
    %581 = arith.addf %577, %580 : vector<8x128xf32>
    %582 = math.tanh %581 : vector<8x128xf32>
    %cst_169 = arith.constant 1.000000e+00 : f32
    %583 = vector.broadcast %cst_169 : f32 to vector<8x128xf32>
    %584 = arith.subf %583, %576 : vector<8x128xf32>
    %585 = arith.mulf %584, %582 : vector<8x128xf32>
    %586 = arith.mulf %576, %552 : vector<8x128xf32>
    %587 = arith.addf %585, %586 : vector<8x128xf32>
    %588 = arith.index_cast %c7_i32_163 : i32 to index
    %c0_170 = arith.constant 0 : index
    %c0_171 = arith.constant 0 : index
    %589 = vector.load %arg15[%588, %c0_170, %c0_171] : memref<8x8x128xf32, #tpu.memory_space<vmem>>, vector<1x8x128xf32>
    %590 = vector.shape_cast %589 : vector<1x8x128xf32> to vector<8x128xf32>
    %591 = vector.shape_cast %587 : vector<8x128xf32> to vector<1x8x128xf32>
    tpu.vector_store %arg15[%588, %c0_170, %c0_171], %591 {strides = array<i32>} : memref<8x8x128xf32, #tpu.memory_space<vmem>>, vector<1x8x128xf32>,
    %c8_i32_172 = arith.constant 8 : i32
    %c0_173 = arith.constant 0 : index
    %c0_174 = arith.constant 0 : index
    %592 = vector.load %arg17[%c0_173, %c0_174] : memref<8x128xf32, #tpu.memory_space<vmem>>, vector<8x128xf32>
    tpu.vector_store %arg17[%c0_173, %c0_174], %587 {strides = array<i32>} : memref<8x128xf32, #tpu.memory_space<vmem>>, vector<8x128xf32>,
    %c0_175 = arith.constant 0 : index
    %c0_176 = arith.constant 0 : index
    %c0_177 = arith.constant 0 : index
    %593 = vector.load %arg15[%c0_175, %c0_176, %c0_177] : memref<8x8x128xf32, #tpu.memory_space<vmem>>, vector<8x8x128xf32>
    %c0_178 = arith.constant 0 : index
    %c0_179 = arith.constant 0 : index
    %594 = vector.load %arg11[%c0_178, %c0_179] : memref<1x128xf32, #tpu.memory_space<vmem>>, vector<1x128xf32>
    %595 = vector.shape_cast %594 : vector<1x128xf32> to vector<1x1x128xf32>
    %596 = vector.broadcast %595 : vector<1x1x128xf32> to vector<8x8x128xf32>
    %597 = arith.mulf %593, %596 : vector<8x8x128xf32>
    %cst_180 = arith.constant dense<0.000000e+00> : vector<8x8xf32>
    %598 = vector.multi_reduction <add>, %597, %cst_180 [2] : vector<8x8x128xf32> to vector<8x8xf32>
    %c0_181 = arith.constant 0 : index
    %c0_182 = arith.constant 0 : index
    %599 = vector.load %arg12[%c0_181, %c0_182] : memref<1x1xf32, #tpu.memory_space<vmem>>, vector<1x1xf32>
    %600 = vector.broadcast %599 : vector<1x1xf32> to vector<8x8xf32>
    %601 = arith.addf %598, %600 : vector<8x8xf32>
    %602 = tpu.transpose %601, [1, 0] : vector<8x8xf32> -> vector<8x8xf32>
    %c0_183 = arith.constant 0 : index
    %c0_184 = arith.constant 0 : index
    %c0_185 = arith.constant 0 : index
    %603 = vector.load %arg13[%c0_183, %c0_184, %c0_185] : memref<1x8x8xf32, #tpu.memory_space<vmem>>, vector<1x8x8xf32>
    %604 = vector.shape_cast %603 : vector<1x8x8xf32> to vector<8x8xf32>
    %605 = vector.shape_cast %602 : vector<8x8xf32> to vector<1x8x8xf32>
    tpu.vector_store %arg13[%c0_183, %c0_184, %c0_185], %605 {strides = array<i32>} : memref<1x8x8xf32, #tpu.memory_space<vmem>>, vector<1x8x8xf32>,
    return
  }
  func.func @transform_0(%arg0: i32, %arg1: i32) -> (i32, i32, i32) {
    %c0_i32 = arith.constant 0 : i32
    %c0_i32_0 = arith.constant 0 : i32
    return %arg1, %arg0, %c0_i32 : i32, i32, i32
  }
  func.func @transform_1(%arg0: i32, %arg1: i32) -> (i32, i32) {
    %c0_i32 = arith.constant 0 : i32
    %c0_i32_0 = arith.constant 0 : i32
    %c0_i32_1 = arith.constant 0 : i32
    return %c0_i32, %c0_i32_0 : i32, i32
  }
  func.func @transform_2(%arg0: i32, %arg1: i32) -> (i32, i32) {
    %c0_i32 = arith.constant 0 : i32
    %c0_i32_0 = arith.constant 0 : i32
    %c0_i32_1 = arith.constant 0 : i32
    return %c0_i32, %c0_i32_0 : i32, i32
  }
  func.func @transform_3(%arg0: i32, %arg1: i32) -> (i32, i32) {
    %c0_i32 = arith.constant 0 : i32
    %c0_i32_0 = arith.constant 0 : i32
    %c0_i32_1 = arith.constant 0 : i32
    return %c0_i32, %c0_i32_0 : i32, i32
  }
  func.func @transform_4(%arg0: i32, %arg1: i32) -> (i32, i32) {
    %c0_i32 = arith.constant 0 : i32
    %c0_i32_0 = arith.constant 0 : i32
    %c0_i32_1 = arith.constant 0 : i32
    return %c0_i32, %c0_i32_0 : i32, i32
  }
  func.func @transform_5(%arg0: i32, %arg1: i32) -> (i32, i32) {
    %c0_i32 = arith.constant 0 : i32
    %c0_i32_0 = arith.constant 0 : i32
    %c0_i32_1 = arith.constant 0 : i32
    return %c0_i32, %c0_i32_0 : i32, i32
  }
  func.func @transform_6(%arg0: i32, %arg1: i32) -> (i32, i32) {
    %c0_i32 = arith.constant 0 : i32
    %c0_i32_0 = arith.constant 0 : i32
    %c0_i32_1 = arith.constant 0 : i32
    return %c0_i32, %c0_i32_0 : i32, i32
  }
  func.func @transform_7(%arg0: i32, %arg1: i32) -> (i32, i32) {
    %c0_i32 = arith.constant 0 : i32
    %c0_i32_0 = arith.constant 0 : i32
    %c0_i32_1 = arith.constant 0 : i32
    return %c0_i32, %c0_i32_0 : i32, i32
  }
  func.func @transform_8(%arg0: i32, %arg1: i32) -> (i32, i32) {
    %c0_i32 = arith.constant 0 : i32
    %c0_i32_0 = arith.constant 0 : i32
    %c0_i32_1 = arith.constant 0 : i32
    return %c0_i32, %c0_i32_0 : i32, i32
  }
  func.func @transform_9(%arg0: i32, %arg1: i32) -> (i32, i32) {
    %c0_i32 = arith.constant 0 : i32
    %c0_i32_0 = arith.constant 0 : i32
    %c0_i32_1 = arith.constant 0 : i32
    return %c0_i32, %c0_i32_0 : i32, i32
  }
  func.func @transform_10(%arg0: i32, %arg1: i32) -> (i32, i32) {
    %c0_i32 = arith.constant 0 : i32
    %c0_i32_0 = arith.constant 0 : i32
    %c0_i32_1 = arith.constant 0 : i32
    return %c0_i32, %c0_i32_0 : i32, i32
  }
  func.func @transform_11(%arg0: i32, %arg1: i32) -> (i32, i32, i32) {
    %c0_i32 = arith.constant 0 : i32
    %c0_i32_0 = arith.constant 0 : i32
    return %arg0, %c0_i32, %arg1 : i32, i32, i32
  }
}

</mosaic_0001>

<bundles_post_ra>
// kernel: tpu_custom_call.1
= control target key start
LH: loop header
LB: loop body
LE: loop exit
PB: predicated region body
PF: predicated region fallthrough
CT: control target
= control target key end

     0   :  { %s6944_s0 = inlined_call_operand.vmem [shape: f32[8,8,4], index: 0, kind: input, shape index: {}]   ;;  %s6945_s1 = inlined_call_operand.vmem [shape: f32[4,384], index: 1, kind: input, shape index: {}]   ;;  %s6946_s2 = inlined_call_operand.vmem [shape: f32[1,384], index: 2, kind: input, shape index: {}]   ;;  %s6947_s3 = inlined_call_operand.hbm [shape: f32[128,384], index: 3, kind: input, shape index: {}]   ;;  %s6948_s4 = inlined_call_operand.vmem [shape: f32[1,128], index: 4, kind: input, shape index: {}]   ;;  %s6949_s5 = inlined_call_operand.hbm [shape: f32[128,384], index: 5, kind: input, shape index: {}]   ;;  %s6950_s6 = inlined_call_operand.vmem [shape: f32[1,384], index: 6, kind: input, shape index: {}]   ;;  %s6951_s7 = inlined_call_operand.hbm [shape: f32[128,384], index: 7, kind: input, shape index: {}]   ;;  %s6952_s8 = inlined_call_operand.vmem [shape: f32[1,128], index: 8, kind: input, shape index: {}]   ;;  %s6953_s9 = inlined_call_operand.vmem [shape: f32[1,128], index: 9, kind: input, shape index: {}]   ;;  %s6954_s10 = inlined_call_operand.<no memory space> [shape: f32[1,1], index: 10, kind: input, shape index: {}]   ;;  %s6955_s11 = inlined_call_operand.hbm [shape: f32[1,8,8], index: 11, kind: output, shape index: {}]  }
   0x1   :  { %v16_v0 = vstv %s6954_s10 }
   0x2   :  { %17 = vst [vmem:[#allocation6] sm:$0x1] %v16_v0 }
   0x3   :  { %18 = vsyncpa [#allocation8], 0 }
   0x4   :  { %19 = vsyncpa [#allocation11], 0 }
   0x5   :  { %20 = vsyncpa [#allocation9], 0  ;;  %s5005_s19 = smov [#allocation10]   ;;  %s5006_s21 = smov [#allocation7]  }
   0x6   :  { %s46_s20 = sshll.u32 %s5005_s19, 4  ;;  %s32_s22 = sshll.u32 %s5006_s21, 4  ;;  %s47_s20 = int_to_ptr.vmem [resolvable:$true] %s46_s20  ;;  %s33_s22 = int_to_ptr.vmem [resolvable:$true] %s32_s22 }
   0x7   :  { %s4927_s23 = scalar_lea.vmem %s47_s20, 6144  ;;  %p4932_p1 = scmp.lt.s32.totalorder %s47_s20, %s47_s20 }
   0x8   :  { %p4928_p0 = scmp.ne.s32.totalorder %s47_s20, %s4927_s23  ;;  %p4933_p2 = scmp.lt.s32.totalorder %s4927_s23, %s4927_s23 }
   0xa   :  { %p4934_p3 = por %p4933_p2, %p4932_p1 }
   0xc   :  { %p4935_p4 = pnand %p4934_p3, %p4928_p0 }
   0xe   :  { %4938 = shalt.err (!%p4935_p4)
}
   0xf   :  { %s5007_s24 = smov 384   ;;  %s5008_s25 = smov 24  }
  0x10   :  { %52 = dma.hbm_to_vmem [thread:$0]  %s6949_s5, 6144, %s47_s20, [#allocation11], %s5007_s24, %s5007_s24, %s5008_s25  }
  0x11   :  { %s4947_s27 = scalar_lea.vmem %s33_s22, 6144  ;;  %p4952_p6 = scmp.lt.s32.totalorder %s33_s22, %s33_s22 }
  0x12   :  { %p4948_p5 = scmp.ne.s32.totalorder %s33_s22, %s4947_s27  ;;  %p4953_p7 = scmp.lt.s32.totalorder %s4947_s27, %s4947_s27 }
  0x14   :  { %p4954_p8 = por %p4953_p7, %p4952_p6 }
  0x16   :  { %p4955_p9 = pnand %p4954_p8, %p4948_p5 }
  0x18   :  { %4958 = shalt.err (!%p4955_p9)
}
  0x19   :  { %38 = dma.hbm_to_vmem [thread:$0]  %s6947_s3, 6144, %s33_s22, [#allocation8], %s5007_s24, %s5007_s24, %s5008_s25  }
  0x1a   :  { %s5009_s30 = smov [#allocation12]  }
  0x1b   :  { %s60_s12 = sshll.u32 %s5009_s30, 4  ;;  %s61_s12 = int_to_ptr.vmem [resolvable:$true] %s60_s12 }
  0x1c   :  { %s4967_s13 = scalar_lea.vmem %s61_s12, 6144  ;;  %p4972_p11 = scmp.lt.s32.totalorder %s61_s12, %s61_s12 }
  0x1d   :  { %p4968_p10 = scmp.ne.s32.totalorder %s61_s12, %s4967_s13  ;;  %p4973_p12 = scmp.lt.s32.totalorder %s4967_s13, %s4967_s13 }
  0x1f   :  { %p4974_p13 = por %p4973_p12, %p4972_p11 }
  0x21   :  { %p4975_p0 = pnand %p4974_p13, %p4968_p10 }
  0x23   :  { %4978 = shalt.err (!%p4975_p0)
}
  0x24   :  { %66 = dma.hbm_to_vmem [thread:$0]  %s6951_s7, 6144, %s61_s12, [#allocation11], %s5007_s24, %s5007_s24, %s5008_s25  }
  0x25   :  { %4999 = dma.done.wait [#allocation8], 6144  }
  0x26   :  { %5000 = vsyncadd [#allocation8], 4294961152 }
  0x27   :  { %5001 = dma.done.wait [#allocation11], 12288  }
  0x28   :  { %5002 = vsyncadd [#allocation11], 4294955008  ;;  %v6957_v1 = vmov 0.0   ;;  %v96_v2 = vld [vmem:[%s6945_s1] sm:$0xff]  ;;  %vm143_vm0 = vcmask 1043456   ;;  %vm118_vm1 = vcmask 31744   ;;  %v6956_v61 = vlaneseq }
  0x29   :  { %214 = vmatprep.mubr.f32.mxu0 %v6957_v1  ;;  %v88_v3 = vld [vmem:[%s6944_s0] sm:$0xff]  ;;  %v117_v4 = vcombine.high %v96_v2, %v96_v2  ;;  %v5094_v5 = vld [vmem:[#allocation7 + $0x170] sm:$0xff]  ;;  %v5097_v6 = vld [vmem:[#allocation7 + $0x168] sm:$0xff]  ;;  %vm5011_vm2 = vmmov 0   ;;  %vm3606_vm3 = vcmask 1041409   ;;  %vm3608_vm4 = vcmask 1042434  }
  0x2a   :  { %4033 = vmatprep.mubr.msk.f32.mxu1 %vm118_vm1, %v88_v3  ;;  %7017 = vst [vmem:[#allocation17_spill] sm:$0xff] %v5094_v5  ;;  %v5100_v7 = vld [vmem:[#allocation7 + $0x158] sm:$0xff]  ;;  %v5104_v8 = vld [vmem:[#allocation7 + $0x150] sm:$0xff]  ;;  %v89_v9 = vld [vmem:[%s6944_s0 + $0x8] sm:$0xff]  ;;  %v5395_v62 = vshrl.u32 %v6956_v61, 7  ;;  %vm3610_vm5 = vcmask 1043459  }
  0x2b   :  { %3671 = vmatprep.subr.msk.mxu0 %vm143_vm0, %v117_v4  ;;  %v5111_v10 = vld [vmem:[#allocation7 + $0x140] sm:$0xff]  ;;  %v5114_v11 = vld [vmem:[#allocation7 + $0x138] sm:$0xff]  ;;  %v5117_v12 = vld [vmem:[#allocation7 + $0x128] sm:$0xff]  ;;  %vm3612_vm6 = vcmask 1044484   ;;  %vm3614_vm7 = vcmask 1045509   ;;  %vm3616_vm8 = vcmask 1046534  }
  0x2c   :  { %3672 = vmatpush1.msk.msra.mxu0 %vm143_vm0, %v96_v2  ;;  %v5121_v13 = vld [vmem:[#allocation7 + $0x120] sm:$0xff]  ;;  %v5128_v14 = vld [vmem:[%s6944_s0 + $0x10] sm:$0xff]  ;;  %v5136_v17 = vld [vmem:[#allocation7 + $0xf8] sm:$0xff]  ;;  %7022 = vst [vmem:[#allocation22_spill] sm:$0xff] %v5395_v62  ;;  %v6963_v63 = vsub.s32 0, %v5395_v62  ;;  %vm3618_vm9 = vcmask 1047559  }
  0x2d   :  { %3673 = vmatmul.mubr.msk.f32.vlgmr.msra.gmra.mxu0 %vm118_vm1, %v88_v3  ;;  %448 = vmatprep.subr.mxu0 %v5094_v5  ;;  %v5130_v15 = vld [vmem:[#allocation7 + $0x110] sm:$0xff]  ;;  %v5133_v16 = vld [vmem:[#allocation7 + $0x108] sm:$0xff]  ;;  %v5153_v21 = vld [vmem:[#allocation7 + $0xe0] sm:$0xff]  ;;  %v6966_v3 = vsub.s32 1, %v5395_v62  ;;  %vm3653_vm10 = vcmask 64512  }
  0x2e   :  { %449 = vmatpush1.msra.mxu0 %v5097_v6  ;;  %220 = vmatprep.mubr.f32.mxu0 %v6957_v1  ;;  %v97_v18 = vld [vmem:[%s6945_s1 + $0x8] sm:$0xf]  ;;  %v5144_v19 = vld [vmem:[#allocation7 + $0xf0] sm:$0xff]  ;;  %v5156_v22 = vld [vmem:[#allocation7 + $0xd8] sm:$0xff] }
  0x2f   :  { %450 = vmatprep.subr.mxu0 %v5100_v7  ;;  %v5151_v20 = vld [vmem:[%s6944_s0 + $0x18] sm:$0xff]  ;;  %4031 = vmatprep.subr.msk.mxu1 %vm143_vm0, %v97_v18  ;;  %v5160_v23 = vld [vmem:[#allocation7 + $0xc8] sm:$0xff]  ;;  %v5166_v24 = vld [vmem:[#allocation7 + $0xc0] sm:$0xff] }
  0x30   :  { %451 = vmatpush1.msra.mxu0 %v5104_v8  ;;  %4032 = vmatpush3.msk.msra.mxu1 %vm143_vm0, %v97_v18  ;;  %v5173_v25 = vld [vmem:[%s6944_s0 + $0x20] sm:$0xff]  ;;  %v5175_v26 = vld [vmem:[#allocation7 + $0xb0] sm:$0xff]  ;;  %v5178_v27 = vld [vmem:[#allocation7 + $0xa8] sm:$0xff] }
  0x31   :  { %3674 = vmatmul.mubr.msk.f32.gmra.mxu0 %vm118_vm1, %v89_v9  ;;  %452 = vmatprep.subr.mxu0 %v5111_v10  ;;  %v5182_v28 = vld [vmem:[#allocation7 + $0x98] sm:$0xff]  ;;  %v5190_v30 = vld [vmem:[#allocation7 + $0x90] sm:$0xff]  ;;  %v5197_v31 = vld [vmem:[%s6944_s0 + $0x28] sm:$0xff] }
  0x32   :  { %453 = vmatpush1.msra.mxu0 %v5114_v11  ;;  %226 = vmatprep.mubr.f32.mxu0 %v6957_v1  ;;  %v5185_v29 = vld [vmem:[#allocation7 + $0x178] sm:$0xff]  ;;  %v5199_v32 = vld [vmem:[#allocation7 + $0x80] sm:$0xff]  ;;  %v5206_v34 = vld [vmem:[#allocation7 + $0x68] sm:$0xff] }
  0x33   :  { %454 = vmatprep.subr.mxu0 %v5117_v12  ;;  %4045 = vmatprep.subr.mxu1 %v6957_v1  ;;  %v5202_v33 = vld [vmem:[#allocation7 + $0x78] sm:$0xff]  ;;  %v5209_v35 = vld [vmem:[#allocation7 + $0x160] sm:$0xff]  ;;  %v94_v37 = vld [vmem:[%s6944_s0 + $0x30] sm:$0xff] }
  0x34   :  { %455 = vmatpush1.msra.mxu0 %v5121_v13  ;;  %4034 = vmatmul.mubr.msk.f32.vlgmr.msra.gmra.mxu1 %vm118_vm1, %v89_v9  ;;  %v5214_v36 = vld [vmem:[#allocation7 + $0x60] sm:$0xff]  ;;  %v5221_v38 = vld [vmem:[#allocation7 + $0x50] sm:$0xff]  ;;  %v5224_v39 = vld [vmem:[#allocation7 + $0x48] sm:$0xff] }
  0x35   :  { %3675 = vmatmul.mubr.msk.f32.gmra.mxu0 %vm118_vm1, %v5128_v14  ;;  %456 = vmatprep.subr.mxu0 %v5130_v15  ;;  %v5228_v40 = vld [vmem:[#allocation7 + $0x38] sm:$0xff]  ;;  %v5231_v41 = vld [vmem:[#allocation7 + $0x148] sm:$0xff]  ;;  %v5235_v42 = vld [vmem:[#allocation7 + $0x30] sm:$0xff] }
  0x36   :  { %457 = vmatpush1.msra.mxu0 %v5133_v16  ;;  %232 = vmatprep.mubr.f32.mxu0 %v6957_v1  ;;  %v95_v43 = vld [vmem:[%s6944_s0 + $0x38] sm:$0xff]  ;;  %v5242_v44 = vld [vmem:[#allocation7 + $0x20] sm:$0xff]  ;;  %v5249_v46 = vld [vmem:[#allocation7 + $0x8] sm:$0xff] }
  0x37   :  { %458 = vmatprep.subr.mxu0 %v5136_v17  ;;  %4046 = vmatpush3.msra.mxu1 %v5185_v29  ;;  %v5245_v45 = vld [vmem:[#allocation7 + $0x18] sm:$0xff]  ;;  %7018 = vst [vmem:[#allocation18_spill] sm:$0xff] %v5249_v46  ;;  %v5252_v47 = vld [vmem:[#allocation7 + $0x130] sm:$0xff]  ;;  %v5256_v48 = vld [vmem:[#allocation7] sm:$0xff] }
  0x38   :  { %459 = vmatpush1.msra.mxu0 %v5144_v19  ;;  %4047 = vmatprep.subr.mxu1 %v6957_v1  ;;  %7019 = vst [vmem:[#allocation19_spill] sm:$0xff] %v5256_v48  ;;  %v5260_v49 = vld [vmem:[#allocation7 + $0x118] sm:$0xff]  ;;  %v5266_v50 = vld [vmem:[#allocation7 + $0x100] sm:$0xff]  ;;  %v5271_v51 = vld [vmem:[#allocation7 + $0xe8] sm:$0xff] }
  0x39   :  { %3676 = vmatmul.mubr.msk.f32.gmra.mxu0 %vm118_vm1, %v5151_v20  ;;  %460 = vmatprep.subr.mxu0 %v5153_v21  ;;  %v5278_v52 = vld [vmem:[#allocation7 + $0xd0] sm:$0xff]  ;;  %v5286_v53 = vld [vmem:[#allocation7 + $0xb8] sm:$0xff]  ;;  %v5292_v54 = vld [vmem:[#allocation7 + $0xa0] sm:$0xff] }
  0x3a   :  { %461 = vmatpush1.msra.mxu0 %v5156_v22  ;;  %238 = vmatprep.mubr.f32.mxu0 %v6957_v1  ;;  %v5299_v55 = vld [vmem:[#allocation7 + $0x88] sm:$0xff]  ;;  %v5305_v56 = vld [vmem:[#allocation7 + $0x70] sm:$0xff]  ;;  %v5312_v57 = vld [vmem:[#allocation7 + $0x58] sm:$0xff] }
  0x3b   :  { %462 = vmatprep.subr.mxu0 %v5160_v23  ;;  %4048 = vmatpush3.msra.mxu1 %v5209_v35  ;;  %v5318_v58 = vld [vmem:[#allocation7 + $0x40] sm:$0xff]  ;;  %v5324_v59 = vld [vmem:[#allocation7 + $0x28] sm:$0xff]  ;;  %v5330_v60 = vld [vmem:[#allocation7 + $0x10] sm:$0xff] }
  0x3c   :  { %463 = vmatpush1.msra.mxu0 %v5166_v24  ;;  %4049 = vmatprep.subr.mxu1 %v6957_v1  ;;  %7020 = vst [vmem:[#allocation20_spill] sm:$0xff] %v5324_v59  ;;  %7021 = vst [vmem:[#allocation21_spill] sm:$0xff] %v5330_v60  ;;  %v98_v0 = vld [vmem:[%s6946_s2] sm:$0x7] }
  0x3d   :  { %3677 = vmatmul.mubr.msk.f32.gmra.mxu0 %vm118_vm1, %v5173_v25  ;;  %464 = vmatprep.subr.mxu0 %v5175_v26  ;;  %v103_v9 = vrot.slane %v98_v0, %v6963_v63  ;;  %v107_v18 = vrot.slane %v98_v0, %v6966_v3 }
  0x3e   :  { %465 = vmatpush1.msra.mxu0 %v5178_v27  ;;  %244 = vmatprep.mubr.f32.mxu0 %v6957_v1 }
  0x3f   :  { %466 = vmatprep.subr.mxu0 %v5182_v28  ;;  %4050 = vmatpush3.msra.mxu1 %v5231_v41 }
  0x40   :  { %467 = vmatpush1.msra.mxu0 %v5190_v30  ;;  %4051 = vmatprep.subr.mxu1 %v6957_v1 }
  0x41   :  { %3678 = vmatmul.mubr.msk.f32.gmra.mxu0 %vm118_vm1, %v5197_v31  ;;  %468 = vmatprep.subr.mxu0 %v5199_v32 }
  0x42   :  { %469 = vmatpush1.msra.mxu0 %v5202_v33  ;;  %250 = vmatprep.mubr.f32.mxu0 %v6957_v1 }
  0x43   :  { %470 = vmatprep.subr.mxu0 %v5206_v34  ;;  %4052 = vmatpush3.msra.mxu1 %v5252_v47 }
  0x44   :  { %471 = vmatpush1.msra.mxu0 %v5214_v36  ;;  %4053 = vmatprep.subr.mxu1 %v6957_v1 }
  0x45   :  { %3679 = vmatmul.mubr.msk.f32.gmra.mxu0 %vm118_vm1, %v94_v37  ;;  %472 = vmatprep.subr.mxu0 %v5221_v38 }
  0x46   :  { %473 = vmatpush1.msra.mxu0 %v5224_v39  ;;  %256 = vmatprep.mubr.f32.mxu0 %v6957_v1 }
  0x47   :  { %474 = vmatprep.subr.mxu0 %v5228_v40  ;;  %4054 = vmatpush3.msra.mxu1 %v5260_v49 }
  0x48   :  { %475 = vmatpush1.msra.mxu0 %v5235_v42  ;;  %4055 = vmatprep.subr.mxu1 %v6957_v1 }
  0x49   :  { %3680 = vmatmul.mubr.msk.f32.gmra.mxu0 %vm118_vm1, %v95_v43  ;;  %476 = vmatprep.subr.mxu0 %v5242_v44 }
  0x4a   :  { %477 = vmatpush1.msra.mxu0 %v5245_v45  ;;  %512 = vmatprep.mubr.f32.mxu0 %v6957_v1 }
  0x4b   :  { %478 = vmatprep.subr.mxu0 %v5249_v46  ;;  %4036 = vmatprep.mubr.msk.f32.mxu1 %vm118_vm1, %v5128_v14 }
  0x4c   :  { %479 = vmatpush1.msra.mxu0 %v5256_v48  ;;  %4056 = vmatpush3.msra.mxu1 %v5266_v50 }
  0x4d   :  { %513 = vmatmul.mubr.f32.vlgmr.msra.gmra.mxu0 %v6957_v1  ;;  %615 = vmatprep.subr.mxu0 %v5094_v5 }
  0x4e   :  { %4057 = vmatprep.subr.mxu1 %v6957_v1  ;;  %4037 = vmatmul.mubr.msk.f32.gmra.mxu1 %vm118_vm1, %v5151_v20 }
  0x4f   :  { %4058 = vmatpush3.msra.mxu1 %v5271_v51  ;;  %4039 = vmatprep.mubr.msk.f32.mxu1 %vm118_vm1, %v5173_v25 }
  0x50   :  { %4059 = vmatprep.subr.mxu1 %v6957_v1  ;;  %616 = vmatpush1.msra.mxu0 %v5097_v6 }
  0x51   :  { %4060 = vmatpush3.msra.mxu1 %v5278_v52  ;;  %617 = vmatprep.subr.mxu0 %v5100_v7 }
  0x52   :  { %4061 = vmatprep.subr.mxu1 %v6957_v1  ;;  %4040 = vmatmul.mubr.msk.f32.gmra.mxu1 %vm118_vm1, %v5197_v31 }
  0x53   :  { %4062 = vmatpush3.msra.mxu1 %v5286_v53  ;;  %4042 = vmatprep.mubr.msk.f32.mxu1 %vm118_vm1, %v94_v37 }
  0x54   :  { %4063 = vmatprep.subr.mxu1 %v6957_v1  ;;  %618 = vmatpush1.msra.mxu0 %v5104_v8 }
  0x55   :  { %4064 = vmatpush3.msra.mxu1 %v5292_v54  ;;  %619 = vmatprep.subr.mxu0 %v5111_v10 }
  0x56   :  { %4065 = vmatprep.subr.mxu1 %v6957_v1  ;;  %4043 = vmatmul.mubr.msk.f32.gmra.mxu1 %vm118_vm1, %v95_v43  ;;  %v6973_v43 = vsub.s32 2, %v5395_v62 }
  0x57   :  { %4066 = vmatpush3.msra.mxu1 %v5299_v55  ;;  %4077 = vmatprep.mubr.msk.f32.mxu1 %vm5011_vm2, %v6957_v1 }
  0x58   :  { %4067 = vmatprep.subr.mxu1 %v6957_v1  ;;  %620 = vmatpush1.msra.mxu0 %v5114_v11  ;;  %v111_v63 = vrot.slane %v98_v0, %v6973_v43 }
  0x59   :  { %4068 = vmatpush3.msra.mxu1 %v5305_v56  ;;  %621 = vmatprep.subr.mxu0 %v5117_v12 }
  0x5a   :  { %4069 = vmatprep.subr.mxu1 %v6957_v1  ;;  %622 = vmatpush1.msra.mxu0 %v5121_v13 }
  0x5b   :  { %4070 = vmatpush3.msra.mxu1 %v5312_v57  ;;  %623 = vmatprep.subr.mxu0 %v5130_v15 }
  0x5c   :  { %4071 = vmatprep.subr.mxu1 %v6957_v1  ;;  %624 = vmatpush1.msra.mxu0 %v5133_v16 }
  0x5d   :  { %4072 = vmatpush3.msra.mxu1 %v5318_v58  ;;  %625 = vmatprep.subr.mxu0 %v5136_v17 }
  0x5e   :  { %4073 = vmatprep.subr.mxu1 %v6957_v1  ;;  %626 = vmatpush1.msra.mxu0 %v5144_v19 }
  0x5f   :  { %4074 = vmatpush3.msra.mxu1 %v5324_v59  ;;  %627 = vmatprep.subr.mxu0 %v5153_v21 }
  0x60   :  { %4075 = vmatprep.subr.mxu1 %v6957_v1  ;;  %628 = vmatpush1.msra.mxu0 %v5156_v22 }
  0x61   :  { %4076 = vmatpush3.msra.mxu1 %v5330_v60  ;;  %629 = vmatprep.subr.mxu0 %v5160_v23 }
  0x62   :  { %4078 = vmatmul.mubr.f32.vlgmr.msra.gmra.mxu1 %v6957_v1  ;;  %4080 = vmatprep.subr.mxu1 %v6957_v1 }
  0x63   :  { %4081 = vmatpush3.msra.mxu1 %v5185_v29  ;;  %630 = vmatpush1.msra.mxu0 %v5166_v24 }
  0x64   :  { %4082 = vmatprep.subr.mxu1 %v6957_v1  ;;  %631 = vmatprep.subr.mxu0 %v5175_v26 }
  0x65   :  { %4083 = vmatpush3.msra.mxu1 %v5209_v35  ;;  %632 = vmatpush1.msra.mxu0 %v5178_v27 }
  0x66   :  { %4084 = vmatprep.subr.mxu1 %v6957_v1  ;;  %633 = vmatprep.subr.mxu0 %v5182_v28 }
  0x67   :  { %4085 = vmatpush3.msra.mxu1 %v5231_v41  ;;  %634 = vmatpush1.msra.mxu0 %v5190_v30 }
  0x68   :  { %4086 = vmatprep.subr.mxu1 %v6957_v1  ;;  %635 = vmatprep.subr.mxu0 %v5199_v32 }
  0x69   :  { %4087 = vmatpush3.msra.mxu1 %v5252_v47  ;;  %636 = vmatpush1.msra.mxu0 %v5202_v33 }
  0x6a   :  { %4088 = vmatprep.subr.mxu1 %v6957_v1  ;;  %637 = vmatprep.subr.mxu0 %v5206_v34 }
  0x6b   :  { %4089 = vmatpush3.msra.mxu1 %v5260_v49  ;;  %638 = vmatpush1.msra.mxu0 %v5214_v36 }
  0x6c   :  { %4090 = vmatprep.subr.mxu1 %v6957_v1  ;;  %639 = vmatprep.subr.mxu0 %v5221_v38 }
  0x6d   :  { %4091 = vmatpush3.msra.mxu1 %v5266_v50  ;;  %640 = vmatpush1.msra.mxu0 %v5224_v39 }
  0x6e   :  { %4092 = vmatprep.subr.mxu1 %v6957_v1  ;;  %641 = vmatprep.subr.mxu0 %v5228_v40 }
  0x6f   :  { %4093 = vmatpush3.msra.mxu1 %v5271_v51  ;;  %642 = vmatpush1.msra.mxu0 %v5235_v42 }
  0x70   :  { %4094 = vmatprep.subr.mxu1 %v6957_v1  ;;  %643 = vmatprep.subr.mxu0 %v5242_v44 }
  0x71   :  { %4095 = vmatpush3.msra.mxu1 %v5278_v52  ;;  %644 = vmatpush1.msra.mxu0 %v5245_v45 }
  0x72   :  { %4096 = vmatprep.subr.mxu1 %v6957_v1  ;;  %645 = vmatprep.subr.mxu0 %v5249_v46 }
  0x73   :  { %4097 = vmatpush3.msra.mxu1 %v5286_v53  ;;  %646 = vmatpush1.msra.mxu0 %v5256_v48 }
  0x74   :  { %4098 = vmatprep.subr.mxu1 %v6957_v1  ;;  %679 = vmatprep.mubr.f32.mxu0 %v6957_v1 }
  0x75   :  { %4099 = vmatpush3.msra.mxu1 %v5292_v54  ;;  %4112 = vmatprep.mubr.msk.f32.mxu1 %vm5011_vm2, %v6957_v1 }
  0x76   :  { %4100 = vmatprep.subr.mxu1 %v6957_v1  ;;  %784 = vmatprep.subr.mxu0 %v5094_v5 }
  0x77   :  { %4101 = vmatpush3.msra.mxu1 %v5299_v55 }
  0x78   :  { %4102 = vmatprep.subr.mxu1 %v6957_v1 }
  0x79   :  { %4103 = vmatpush3.msra.mxu1 %v5305_v56 }
  0x7a   :  { %4104 = vmatprep.subr.mxu1 %v6957_v1 }
  0x7b   :  { %4105 = vmatpush3.msra.mxu1 %v5312_v57 }
  0x7c   :  { %4106 = vmatprep.subr.mxu1 %v6957_v1 }
  0x7d   :  { %4107 = vmatpush3.msra.mxu1 %v5318_v58 }
  0x7e   :  { %4108 = vmatprep.subr.mxu1 %v6957_v1 }
  0x7f   :  { %4109 = vmatpush3.msra.mxu1 %v5324_v59 }
  0x80   :  { %4110 = vmatprep.subr.mxu1 %v6957_v1 }
  0x81   :  { %4111 = vmatpush3.msra.mxu1 %v5330_v60 }
  0x82   :  { %4115 = vmatprep.subr.mxu1 %v6957_v1 }
  0xed   :  { %v216_v2 = vpop.f32.mrf.mxu0 }
  0xef   :  { %v218_v4 = vpop.f32.mrf.mxu0 }
  0xf1   :  { %v222_v14 = vpop.f32.mrf.mxu0 }
  0xf2   :  { %v5406_v20 = vadd.f32 %v222_v14, %v103_v9 }
  0xf3   :  { %v224_v25 = vpop.f32.mrf.mxu0 }
  0xf4   :  { %7023 = vst [vmem:[#allocation23_spill] sm:$0xff] %v5406_v20  ;;  %v5408_v31 = vadd.f32 %v224_v25, %v107_v18  ;;  %v4035_v20 = vpop.f32.mrf.mxu1 }
  0xf5   :  { %v228_v37 = vpop.f32.mrf.mxu0 }
  0xf6   :  { %7024 = vst [vmem:[#allocation24_spill] sm:$0xff] %v5408_v31  ;;  %v5411_v61 = vadd.f32 %v228_v37, %v103_v9  ;;  %v5421_v31 = vadd.f32 %v4035_v20, %v111_v63 }
  0xf7   :  { %v230_v1 = vpop.f32.mrf.mxu0 }
  0xf8   :  { %7025 = vst [vmem:[#allocation25_spill] sm:$0xff] %v5411_v61  ;;  %v5413_v5 = vadd.f32 %v230_v1, %v107_v18  ;;  %7029 = vst [vmem:[#allocation29_spill] sm:$0xff] %v5421_v31 }
  0xf9   :  { %v234_v60 = vpop.f32.mrf.mxu0 }
  0xfa   :  { %7026 = vst [vmem:[#allocation26_spill] sm:$0xff] %v5413_v5  ;;  %v5417_v48 = vadd.f32 %v234_v60, %v103_v9 }
  0xfb   :  { %v236_v3 = vpop.f32.mrf.mxu0 }
  0xfc   :  { %7027 = vst [vmem:[#allocation27_spill] sm:$0xff] %v5417_v48  ;;  %v5419_v14 = vadd.f32 %v236_v3, %v107_v18 }
  0xfd   :  { %v240_v25 = vpop.f32.mrf.mxu0 }
  0xfe   :  { %7028 = vst [vmem:[#allocation28_spill] sm:$0xff] %v5419_v14  ;;  %v5423_v46 = vadd.f32 %v240_v25, %v103_v9 }
  0xff   :  { %v242_v37 = vpop.f32.mrf.mxu0 }
 0x100   :  { %7030 = vst [vmem:[#allocation30_spill] sm:$0xff] %v5423_v46  ;;  %v5425_v61 = vadd.f32 %v242_v37, %v107_v18  ;;  %v217_v46 = vadd.f32 %v216_v2, %v103_v9 }
 0x101   :  { %v246_v1 = vpop.f32.mrf.mxu0 }
 0x102   :  { %7031 = vst [vmem:[#allocation31_spill] sm:$0xff] %v5425_v61  ;;  %v5427_v5 = vadd.f32 %v246_v1, %v103_v9  ;;  %v329_v1 = vpop.f32.mrf.mxu1 }
 0x103   :  { %v248_v59 = vpop.f32.mrf.mxu0 }
 0x104   :  { %7032 = vst [vmem:[#allocation32_spill] sm:$0xff] %v5427_v5  ;;  %v5429_v62 = vadd.f32 %v248_v59, %v107_v18 }
 0x105   :  { %v252_v60 = vpop.f32.mrf.mxu0 }
 0x106   :  { %7033 = vst [vmem:[#allocation33_spill] sm:$0xff] %v5429_v62  ;;  %v5431_v0 = vadd.f32 %v252_v60, %v103_v9  ;;  %v219_v60 = vadd.f32 %v218_v4, %v107_v18 }
 0x107   :  { %v254_v3 = vpop.f32.mrf.mxu0 }
 0x108   :  { %7034 = vst [vmem:[#allocation34_spill] sm:$0xff] %v5431_v0  ;;  %v5433_v43 = vadd.f32 %v254_v3, %v107_v18 }
 0x109   :  { %v258_v14 = vpop.f32.mrf.mxu0 }
 0x10a   :  { %7035 = vst [vmem:[#allocation35_spill] sm:$0xff] %v5433_v43  ;;  %v5435_v20 = vadd.f32 %v258_v14, %v103_v9 }
 0x10b   :  { %v260_v25 = vpop.f32.mrf.mxu0 }
 0x10c   :  { %7036 = vst [vmem:[#allocation36_spill] sm:$0xff] %v5435_v20  ;;  %v5437_v48 = vadd.f32 %v260_v25, %v107_v18 }
 0x10d   :  { %v514_v37 = vpop.f32.mrf.mxu0 }
 0x10e   :  { %7037 = vst [vmem:[#allocation37_spill] sm:$0xff] %v5437_v48  ;;  %v592_v61 = vadd.f32 %v514_v37, %v217_v46  ;;  %v4038_v31 = vpop.f32.mrf.mxu1 }
 0x10f   :  { %v516_v59 = vpop.f32.mrf.mxu0  ;;  %v5439_v62 = vadd.f32 %v4038_v31, %v111_v63 }
 0x110   :  { %v3691_v5 = vmul.f32 -1.442695, %v592_v61  ;;  %v339_v0 = vpop.f32.mrf.mxu1  ;;  %v599_v43 = vadd.f32 %v516_v59, %v219_v60  ;;  %v5454_v59 = vld [vmem:[%s6948_s4] ss:$0 sm:$0xff] }
 0x111   :  { %7038 = vst [vmem:[#allocation38_spill] sm:$0xff] %v5439_v62  ;;  %v5441_v3 = vadd.f32 %v339_v0, %v111_v63 }
 0x112   :  { %4660 = vpow2.f32 %v3691_v5  ;;  %v4041_v14 = vpop.f32.mrf.mxu1  ;;  %v3692_v25 = vmul.f32 -1.442695, %v599_v43 }
 0x113   :  { %7039 = vst [vmem:[#allocation39_spill] sm:$0xff] %v5441_v3  ;;  %v5443_v20 = vadd.f32 %v4041_v14, %v111_v63 }
 0x114   :  { %v349_v2 = vpop.f32.mrf.mxu1  ;;  %4662 = vpow2.f32 %v3692_v25 }
 0x115   :  { %7040 = vst [vmem:[#allocation40_spill] sm:$0xff] %v5443_v20  ;;  %v5445_v9 = vadd.f32 %v349_v2, %v111_v63  ;;  %v330_v2 = vadd.f32 %v329_v1, %v111_v63  ;;  %v7046_v1 = vld [vmem:[#allocation20_spill] sm:$0xff] }
 0x116   :  { %v4044_v46 = vpop.f32.mrf.mxu1 }
 0x117   :  { %7041 = vst [vmem:[#allocation41_spill] sm:$0xff] %v5445_v9  ;;  %v5447_v37 = vadd.f32 %v4044_v46, %v111_v63 }
 0x118   :  { %v359_v61 = vpop.f32.mrf.mxu1 }
 0x119   :  { %7042 = vst [vmem:[#allocation42_spill] sm:$0xff] %v5447_v37  ;;  %v5449_v48 = vadd.f32 %v359_v61, %v111_v63  ;;  %v7045_v63 = vmov 0.0  }
 0x11b   :  { %7043 = vst [vmem:[#allocation43_spill] sm:$0xff] %v5449_v48 }
 0x11f   :  { %v4661_v4 = vpop.eup %4660 }
 0x120   :  { %v596_v5 = vadd.f32 1.0, %v4661_v4 }
 0x121   :  { %v4663_v0 = vpop.eup %4662 }
 0x122   :  { %4664 = vrcp.f32 %v596_v5  ;;  %v585_v18 = vpop.f32.mrf.mxu1  ;;  %v603_v60 = vadd.f32 1.0, %v4663_v0  ;;  %v7049_v0 = vld [vmem:[#allocation21_spill] sm:$0xff] }
 0x123   :  { %v606_v43 = vadd.f32 %v5454_v59, %v585_v18  ;;  %v7048_v18 = vld [vmem:[#allocation19_spill] sm:$0xff] }
 0x124   :  { %v4079_v31 = vpop.f32.mrf.mxu1  ;;  %4666 = vrcp.f32 %v603_v60  ;;  %v7050_v60 = vld [vmem:[#allocation17_spill] sm:$0xff] }
 0x12f   :  { %v4665_v14 = vpop.eup %4664 }
 0x130   :  { %v607_v46 = vmul.f32 %v4665_v14, %v606_v43 }
 0x131   :  { %v4667_v25 = vpop.eup %4666 }
 0x132   :  { %v608_v61 = vadd.f32 %v607_v46, %v330_v2  ;;  %v610_v4 = vsub.f32 1.0, %v4667_v25  ;;  %v612_v31 = vmul.f32 0.0, %v4667_v25  ;;  %v7051_v2 = vld [vmem:[#allocation23_spill] sm:$0xff] }
 0x134   :  { %4668 = vtanh.f32 %v608_v61 }
 0x141   :  { %v4669_v5 = vpop.eup %4668 }
 0x142   :  { %v611_v37 = vmul.f32 %v4669_v5, %v610_v4  ;;  %v7052_v5 = vld [vmem:[#allocation24_spill] sm:$0xff] }
 0x144   :  { %v5457_v48 = vadd.f32 %v612_v31, %v611_v37  ;;  %v7047_v37 = vld [vmem:[#allocation18_spill] sm:$0xff] }
 0x146   :  { %7044 = vst [vmem:[#allocation44_spill] sm:$0xff] %v5457_v48  ;;  %680 = vmatmul.mubr.f32.vlgmr.msra.gmra.mxu0 %v5457_v48  ;;  %4113 = vmatmul.mubr.f32.vlgmr.msra.gmra.mxu1 %v5457_v48 }
 0x147   :  { %785 = vmatpush1.msra.mxu0 %v5097_v6  ;;  %4116 = vmatpush3.msra.mxu1 %v5185_v29 }
 0x148   :  { %786 = vmatprep.subr.mxu0 %v5100_v7  ;;  %4117 = vmatprep.subr.mxu1 %v7045_v63 }
 0x149   :  { %787 = vmatpush1.msra.mxu0 %v5104_v8  ;;  %4118 = vmatpush3.msra.mxu1 %v5209_v35 }
 0x14a   :  { %788 = vmatprep.subr.mxu0 %v5111_v10  ;;  %4119 = vmatprep.subr.mxu1 %v7045_v63 }
 0x14b   :  { %789 = vmatpush1.msra.mxu0 %v5114_v11  ;;  %4120 = vmatpush3.msra.mxu1 %v5231_v41 }
 0x14c   :  { %790 = vmatprep.subr.mxu0 %v5117_v12  ;;  %4121 = vmatprep.subr.mxu1 %v7045_v63 }
 0x14d   :  { %791 = vmatpush1.msra.mxu0 %v5121_v13  ;;  %4122 = vmatpush3.msra.mxu1 %v5252_v47 }
 0x14e   :  { %792 = vmatprep.subr.mxu0 %v5130_v15  ;;  %4123 = vmatprep.subr.mxu1 %v7045_v63 }
 0x14f   :  { %793 = vmatpush1.msra.mxu0 %v5133_v16  ;;  %4124 = vmatpush3.msra.mxu1 %v5260_v49 }
 0x150   :  { %794 = vmatprep.subr.mxu0 %v5136_v17  ;;  %4125 = vmatprep.subr.mxu1 %v7045_v63 }
 0x151   :  { %795 = vmatpush1.msra.mxu0 %v5144_v19  ;;  %4126 = vmatpush3.msra.mxu1 %v5266_v50 }
 0x152   :  { %796 = vmatprep.subr.mxu0 %v5153_v21  ;;  %4127 = vmatprep.subr.mxu1 %v7045_v63 }
 0x153   :  { %797 = vmatpush1.msra.mxu0 %v5156_v22  ;;  %4128 = vmatpush3.msra.mxu1 %v5271_v51 }
 0x154   :  { %798 = vmatprep.subr.mxu0 %v5160_v23  ;;  %4129 = vmatprep.subr.mxu1 %v7045_v63 }
 0x155   :  { %799 = vmatpush1.msra.mxu0 %v5166_v24  ;;  %4130 = vmatpush3.msra.mxu1 %v5278_v52 }
 0x156   :  { %800 = vmatprep.subr.mxu0 %v5175_v26  ;;  %4131 = vmatprep.subr.mxu1 %v7045_v63 }
 0x157   :  { %801 = vmatpush1.msra.mxu0 %v5178_v27  ;;  %4132 = vmatpush3.msra.mxu1 %v5286_v53 }
 0x158   :  { %802 = vmatprep.subr.mxu0 %v5182_v28  ;;  %4133 = vmatprep.subr.mxu1 %v7045_v63 }
 0x159   :  { %803 = vmatpush1.msra.mxu0 %v5190_v30  ;;  %4134 = vmatpush3.msra.mxu1 %v5292_v54 }
 0x15a   :  { %804 = vmatprep.subr.mxu0 %v5199_v32  ;;  %4135 = vmatprep.subr.mxu1 %v7045_v63 }
 0x15b   :  { %805 = vmatpush1.msra.mxu0 %v5202_v33  ;;  %4136 = vmatpush3.msra.mxu1 %v5299_v55 }
 0x15c   :  { %806 = vmatprep.subr.mxu0 %v5206_v34  ;;  %4137 = vmatprep.subr.mxu1 %v7045_v63 }
 0x15d   :  { %807 = vmatpush1.msra.mxu0 %v5214_v36  ;;  %4138 = vmatpush3.msra.mxu1 %v5305_v56 }
 0x15e   :  { %808 = vmatprep.subr.mxu0 %v5221_v38  ;;  %4139 = vmatprep.subr.mxu1 %v7045_v63 }
 0x15f   :  { %809 = vmatpush1.msra.mxu0 %v5224_v39  ;;  %4140 = vmatpush3.msra.mxu1 %v5312_v57 }
 0x160   :  { %810 = vmatprep.subr.mxu0 %v5228_v40  ;;  %4141 = vmatprep.subr.mxu1 %v7045_v63 }
 0x161   :  { %811 = vmatpush1.msra.mxu0 %v5235_v42  ;;  %4142 = vmatpush3.msra.mxu1 %v5318_v58 }
 0x162   :  { %812 = vmatprep.subr.mxu0 %v5242_v44  ;;  %4143 = vmatprep.subr.mxu1 %v7045_v63 }
 0x163   :  { %813 = vmatpush1.msra.mxu0 %v5245_v45  ;;  %4144 = vmatpush3.msra.mxu1 %v7046_v1  ;;  %v7053_v1 = vld [vmem:[#allocation29_spill] sm:$0xff] }
 0x164   :  { %814 = vmatprep.subr.mxu0 %v7047_v37  ;;  %4145 = vmatprep.subr.mxu1 %v7045_v63 }
 0x165   :  { %815 = vmatpush1.msra.mxu0 %v7048_v18  ;;  %848 = vmatprep.mubr.f32.mxu0 %v7045_v63 }
 0x166   :  { %4146 = vmatpush3.msra.mxu1 %v7049_v0  ;;  %4147 = vmatprep.mubr.msk.f32.mxu1 %vm5011_vm2, %v7045_v63 }
 0x167   :  { %953 = vmatprep.subr.mxu0 %v7050_v60  ;;  %4150 = vmatprep.subr.mxu1 %v7045_v63 }
 0x206   :  { %v681_v43 = vpop.f32.mrf.mxu0  ;;  %v752_v14 = vpop.f32.mrf.mxu1 }
 0x207   :  { %v760_v46 = vadd.f32 %v681_v43, %v7051_v2  ;;  %v774_v60 = vadd.f32 %v5454_v59, %v752_v14 }
 0x208   :  { %v4114_v61 = vpop.f32.mrf.mxu1  ;;  %v683_v4 = vpop.f32.mrf.mxu0 }
 0x209   :  { %v3693_v25 = vmul.f32 -1.442695, %v760_v46  ;;  %v767_v31 = vadd.f32 %v683_v4, %v7052_v5 }
 0x20b   :  { %4670 = vpow2.f32 %v3693_v25  ;;  %v3694_v20 = vmul.f32 -1.442695, %v767_v31 }
 0x20d   :  { %4672 = vpow2.f32 %v3694_v20 }
 0x218   :  { %v4671_v9 = vpop.eup %4670 }
 0x219   :  { %v764_v62 = vadd.f32 1.0, %v4671_v9  ;;  %v7057_v9 = vld [vmem:[#allocation19_spill] sm:$0xff] }
 0x21a   :  { %v4673_v3 = vpop.eup %4672 }
 0x21b   :  { %4674 = vrcp.f32 %v764_v62  ;;  %v771_v0 = vadd.f32 1.0, %v4673_v3  ;;  %v7055_v62 = vld [vmem:[#allocation20_spill] sm:$0xff]  ;;  %v7056_v3 = vld [vmem:[#allocation18_spill] sm:$0xff] }
 0x21d   :  { %4676 = vrcp.f32 %v771_v0 }
 0x228   :  { %v4675_v18 = vpop.eup %4674 }
 0x229   :  { %v775_v37 = vmul.f32 %v4675_v18, %v774_v60  ;;  %v7060_v60 = vld [vmem:[#allocation25_spill] sm:$0xff] }
 0x22a   :  { %v4677_v2 = vpop.eup %4676 }
 0x22b   :  { %v776_v43 = vadd.f32 %v775_v37, %v7053_v1  ;;  %v778_v46 = vsub.f32 1.0, %v4677_v2  ;;  %v780_v4 = vmul.f32 %v4677_v2, %v5457_v48  ;;  %v7058_v1 = vld [vmem:[#allocation21_spill] sm:$0xff]  ;;  %v7061_v2 = vld [vmem:[#allocation26_spill] sm:$0xff] }
 0x22c   :  { %v7059_v37 = vld [vmem:[#allocation17_spill] sm:$0xff] }
 0x22d   :  { %4678 = vtanh.f32 %v776_v43 }
 0x23a   :  { %v4679_v61 = vpop.eup %4678 }
 0x23b   :  { %v779_v25 = vmul.f32 %v4679_v61, %v778_v46 }
 0x23d   :  { %v5533_v20 = vadd.f32 %v780_v4, %v779_v25 }
 0x23f   :  { %7054 = vst [vmem:[#allocation23_spill] sm:$0xff] %v5533_v20  ;;  %849 = vmatmul.mubr.f32.vlgmr.msra.gmra.mxu0 %v5533_v20  ;;  %4148 = vmatmul.mubr.f32.vlgmr.msra.gmra.mxu1 %v5533_v20 }
 0x240   :  { %954 = vmatpush1.msra.mxu0 %v5097_v6  ;;  %4151 = vmatpush3.msra.mxu1 %v5185_v29 }
 0x241   :  { %955 = vmatprep.subr.mxu0 %v5100_v7  ;;  %4152 = vmatprep.subr.mxu1 %v7045_v63 }
 0x242   :  { %956 = vmatpush1.msra.mxu0 %v5104_v8  ;;  %4153 = vmatpush3.msra.mxu1 %v5209_v35 }
 0x243   :  { %957 = vmatprep.subr.mxu0 %v5111_v10  ;;  %4154 = vmatprep.subr.mxu1 %v7045_v63 }
 0x244   :  { %958 = vmatpush1.msra.mxu0 %v5114_v11  ;;  %4155 = vmatpush3.msra.mxu1 %v5231_v41 }
 0x245   :  { %959 = vmatprep.subr.mxu0 %v5117_v12  ;;  %4156 = vmatprep.subr.mxu1 %v7045_v63 }
 0x246   :  { %960 = vmatpush1.msra.mxu0 %v5121_v13  ;;  %4157 = vmatpush3.msra.mxu1 %v5252_v47 }
 0x247   :  { %961 = vmatprep.subr.mxu0 %v5130_v15  ;;  %4158 = vmatprep.subr.mxu1 %v7045_v63 }
 0x248   :  { %962 = vmatpush1.msra.mxu0 %v5133_v16  ;;  %4159 = vmatpush3.msra.mxu1 %v5260_v49 }
 0x249   :  { %963 = vmatprep.subr.mxu0 %v5136_v17  ;;  %4160 = vmatprep.subr.mxu1 %v7045_v63 }
 0x24a   :  { %964 = vmatpush1.msra.mxu0 %v5144_v19  ;;  %4161 = vmatpush3.msra.mxu1 %v5266_v50 }
 0x24b   :  { %965 = vmatprep.subr.mxu0 %v5153_v21  ;;  %4162 = vmatprep.subr.mxu1 %v7045_v63 }
 0x24c   :  { %966 = vmatpush1.msra.mxu0 %v5156_v22  ;;  %4163 = vmatpush3.msra.mxu1 %v5271_v51 }
 0x24d   :  { %967 = vmatprep.subr.mxu0 %v5160_v23  ;;  %4164 = vmatprep.subr.mxu1 %v7045_v63 }
 0x24e   :  { %968 = vmatpush1.msra.mxu0 %v5166_v24  ;;  %4165 = vmatpush3.msra.mxu1 %v5278_v52 }
 0x24f   :  { %969 = vmatprep.subr.mxu0 %v5175_v26  ;;  %4166 = vmatprep.subr.mxu1 %v7045_v63 }
 0x250   :  { %970 = vmatpush1.msra.mxu0 %v5178_v27  ;;  %4167 = vmatpush3.msra.mxu1 %v5286_v53 }
 0x251   :  { %971 = vmatprep.subr.mxu0 %v5182_v28  ;;  %4168 = vmatprep.subr.mxu1 %v7045_v63 }
 0x252   :  { %972 = vmatpush1.msra.mxu0 %v5190_v30  ;;  %4169 = vmatpush3.msra.mxu1 %v5292_v54 }
 0x253   :  { %973 = vmatprep.subr.mxu0 %v5199_v32  ;;  %4170 = vmatprep.subr.mxu1 %v7045_v63 }
 0x254   :  { %974 = vmatpush1.msra.mxu0 %v5202_v33  ;;  %4171 = vmatpush3.msra.mxu1 %v5299_v55 }
 0x255   :  { %975 = vmatprep.subr.mxu0 %v5206_v34  ;;  %4172 = vmatprep.subr.mxu1 %v7045_v63 }
 0x256   :  { %976 = vmatpush1.msra.mxu0 %v5214_v36  ;;  %4173 = vmatpush3.msra.mxu1 %v5305_v56 }
 0x257   :  { %977 = vmatprep.subr.mxu0 %v5221_v38  ;;  %4174 = vmatprep.subr.mxu1 %v7045_v63 }
 0x258   :  { %978 = vmatpush1.msra.mxu0 %v5224_v39  ;;  %4175 = vmatpush3.msra.mxu1 %v5312_v57 }
 0x259   :  { %979 = vmatprep.subr.mxu0 %v5228_v40  ;;  %4176 = vmatprep.subr.mxu1 %v7045_v63 }
 0x25a   :  { %980 = vmatpush1.msra.mxu0 %v5235_v42  ;;  %4177 = vmatpush3.msra.mxu1 %v5318_v58 }
 0x25b   :  { %981 = vmatprep.subr.mxu0 %v5242_v44  ;;  %4178 = vmatprep.subr.mxu1 %v7045_v63 }
 0x25c   :  { %982 = vmatpush1.msra.mxu0 %v5245_v45  ;;  %4179 = vmatpush3.msra.mxu1 %v7055_v62  ;;  %v7062_v62 = vld [vmem:[#allocation39_spill] sm:$0xff] }
 0x25d   :  { %983 = vmatprep.subr.mxu0 %v7056_v3  ;;  %4180 = vmatprep.subr.mxu1 %v7045_v63 }
 0x25e   :  { %984 = vmatpush1.msra.mxu0 %v7057_v9  ;;  %1017 = vmatprep.mubr.f32.mxu0 %v7045_v63 }
 0x25f   :  { %4181 = vmatpush3.msra.mxu1 %v7058_v1  ;;  %4182 = vmatprep.mubr.msk.f32.mxu1 %vm5011_vm2, %v7045_v63 }
 0x260   :  { %1122 = vmatprep.subr.mxu0 %v7059_v37  ;;  %4185 = vmatprep.subr.mxu1 %v7045_v63 }
 0x2ff   :  { %v850_v18 = vpop.f32.mrf.mxu0  ;;  %v921_v0 = vpop.f32.mrf.mxu1 }
 0x300   :  { %v929_v14 = vadd.f32 %v850_v18, %v7060_v60  ;;  %v943_v37 = vadd.f32 %v5454_v59, %v921_v0  ;;  %v5714_v0 = vld [vmem:[#allocation7 + $0x148] sm:$0xff] }
 0x301   :  { %v4149_v5 = vpop.f32.mrf.mxu1  ;;  %v852_v43 = vpop.f32.mrf.mxu0 }
 0x302   :  { %v3695_v31 = vmul.f32 -1.442695, %v929_v14  ;;  %v936_v46 = vadd.f32 %v852_v43, %v7061_v2 }
 0x304   :  { %4680 = vpow2.f32 %v3695_v31  ;;  %v3696_v61 = vmul.f32 -1.442695, %v936_v46  ;;  %v5717_v46 = vld [vmem:[#allocation7 + $0x128] sm:$0xff] }
 0x306   :  { %4682 = vpow2.f32 %v3696_v61  ;;  %v5721_v61 = vld [vmem:[#allocation7 + $0x120] sm:$0xff] }
 0x311   :  { %v4681_v25 = vpop.eup %4680 }
 0x312   :  { %v933_v4 = vadd.f32 1.0, %v4681_v25  ;;  %v5725_v25 = vld [vmem:[#allocation7 + $0x110] sm:$0xff] }
 0x313   :  { %v4683_v48 = vpop.eup %4682 }
 0x314   :  { %4684 = vrcp.f32 %v933_v4  ;;  %v940_v1 = vadd.f32 1.0, %v4683_v48  ;;  %v5697_v48 = vld [vmem:[#allocation7 + $0x158] sm:$0xff]  ;;  %v5729_v4 = vld [vmem:[#allocation7 + $0x108] sm:$0xff] }
 0x316   :  { %4686 = vrcp.f32 %v940_v1  ;;  %v5711_v1 = vld [vmem:[#allocation7 + $0x138] sm:$0xff] }
 0x321   :  { %v4685_v9 = vpop.eup %4684 }
 0x322   :  { %v944_v3 = vmul.f32 %v4685_v9, %v943_v37  ;;  %v5707_v9 = vld [vmem:[#allocation7 + $0x140] sm:$0xff]  ;;  %v5733_v37 = vld [vmem:[#allocation7 + $0xf8] sm:$0xff] }
 0x323   :  { %v4687_v60 = vpop.eup %4686 }
 0x324   :  { %v945_v18 = vadd.f32 %v944_v3, %v7062_v62  ;;  %v947_v14 = vsub.f32 1.0, %v4687_v60  ;;  %v949_v43 = vmul.f32 %v4687_v60, %v5533_v20  ;;  %v5701_v62 = vld [vmem:[#allocation7 + $0x150] sm:$0xff]  ;;  %v5704_v3 = vld [vmem:[#allocation7 + $0x160] sm:$0xff]  ;;  %v5745_v60 = vld [vmem:[#allocation7 + $0xd8] sm:$0xff] }
 0x326   :  { %4688 = vtanh.f32 %v945_v18  ;;  %v5737_v18 = vld [vmem:[#allocation7 + $0xf0] sm:$0xff] }
 0x333   :  { %v4689_v5 = vpop.eup %4688 }
 0x334   :  { %v948_v31 = vmul.f32 %v4689_v5, %v947_v14  ;;  %v5753_v14 = vld [vmem:[#allocation7 + $0xc0] sm:$0xff]  ;;  %v5761_v5 = vld [vmem:[#allocation7 + $0xa8] sm:$0xff] }
 0x336   :  { %v5609_v2 = vadd.f32 %v949_v43, %v948_v31  ;;  %v5769_v31 = vld [vmem:[#allocation7 + $0x90] sm:$0xff]  ;;  %v5777_v43 = vld [vmem:[#allocation7 + $0x78] sm:$0xff] }
 0x338   :  { %7063 = vst [vmem:[#allocation24_spill] sm:$0xff] %v5609_v2  ;;  %1018 = vmatmul.mubr.f32.vlgmr.msra.gmra.mxu0 %v5609_v2  ;;  %4183 = vmatmul.mubr.f32.vlgmr.msra.gmra.mxu1 %v5609_v2 }
 0x339   :  { %1123 = vmatpush1.msra.mxu0 %v5097_v6  ;;  %4186 = vmatpush3.msra.mxu1 %v5185_v29  ;;  %v7064_v6 = vld [vmem:[#allocation20_spill] sm:$0xff] }
 0x33a   :  { %1124 = vmatprep.subr.mxu0 %v5100_v7  ;;  %4187 = vmatprep.subr.mxu1 %v7045_v63  ;;  %v7065_v7 = vld [vmem:[#allocation18_spill] sm:$0xff] }
 0x33b   :  { %1125 = vmatpush1.msra.mxu0 %v5104_v8  ;;  %4188 = vmatpush3.msra.mxu1 %v5209_v35  ;;  %v7066_v8 = vld [vmem:[#allocation19_spill] sm:$0xff] }
 0x33c   :  { %1126 = vmatprep.subr.mxu0 %v5111_v10  ;;  %4189 = vmatprep.subr.mxu1 %v7045_v63  ;;  %v7067_v10 = vld [vmem:[#allocation21_spill] sm:$0xff] }
 0x33d   :  { %1127 = vmatpush1.msra.mxu0 %v5114_v11  ;;  %4190 = vmatpush3.msra.mxu1 %v5231_v41  ;;  %v5678_v11 = vld [vmem:[#allocation7 + $0x170] sm:$0xff] }
 0x33e   :  { %1128 = vmatprep.subr.mxu0 %v5117_v12  ;;  %4191 = vmatprep.subr.mxu1 %v7045_v63 }
 0x33f   :  { %1129 = vmatpush1.msra.mxu0 %v5121_v13  ;;  %4192 = vmatpush3.msra.mxu1 %v5252_v47 }
 0x340   :  { %1130 = vmatprep.subr.mxu0 %v5130_v15  ;;  %4193 = vmatprep.subr.mxu1 %v7045_v63  ;;  %v7068_v15 = vld [vmem:[#allocation27_spill] sm:$0xff] }
 0x341   :  { %1131 = vmatpush1.msra.mxu0 %v5133_v16  ;;  %4194 = vmatpush3.msra.mxu1 %v5260_v49 }
 0x342   :  { %1132 = vmatprep.subr.mxu0 %v5136_v17  ;;  %4195 = vmatprep.subr.mxu1 %v7045_v63 }
 0x343   :  { %1133 = vmatpush1.msra.mxu0 %v5144_v19  ;;  %4196 = vmatpush3.msra.mxu1 %v5266_v50 }
 0x344   :  { %1134 = vmatprep.subr.mxu0 %v5153_v21  ;;  %4197 = vmatprep.subr.mxu1 %v7045_v63 }
 0x345   :  { %1135 = vmatpush1.msra.mxu0 %v5156_v22  ;;  %4198 = vmatpush3.msra.mxu1 %v5271_v51  ;;  %v7069_v22 = vld [vmem:[#allocation28_spill] sm:$0xff] }
 0x346   :  { %1136 = vmatprep.subr.mxu0 %v5160_v23  ;;  %4199 = vmatprep.subr.mxu1 %v7045_v63 }
 0x347   :  { %1137 = vmatpush1.msra.mxu0 %v5166_v24  ;;  %4200 = vmatpush3.msra.mxu1 %v5278_v52 }
 0x348   :  { %1138 = vmatprep.subr.mxu0 %v5175_v26  ;;  %4201 = vmatprep.subr.mxu1 %v7045_v63 }
 0x349   :  { %1139 = vmatpush1.msra.mxu0 %v5178_v27  ;;  %4202 = vmatpush3.msra.mxu1 %v5286_v53 }
 0x34a   :  { %1140 = vmatprep.subr.mxu0 %v5182_v28  ;;  %4203 = vmatprep.subr.mxu1 %v7045_v63 }
 0x34b   :  { %1141 = vmatpush1.msra.mxu0 %v5190_v30  ;;  %4204 = vmatpush3.msra.mxu1 %v5292_v54 }
 0x34c   :  { %1142 = vmatprep.subr.mxu0 %v5199_v32  ;;  %4205 = vmatprep.subr.mxu1 %v7045_v63 }
 0x34d   :  { %1143 = vmatpush1.msra.mxu0 %v5202_v33  ;;  %4206 = vmatpush3.msra.mxu1 %v5299_v55 }
 0x34e   :  { %1144 = vmatprep.subr.mxu0 %v5206_v34  ;;  %4207 = vmatprep.subr.mxu1 %v7045_v63  ;;  %v7070_v34 = vld [vmem:[#allocation38_spill] sm:$0xff] }
 0x34f   :  { %1145 = vmatpush1.msra.mxu0 %v5214_v36  ;;  %4208 = vmatpush3.msra.mxu1 %v5305_v56 }
 0x350   :  { %1146 = vmatprep.subr.mxu0 %v5221_v38  ;;  %4209 = vmatprep.subr.mxu1 %v7045_v63 }
 0x351   :  { %1147 = vmatpush1.msra.mxu0 %v5224_v39  ;;  %4210 = vmatpush3.msra.mxu1 %v5312_v57 }
 0x352   :  { %1148 = vmatprep.subr.mxu0 %v5228_v40  ;;  %4211 = vmatprep.subr.mxu1 %v7045_v63 }
 0x353   :  { %1149 = vmatpush1.msra.mxu0 %v5235_v42  ;;  %4212 = vmatpush3.msra.mxu1 %v5318_v58 }
 0x354   :  { %1150 = vmatprep.subr.mxu0 %v5242_v44  ;;  %4213 = vmatprep.subr.mxu1 %v7045_v63  ;;  %v5691_v44 = vld [vmem:[#allocation7 + $0x168] sm:$0xff] }
 0x355   :  { %1151 = vmatpush1.msra.mxu0 %v5245_v45  ;;  %4214 = vmatpush3.msra.mxu1 %v7064_v6  ;;  %v5694_v45 = vld [vmem:[#allocation7 + $0x178] sm:$0xff] }
 0x356   :  { %1152 = vmatprep.subr.mxu0 %v7065_v7  ;;  %4215 = vmatprep.subr.mxu1 %v7045_v63  ;;  %v5785_v7 = vld [vmem:[#allocation7 + $0x60] sm:$0xff] }
 0x357   :  { %1153 = vmatpush1.msra.mxu0 %v7066_v8  ;;  %1186 = vmatprep.mubr.f32.mxu0 %v7045_v63  ;;  %v5793_v8 = vld [vmem:[#allocation7 + $0x48] sm:$0xff] }
 0x358   :  { %4216 = vmatpush3.msra.mxu1 %v7067_v10  ;;  %4217 = vmatprep.mubr.msk.f32.mxu1 %vm5011_vm2, %v7045_v63 }
 0x359   :  { %1291 = vmatprep.subr.mxu0 %v5678_v11  ;;  %4220 = vmatprep.subr.mxu1 %v7045_v63 }
 0x3f8   :  { %v1019_v12 = vpop.f32.mrf.mxu0  ;;  %v1090_v13 = vpop.f32.mrf.mxu1 }
 0x3f9   :  { %v1098_v16 = vadd.f32 %v1019_v12, %v7068_v15  ;;  %v1112_v30 = vadd.f32 %v5454_v59, %v1090_v13  ;;  %v5801_v12 = vld [vmem:[#allocation7 + $0x30] sm:$0xff]  ;;  %v5809_v13 = vld [vmem:[#allocation7 + $0x18] sm:$0xff]  ;;  %v5817_v15 = vld [vmem:[#allocation7] sm:$0xff] }
 0x3fa   :  { %v4184_v17 = vpop.f32.mrf.mxu1  ;;  %v1021_v21 = vpop.f32.mrf.mxu0  ;;  %7073 = vst [vmem:[#allocation25_spill] sm:$0xff] %v5817_v15 }
 0x3fb   :  { %v3697_v19 = vmul.f32 -1.442695, %v1098_v16  ;;  %v1105_v23 = vadd.f32 %v1021_v21, %v7069_v22  ;;  %v7074_v16 = vld [vmem:[#allocation30_spill] sm:$0xff] }
 0x3fd   :  { %4690 = vpow2.f32 %v3697_v19  ;;  %v3698_v24 = vmul.f32 -1.442695, %v1105_v23  ;;  %v7075_v23 = vld [vmem:[#allocation31_spill] sm:$0xff] }
 0x3ff   :  { %4692 = vpow2.f32 %v3698_v24 }
 0x40a   :  { %v4691_v26 = vpop.eup %4690 }
 0x40b   :  { %v1102_v27 = vadd.f32 1.0, %v4691_v26 }
 0x40c   :  { %v4693_v28 = vpop.eup %4692 }
 0x40d   :  { %4694 = vrcp.f32 %v1102_v27  ;;  %v1109_v29 = vadd.f32 1.0, %v4693_v28 }
 0x40f   :  { %4696 = vrcp.f32 %v1109_v29 }
 0x41a   :  { %v4695_v32 = vpop.eup %4694 }
 0x41b   :  { %v1113_v33 = vmul.f32 %v4695_v32, %v1112_v30 }
 0x41c   :  { %v4697_v36 = vpop.eup %4696 }
 0x41d   :  { %v1114_v35 = vadd.f32 %v1113_v33, %v7070_v34  ;;  %v1116_v38 = vsub.f32 1.0, %v4697_v36  ;;  %v1118_v41 = vmul.f32 %v4697_v36, %v5609_v2  ;;  %v7076_v34 = vld [vmem:[#allocation41_spill] sm:$0xff] }
 0x41f   :  { %4698 = vtanh.f32 %v1114_v35 }
 0x42c   :  { %v4699_v39 = vpop.eup %4698 }
 0x42d   :  { %v1117_v40 = vmul.f32 %v4699_v39, %v1116_v38 }
 0x42f   :  { %v5687_v42 = vadd.f32 %v1118_v41, %v1117_v40 }
 0x431   :  { %7071 = vst [vmem:[#allocation29_spill] sm:$0xff] %v5687_v42  ;;  %1187 = vmatmul.mubr.f32.vlgmr.msra.gmra.mxu0 %v5687_v42  ;;  %4218 = vmatmul.mubr.f32.vlgmr.msra.gmra.mxu1 %v5687_v42 }
 0x432   :  { %1292 = vmatpush1.msra.mxu0 %v5691_v44  ;;  %4221 = vmatpush3.msra.mxu1 %v5694_v45 }
 0x433   :  { %1293 = vmatprep.subr.mxu0 %v5697_v48  ;;  %4222 = vmatprep.subr.mxu1 %v7045_v63 }
 0x434   :  { %1294 = vmatpush1.msra.mxu0 %v5701_v62  ;;  %4223 = vmatpush3.msra.mxu1 %v5704_v3 }
 0x435   :  { %1295 = vmatprep.subr.mxu0 %v5707_v9  ;;  %4224 = vmatprep.subr.mxu1 %v7045_v63 }
 0x436   :  { %1296 = vmatpush1.msra.mxu0 %v5711_v1  ;;  %4225 = vmatpush3.msra.mxu1 %v5714_v0 }
 0x437   :  { %1297 = vmatprep.subr.mxu0 %v5717_v46  ;;  %4226 = vmatprep.subr.mxu1 %v7045_v63 }
 0x438   :  { %1298 = vmatpush1.msra.mxu0 %v5721_v61  ;;  %4227 = vmatpush3.msra.mxu1 %v5252_v47  ;;  %v5741_v47 = vld [vmem:[#allocation7 + $0xe0] sm:$0xff] }
 0x439   :  { %1299 = vmatprep.subr.mxu0 %v5725_v25  ;;  %4228 = vmatprep.subr.mxu1 %v7045_v63 }
 0x43a   :  { %1300 = vmatpush1.msra.mxu0 %v5729_v4  ;;  %4229 = vmatpush3.msra.mxu1 %v5260_v49  ;;  %v5749_v49 = vld [vmem:[#allocation7 + $0xc8] sm:$0xff] }
 0x43b   :  { %1301 = vmatprep.subr.mxu0 %v5733_v37  ;;  %4230 = vmatprep.subr.mxu1 %v7045_v63 }
 0x43c   :  { %1302 = vmatpush1.msra.mxu0 %v5737_v18  ;;  %4231 = vmatpush3.msra.mxu1 %v5266_v50  ;;  %v5757_v50 = vld [vmem:[#allocation7 + $0xb0] sm:$0xff] }
 0x43d   :  { %1303 = vmatprep.subr.mxu0 %v5741_v47  ;;  %4232 = vmatprep.subr.mxu1 %v7045_v63 }
 0x43e   :  { %1304 = vmatpush1.msra.mxu0 %v5745_v60  ;;  %4233 = vmatpush3.msra.mxu1 %v5271_v51  ;;  %v5765_v51 = vld [vmem:[#allocation7 + $0x98] sm:$0xff] }
 0x43f   :  { %1305 = vmatprep.subr.mxu0 %v5749_v49  ;;  %4234 = vmatprep.subr.mxu1 %v7045_v63 }
 0x440   :  { %1306 = vmatpush1.msra.mxu0 %v5753_v14  ;;  %4235 = vmatpush3.msra.mxu1 %v5278_v52  ;;  %v5773_v52 = vld [vmem:[#allocation7 + $0x80] sm:$0xff] }
 0x441   :  { %1307 = vmatprep.subr.mxu0 %v5757_v50  ;;  %4236 = vmatprep.subr.mxu1 %v7045_v63 }
 0x442   :  { %1308 = vmatpush1.msra.mxu0 %v5761_v5  ;;  %4237 = vmatpush3.msra.mxu1 %v5286_v53  ;;  %v5781_v53 = vld [vmem:[#allocation7 + $0x68] sm:$0xff] }
 0x443   :  { %1309 = vmatprep.subr.mxu0 %v5765_v51  ;;  %4238 = vmatprep.subr.mxu1 %v7045_v63 }
 0x444   :  { %1310 = vmatpush1.msra.mxu0 %v5769_v31  ;;  %4239 = vmatpush3.msra.mxu1 %v5292_v54  ;;  %v5789_v54 = vld [vmem:[#allocation7 + $0x50] sm:$0xff] }
 0x445   :  { %1311 = vmatprep.subr.mxu0 %v5773_v52  ;;  %4240 = vmatprep.subr.mxu1 %v7045_v63 }
 0x446   :  { %1312 = vmatpush1.msra.mxu0 %v5777_v43  ;;  %4241 = vmatpush3.msra.mxu1 %v5299_v55  ;;  %v5797_v55 = vld [vmem:[#allocation7 + $0x38] sm:$0xff] }
 0x447   :  { %1313 = vmatprep.subr.mxu0 %v5781_v53  ;;  %4242 = vmatprep.subr.mxu1 %v7045_v63 }
 0x448   :  { %1314 = vmatpush1.msra.mxu0 %v5785_v7  ;;  %4243 = vmatpush3.msra.mxu1 %v5305_v56  ;;  %v5805_v56 = vld [vmem:[#allocation7 + $0x20] sm:$0xff] }
 0x449   :  { %1315 = vmatprep.subr.mxu0 %v5789_v54  ;;  %4244 = vmatprep.subr.mxu1 %v7045_v63 }
 0x44a   :  { %1316 = vmatpush1.msra.mxu0 %v5793_v8  ;;  %4245 = vmatpush3.msra.mxu1 %v5312_v57  ;;  %v5813_v57 = vld [vmem:[#allocation7 + $0x8] sm:$0xff] }
 0x44b   :  { %1317 = vmatprep.subr.mxu0 %v5797_v55  ;;  %4246 = vmatprep.subr.mxu1 %v7045_v63  ;;  %7072 = vst [vmem:[#allocation17_spill] sm:$0xff] %v5813_v57 }
 0x44c   :  { %1318 = vmatpush1.msra.mxu0 %v5801_v12  ;;  %4247 = vmatpush3.msra.mxu1 %v5318_v58 }
 0x44d   :  { %1319 = vmatprep.subr.mxu0 %v5805_v56  ;;  %4248 = vmatprep.subr.mxu1 %v7045_v63 }
 0x44e   :  { %1320 = vmatpush1.msra.mxu0 %v5809_v13  ;;  %4249 = vmatpush3.msra.mxu1 %v7064_v6 }
 0x44f   :  { %1321 = vmatprep.subr.mxu0 %v5813_v57  ;;  %4250 = vmatprep.subr.mxu1 %v7045_v63 }
 0x450   :  { %1322 = vmatpush1.msra.mxu0 %v5817_v15  ;;  %1355 = vmatprep.mubr.f32.mxu0 %v7045_v63 }
 0x451   :  { %4251 = vmatpush3.msra.mxu1 %v7067_v10  ;;  %4252 = vmatprep.mubr.msk.f32.mxu1 %vm5011_vm2, %v7045_v63 }
 0x452   :  { %1460 = vmatprep.subr.mxu0 %v5678_v11  ;;  %4255 = vmatprep.subr.mxu1 %v7045_v63 }
 0x4f1   :  { %v1188_v58 = vpop.f32.mrf.mxu0  ;;  %v1259_v6 = vpop.f32.mrf.mxu1 }
 0x4f2   :  { %v1267_v17 = vadd.f32 %v1188_v58, %v7074_v16  ;;  %v1281_v30 = vadd.f32 %v5454_v59, %v1259_v6  ;;  %v5848_v6 = vld [vmem:[#allocation7 + $0x130] sm:$0xff]  ;;  %v5854_v16 = vld [vmem:[#allocation7 + $0x118] sm:$0xff] }
 0x4f3   :  { %v4219_v19 = vpop.f32.mrf.mxu1  ;;  %v1190_v22 = vpop.f32.mrf.mxu0 }
 0x4f4   :  { %v3699_v21 = vmul.f32 -1.442695, %v1267_v17  ;;  %v1274_v24 = vadd.f32 %v1190_v22, %v7075_v23  ;;  %v5860_v17 = vld [vmem:[#allocation7 + $0x100] sm:$0xff]  ;;  %v5866_v19 = vld [vmem:[#allocation7 + $0xe8] sm:$0xff]  ;;  %v5878_v22 = vld [vmem:[#allocation7 + $0xb8] sm:$0xff] }
 0x4f5   :  { %v5884_v23 = vld [vmem:[#allocation7 + $0xa0] sm:$0xff] }
 0x4f6   :  { %4700 = vpow2.f32 %v3699_v21  ;;  %v3700_v26 = vmul.f32 -1.442695, %v1274_v24  ;;  %v5872_v21 = vld [vmem:[#allocation7 + $0xd0] sm:$0xff]  ;;  %v5890_v24 = vld [vmem:[#allocation7 + $0x88] sm:$0xff] }
 0x4f8   :  { %4702 = vpow2.f32 %v3700_v26  ;;  %v5896_v26 = vld [vmem:[#allocation7 + $0x70] sm:$0xff] }
 0x503   :  { %v4701_v10 = vpop.eup %4700 }
 0x504   :  { %v1271_v27 = vadd.f32 1.0, %v4701_v10  ;;  %v5902_v10 = vld [vmem:[#allocation7 + $0x58] sm:$0xff] }
 0x505   :  { %v4703_v28 = vpop.eup %4702 }
 0x506   :  { %4704 = vrcp.f32 %v1271_v27  ;;  %v1278_v29 = vadd.f32 1.0, %v4703_v28  ;;  %v5908_v27 = vld [vmem:[#allocation7 + $0x40] sm:$0xff]  ;;  %v5914_v28 = vld [vmem:[#allocation7 + $0x28] sm:$0xff] }
 0x507   :  { %7077 = vst [vmem:[#allocation26_spill] sm:$0xff] %v5914_v28 }
 0x508   :  { %4706 = vrcp.f32 %v1278_v29  ;;  %v5921_v29 = vld [vmem:[#allocation7 + $0x10] sm:$0xff] }
 0x509   :  { %7078 = vst [vmem:[#allocation39_spill] sm:$0xff] %v5921_v29 }
 0x513   :  { %v4705_v32 = vpop.eup %4704 }
 0x514   :  { %v1282_v33 = vmul.f32 %v4705_v32, %v1281_v30 }
 0x515   :  { %v4707_v36 = vpop.eup %4706 }
 0x516   :  { %v1283_v35 = vadd.f32 %v1282_v33, %v7076_v34  ;;  %v1285_v38 = vsub.f32 1.0, %v4707_v36  ;;  %v1287_v41 = vmul.f32 %v4707_v36, %v5687_v42  ;;  %v7079_v33 = vld [vmem:[#allocation32_spill] sm:$0xff] }
 0x518   :  { %4708 = vtanh.f32 %v1283_v35 }
 0x525   :  { %v4709_v39 = vpop.eup %4708 }
 0x526   :  { %v1286_v40 = vmul.f32 %v4709_v39, %v1285_v38  ;;  %v7080_v39 = vld [vmem:[#allocation33_spill] sm:$0xff] }
 0x528   :  { %v5831_v58 = vadd.f32 %v1287_v41, %v1286_v40 }
 0x52a   :  { %1356 = vmatmul.mubr.f32.vlgmr.msra.gmra.mxu0 %v5831_v58  ;;  %4253 = vmatmul.mubr.f32.vlgmr.msra.gmra.mxu1 %v5831_v58 }
 0x52b   :  { %1461 = vmatpush1.msra.mxu0 %v5691_v44  ;;  %4256 = vmatpush3.msra.mxu1 %v5694_v45 }
 0x52c   :  { %1462 = vmatprep.subr.mxu0 %v5697_v48  ;;  %4257 = vmatprep.subr.mxu1 %v7045_v63 }
 0x52d   :  { %1463 = vmatpush1.msra.mxu0 %v5701_v62  ;;  %4258 = vmatpush3.msra.mxu1 %v5704_v3 }
 0x52e   :  { %1464 = vmatprep.subr.mxu0 %v5707_v9  ;;  %4259 = vmatprep.subr.mxu1 %v7045_v63 }
 0x52f   :  { %1465 = vmatpush1.msra.mxu0 %v5711_v1  ;;  %4260 = vmatpush3.msra.mxu1 %v5714_v0 }
 0x530   :  { %1466 = vmatprep.subr.mxu0 %v5717_v46  ;;  %4261 = vmatprep.subr.mxu1 %v7045_v63 }
 0x531   :  { %1467 = vmatpush1.msra.mxu0 %v5721_v61  ;;  %4262 = vmatpush3.msra.mxu1 %v5848_v6 }
 0x532   :  { %1468 = vmatprep.subr.mxu0 %v5725_v25  ;;  %4263 = vmatprep.subr.mxu1 %v7045_v63 }
 0x533   :  { %1469 = vmatpush1.msra.mxu0 %v5729_v4  ;;  %4264 = vmatpush3.msra.mxu1 %v5854_v16 }
 0x534   :  { %1470 = vmatprep.subr.mxu0 %v5733_v37  ;;  %4265 = vmatprep.subr.mxu1 %v7045_v63 }
 0x535   :  { %1471 = vmatpush1.msra.mxu0 %v5737_v18  ;;  %4266 = vmatpush3.msra.mxu1 %v5860_v17 }
 0x536   :  { %1472 = vmatprep.subr.mxu0 %v5741_v47  ;;  %4267 = vmatprep.subr.mxu1 %v7045_v63 }
 0x537   :  { %1473 = vmatpush1.msra.mxu0 %v5745_v60  ;;  %4268 = vmatpush3.msra.mxu1 %v5866_v19 }
 0x538   :  { %1474 = vmatprep.subr.mxu0 %v5749_v49  ;;  %4269 = vmatprep.subr.mxu1 %v7045_v63 }
 0x539   :  { %1475 = vmatpush1.msra.mxu0 %v5753_v14  ;;  %4270 = vmatpush3.msra.mxu1 %v5872_v21 }
 0x53a   :  { %1476 = vmatprep.subr.mxu0 %v5757_v50  ;;  %4271 = vmatprep.subr.mxu1 %v7045_v63 }
 0x53b   :  { %1477 = vmatpush1.msra.mxu0 %v5761_v5  ;;  %4272 = vmatpush3.msra.mxu1 %v5878_v22 }
 0x53c   :  { %1478 = vmatprep.subr.mxu0 %v5765_v51  ;;  %4273 = vmatprep.subr.mxu1 %v7045_v63 }
 0x53d   :  { %1479 = vmatpush1.msra.mxu0 %v5769_v31  ;;  %4274 = vmatpush3.msra.mxu1 %v5884_v23 }
 0x53e   :  { %1480 = vmatprep.subr.mxu0 %v5773_v52  ;;  %4275 = vmatprep.subr.mxu1 %v7045_v63 }
 0x53f   :  { %1481 = vmatpush1.msra.mxu0 %v5777_v43  ;;  %4276 = vmatpush3.msra.mxu1 %v5890_v24 }
 0x540   :  { %1482 = vmatprep.subr.mxu0 %v5781_v53  ;;  %4277 = vmatprep.subr.mxu1 %v7045_v63 }
 0x541   :  { %1483 = vmatpush1.msra.mxu0 %v5785_v7  ;;  %4278 = vmatpush3.msra.mxu1 %v5896_v26 }
 0x542   :  { %1484 = vmatprep.subr.mxu0 %v5789_v54  ;;  %4279 = vmatprep.subr.mxu1 %v7045_v63 }
 0x543   :  { %1485 = vmatpush1.msra.mxu0 %v5793_v8  ;;  %4280 = vmatpush3.msra.mxu1 %v5902_v10 }
 0x544   :  { %1486 = vmatprep.subr.mxu0 %v5797_v55  ;;  %4281 = vmatprep.subr.mxu1 %v7045_v63 }
 0x545   :  { %1487 = vmatpush1.msra.mxu0 %v5801_v12  ;;  %4282 = vmatpush3.msra.mxu1 %v5908_v27 }
 0x546   :  { %1488 = vmatprep.subr.mxu0 %v5805_v56  ;;  %4283 = vmatprep.subr.mxu1 %v7045_v63 }
 0x547   :  { %1489 = vmatpush1.msra.mxu0 %v5809_v13  ;;  %4284 = vmatpush3.msra.mxu1 %v5914_v28  ;;  %v7081_v28 = vld [vmem:[#allocation40_spill] sm:$0xff] }
 0x548   :  { %1490 = vmatprep.subr.mxu0 %v5813_v57  ;;  %4285 = vmatprep.subr.mxu1 %v7045_v63 }
 0x549   :  { %1491 = vmatpush1.msra.mxu0 %v5817_v15  ;;  %1524 = vmatprep.mubr.f32.mxu0 %v7045_v63 }
 0x54a   :  { %4286 = vmatpush3.msra.mxu1 %v5921_v29  ;;  %4287 = vmatprep.mubr.msk.f32.mxu1 %vm5011_vm2, %v7045_v63 }
 0x54b   :  { %1629 = vmatprep.subr.mxu0 %v5678_v11  ;;  %4290 = vmatprep.subr.mxu1 %v7045_v63 }
 0x5ea   :  { %v1357_v30 = vpop.f32.mrf.mxu0  ;;  %v1428_v32 = vpop.f32.mrf.mxu1 }
 0x5eb   :  { %v1436_v34 = vadd.f32 %v1357_v30, %v7079_v33  ;;  %v1450_v11 = vadd.f32 %v5454_v59, %v1428_v32  ;;  %v7082_v59 = vld [vmem:[#allocation26_spill] sm:$0xff]  ;;  %v1834_v32 = vld [vmem:[#allocation10 + $0xd8] sm:$0xff] }
 0x5ec   :  { %v4254_v35 = vpop.f32.mrf.mxu1  ;;  %v1359_v38 = vpop.f32.mrf.mxu0 }
 0x5ed   :  { %v3701_v36 = vmul.f32 -1.442695, %v1436_v34  ;;  %v1443_v40 = vadd.f32 %v1359_v38, %v7080_v39 }
 0x5ef   :  { %4710 = vpow2.f32 %v3701_v36  ;;  %v3702_v41 = vmul.f32 -1.442695, %v1443_v40  ;;  %v1832_v40 = vld [vmem:[#allocation10 + $0xc8] sm:$0xff] }
 0x5f1   :  { %4712 = vpow2.f32 %v3702_v41  ;;  %v1833_v41 = vld [vmem:[#allocation10 + $0xd0] sm:$0xff] }
 0x5fc   :  { %v4711_v42 = vpop.eup %4710 }
 0x5fd   :  { %v1440_v2 = vadd.f32 1.0, %v4711_v42  ;;  %v7085_v42 = vld [vmem:[#allocation39_spill] sm:$0xff] }
 0x5fe   :  { %v4713_v20 = vpop.eup %4712 }
 0x5ff   :  { %4714 = vrcp.f32 %v1440_v2  ;;  %v1447_v29 = vadd.f32 1.0, %v4713_v20  ;;  %v7083_v20 = vld [vmem:[#allocation17_spill] sm:$0xff] }
 0x600   :  { %v7084_v2 = vld [vmem:[#allocation25_spill] sm:$0xff] }
 0x601   :  { %4716 = vrcp.f32 %v1447_v29  ;;  %v1836_v29 = vld [vmem:[#allocation10 + $0xe8] sm:$0xff] }
 0x60c   :  { %v4715_v15 = vpop.eup %4714 }
 0x60d   :  { %v1451_v57 = vmul.f32 %v4715_v15, %v1450_v11  ;;  %v1848_v15 = vld [vmem:[#allocation10 + $0x148] sm:$0xff]  ;;  %v1831_v11 = vld [vmem:[#allocation10 + $0xc0] sm:$0xff] }
 0x60e   :  { %v4717_v33 = vpop.eup %4716 }
 0x60f   :  { %v1452_v30 = vadd.f32 %v1451_v57, %v7081_v28  ;;  %v1454_v34 = vsub.f32 1.0, %v4717_v33  ;;  %v1456_v38 = vmul.f32 %v4717_v33, %v5831_v58  ;;  %v1847_v57 = vld [vmem:[#allocation10 + $0x140] sm:$0xff]  ;;  %v1830_v33 = vld [vmem:[#allocation10 + $0xb8] sm:$0xff] }
 0x610   :  { %v1835_v28 = vld [vmem:[#allocation10 + $0xe0] sm:$0xff] }
 0x611   :  { %4718 = vtanh.f32 %v1452_v30  ;;  %v1829_v30 = vld [vmem:[#allocation10 + $0xb0] sm:$0xff] }
 0x61e   :  { %v4719_v35 = vpop.eup %4718 }
 0x61f   :  { %v1455_v36 = vmul.f32 %v4719_v35, %v1454_v34  ;;  %v1828_v34 = vld [vmem:[#allocation10 + $0xa8] sm:$0xff]  ;;  %v1826_v35 = vld [vmem:[#allocation10 + $0x98] sm:$0xff] }
 0x621   :  { %v5933_v39 = vadd.f32 %v1456_v38, %v1455_v36  ;;  %v1827_v36 = vld [vmem:[#allocation10 + $0xa0] sm:$0xff]  ;;  %v1825_v38 = vld [vmem:[#allocation10 + $0x90] sm:$0xff] }
 0x623   :  { %1525 = vmatmul.mubr.f32.vlgmr.msra.gmra.mxu0 %v5933_v39  ;;  %4288 = vmatmul.mubr.f32.vlgmr.msra.gmra.mxu1 %v5933_v39 }
 0x624   :  { %1630 = vmatpush1.msra.mxu0 %v5691_v44  ;;  %4291 = vmatpush3.msra.mxu1 %v5694_v45  ;;  %v1853_v44 = vld [vmem:[#allocation10 + $0x170] sm:$0xff]  ;;  %v1854_v45 = vld [vmem:[#allocation10 + $0x178] sm:$0xff] }
 0x625   :  { %1631 = vmatprep.subr.mxu0 %v5697_v48  ;;  %4292 = vmatprep.subr.mxu1 %v7045_v63 }
 0x626   :  { %1632 = vmatpush1.msra.mxu0 %v5701_v62  ;;  %4293 = vmatpush3.msra.mxu1 %v5704_v3  ;;  %v7086_v3 = vld [vmem:[#allocation34_spill] sm:$0xff] }
 0x627   :  { %1633 = vmatprep.subr.mxu0 %v5707_v9  ;;  %4294 = vmatprep.subr.mxu1 %v7045_v63 }
 0x628   :  { %1634 = vmatpush1.msra.mxu0 %v5711_v1  ;;  %4295 = vmatpush3.msra.mxu1 %v5714_v0 }
 0x629   :  { %1635 = vmatprep.subr.mxu0 %v5717_v46  ;;  %4296 = vmatprep.subr.mxu1 %v7045_v63 }
 0x62a   :  { %1636 = vmatpush1.msra.mxu0 %v5721_v61  ;;  %4297 = vmatpush3.msra.mxu1 %v5848_v6  ;;  %v7087_v61 = vld [vmem:[#allocation35_spill] sm:$0xff] }
 0x62b   :  { %1637 = vmatprep.subr.mxu0 %v5725_v25  ;;  %4298 = vmatprep.subr.mxu1 %v7045_v63  ;;  %v1846_v6 = vld [vmem:[#allocation10 + $0x138] sm:$0xff] }
 0x62c   :  { %1638 = vmatpush1.msra.mxu0 %v5729_v4  ;;  %4299 = vmatpush3.msra.mxu1 %v5854_v16  ;;  %v7089_v16 = vld [vmem:[#allocation44_spill] sm:$0xff] }
 0x62d   :  { %1639 = vmatprep.subr.mxu0 %v5733_v37  ;;  %4300 = vmatprep.subr.mxu1 %v7045_v63 }
 0x62e   :  { %1640 = vmatpush1.msra.mxu0 %v5737_v18  ;;  %4301 = vmatpush3.msra.mxu1 %v5860_v17  ;;  %v1844_v17 = vld [vmem:[#allocation10 + $0x128] sm:$0xff] }
 0x62f   :  { %1641 = vmatprep.subr.mxu0 %v5741_v47  ;;  %4302 = vmatprep.subr.mxu1 %v7045_v63 }
 0x630   :  { %1642 = vmatpush1.msra.mxu0 %v5745_v60  ;;  %4303 = vmatpush3.msra.mxu1 %v5866_v19  ;;  %v1845_v19 = vld [vmem:[#allocation10 + $0x130] sm:$0xff] }
 0x631   :  { %1643 = vmatprep.subr.mxu0 %v5749_v49  ;;  %4304 = vmatprep.subr.mxu1 %v7045_v63  ;;  %v6007_v49 = vld [vmem:[%s6948_s4] ss:$0 sm:$0xff] }
 0x632   :  { %1644 = vmatpush1.msra.mxu0 %v5753_v14  ;;  %4305 = vmatpush3.msra.mxu1 %v5872_v21  ;;  %v1843_v21 = vld [vmem:[#allocation10 + $0x120] sm:$0xff] }
 0x633   :  { %1645 = vmatprep.subr.mxu0 %v5757_v50  ;;  %4306 = vmatprep.subr.mxu1 %v7045_v63 }
 0x634   :  { %1646 = vmatpush1.msra.mxu0 %v5761_v5  ;;  %4307 = vmatpush3.msra.mxu1 %v5878_v22  ;;  %v1841_v22 = vld [vmem:[#allocation10 + $0x110] sm:$0xff] }
 0x635   :  { %1647 = vmatprep.subr.mxu0 %v5765_v51  ;;  %4308 = vmatprep.subr.mxu1 %v7045_v63  ;;  %v7088_v51 = vld [vmem:[#allocation43_spill] sm:$0xff] }
 0x636   :  { %1648 = vmatpush1.msra.mxu0 %v5769_v31  ;;  %4309 = vmatpush3.msra.mxu1 %v5884_v23  ;;  %v1842_v23 = vld [vmem:[#allocation10 + $0x118] sm:$0xff] }
 0x637   :  { %1649 = vmatprep.subr.mxu0 %v5773_v52  ;;  %4310 = vmatprep.subr.mxu1 %v7045_v63 }
 0x638   :  { %1650 = vmatpush1.msra.mxu0 %v5777_v43  ;;  %4311 = vmatpush3.msra.mxu1 %v5890_v24  ;;  %v1840_v24 = vld [vmem:[#allocation10 + $0x108] sm:$0xff] }
 0x639   :  { %1651 = vmatprep.subr.mxu0 %v5781_v53  ;;  %4312 = vmatprep.subr.mxu1 %v7045_v63 }
 0x63a   :  { %1652 = vmatpush1.msra.mxu0 %v5785_v7  ;;  %4313 = vmatpush3.msra.mxu1 %v5896_v26  ;;  %v1838_v26 = vld [vmem:[#allocation10 + $0xf8] sm:$0xff] }
 0x63b   :  { %1653 = vmatprep.subr.mxu0 %v5789_v54  ;;  %4314 = vmatprep.subr.mxu1 %v7045_v63 }
 0x63c   :  { %1654 = vmatpush1.msra.mxu0 %v5793_v8  ;;  %4315 = vmatpush3.msra.mxu1 %v5902_v10  ;;  %v1839_v10 = vld [vmem:[#allocation10 + $0x100] sm:$0xff] }
 0x63d   :  { %1655 = vmatprep.subr.mxu0 %v5797_v55  ;;  %4316 = vmatprep.subr.mxu1 %v7045_v63  ;;  %v1852_v55 = vld [vmem:[#allocation10 + $0x168] sm:$0xff] }
 0x63e   :  { %1656 = vmatpush1.msra.mxu0 %v5801_v12  ;;  %4317 = vmatpush3.msra.mxu1 %v5908_v27  ;;  %v1850_v12 = vld [vmem:[#allocation10 + $0x158] sm:$0xff]  ;;  %v1837_v27 = vld [vmem:[#allocation10 + $0xf0] sm:$0xff] }
 0x63f   :  { %1657 = vmatprep.subr.mxu0 %v5805_v56  ;;  %4318 = vmatprep.subr.mxu1 %v7045_v63  ;;  %v1851_v56 = vld [vmem:[#allocation10 + $0x160] sm:$0xff] }
 0x640   :  { %1658 = vmatpush1.msra.mxu0 %v5809_v13  ;;  %4319 = vmatpush3.msra.mxu1 %v7082_v59  ;;  %v1849_v13 = vld [vmem:[#allocation10 + $0x150] sm:$0xff]  ;;  %v1823_v59 = vld [vmem:[#allocation10 + $0x80] sm:$0xff] }
 0x641   :  { %1659 = vmatprep.subr.mxu0 %v7083_v20  ;;  %4320 = vmatprep.subr.mxu1 %v7045_v63  ;;  %v1824_v20 = vld [vmem:[#allocation10 + $0x88] sm:$0xff] }
 0x642   :  { %1660 = vmatpush1.msra.mxu0 %v7084_v2  ;;  %4321 = vmatpush3.msra.mxu1 %v7085_v42  ;;  %v1822_v2 = vld [vmem:[#allocation10 + $0x78] sm:$0xff]  ;;  %v1820_v42 = vld [vmem:[#allocation10 + $0x68] sm:$0xff] }
 0x643   :  { %1693 = vmatprep.mubr.f32.mxu0 %v7045_v63  ;;  %4322 = vmatprep.mubr.msk.f32.mxu1 %vm5011_vm2, %v7045_v63 }
 0x644   :  { %1872 = vmatprep.subr.mxu0 %v1853_v44  ;;  %4325 = vmatprep.subr.mxu1 %v1854_v45  ;;  %v1821_v44 = vld [vmem:[#allocation10 + $0x70] sm:$0xff] }
 0x6e3   :  { %v1526_v48 = vpop.f32.mrf.mxu0  ;;  %v1597_v62 = vpop.f32.mrf.mxu1 }
 0x6e4   :  { %v1605_v9 = vadd.f32 %v1526_v48, %v7086_v3  ;;  %v1619_v14 = vadd.f32 %v6007_v49, %v1597_v62  ;;  %v1817_v48 = vld [vmem:[#allocation10 + $0x50] sm:$0xff]  ;;  %v1818_v62 = vld [vmem:[#allocation10 + $0x58] sm:$0xff]  ;;  %v1816_v3 = vld [vmem:[#allocation10 + $0x48] sm:$0xff] }
 0x6e5   :  { %v4289_v1 = vpop.f32.mrf.mxu1  ;;  %v1528_v46 = vpop.f32.mrf.mxu0 }
 0x6e6   :  { %v3703_v0 = vmul.f32 -1.442695, %v1605_v9  ;;  %v1612_v25 = vadd.f32 %v1528_v46, %v7087_v61  ;;  %v1814_v9 = vld [vmem:[#allocation10 + $0x38] sm:$0xff]  ;;  %v1815_v1 = vld [vmem:[#allocation10 + $0x40] sm:$0xff]  ;;  %v1812_v61 = vld [vmem:[#allocation10 + $0x28] sm:$0xff] }
 0x6e7   :  { %v1811_v46 = vld [vmem:[#allocation10 + $0x20] sm:$0xff] }
 0x6e8   :  { %4720 = vpow2.f32 %v3703_v0  ;;  %v3704_v4 = vmul.f32 -1.442695, %v1612_v25  ;;  %v1813_v0 = vld [vmem:[#allocation10 + $0x30] sm:$0xff]  ;;  %v1810_v25 = vld [vmem:[#allocation10 + $0x18] sm:$0xff] }
 0x6ea   :  { %4722 = vpow2.f32 %v3704_v4  ;;  %v1808_v4 = vld [vmem:[#allocation10 + $0x8] sm:$0xff] }
 0x6f5   :  { %v4721_v37 = vpop.eup %4720 }
 0x6f6   :  { %v1609_v18 = vadd.f32 1.0, %v4721_v37  ;;  %v1809_v37 = vld [vmem:[#allocation10 + $0x10] sm:$0xff] }
 0x6f7   :  { %v4723_v47 = vpop.eup %4722 }
 0x6f8   :  { %4724 = vrcp.f32 %v1609_v18  ;;  %v1616_v60 = vadd.f32 1.0, %v4723_v47  ;;  %v1807_v18 = vld [vmem:[#allocation10] sm:$0xff]  ;;  %v7090_v47 = vld [vmem:[#allocation23_spill] sm:$0xff] }
 0x6fa   :  { %4726 = vrcp.f32 %v1616_v60  ;;  %v7091_v60 = vld [vmem:[#allocation24_spill] sm:$0xff] }
 0x705   :  { %v4725_v50 = vpop.eup %4724 }
 0x706   :  { %v1620_v5 = vmul.f32 %v4725_v50, %v1619_v14  ;;  %v7092_v14 = vld [vmem:[#allocation29_spill] sm:$0xff]  ;;  %v6039_v50 = vld [vmem:[#allocation12 + $0x170] sm:$0xff] }
 0x707   :  { %v4727_v52 = vpop.eup %4726  ;;  %7093 = vst [vmem:[#allocation20_spill] sm:$0xff] %v6039_v50 }
 0x708   :  { %v1621_v31 = vadd.f32 %v1620_v5, %v7088_v51  ;;  %v1623_v43 = vsub.f32 1.0, %v4727_v52  ;;  %v1625_v54 = vmul.f32 %v4727_v52, %v5933_v39  ;;  %v6042_v5 = vld [vmem:[#allocation12 + $0x168] sm:$0xff]  ;;  %v6045_v51 = vld [vmem:[#allocation12 + $0x158] sm:$0xff] }
 0x709   :  { %v6057_v52 = vld [vmem:[#allocation12 + $0x128] sm:$0xff] }
 0x70a   :  { %4728 = vtanh.f32 %v1621_v31  ;;  %v6054_v31 = vld [vmem:[#allocation12 + $0x138] sm:$0xff] }
 0x717   :  { %v4729_v53 = vpop.eup %4728 }
 0x718   :  { %v1624_v7 = vmul.f32 %v4729_v53, %v1623_v43  ;;  %v6060_v43 = vld [vmem:[#allocation12 + $0x120] sm:$0xff]  ;;  %v6063_v53 = vld [vmem:[#allocation12 + $0x110] sm:$0xff] }
 0x71a   :  { %v6012_v8 = vadd.f32 %v1625_v54, %v1624_v7  ;;  %v6066_v7 = vld [vmem:[#allocation12 + $0x108] sm:$0xff]  ;;  %v6069_v54 = vld [vmem:[#allocation12 + $0xf8] sm:$0xff] }
 0x71c   :  { %1694 = vmatmul.mubr.f32.vlgmr.msra.gmra.mxu0 %v6012_v8  ;;  %4323 = vmatmul.mubr.f32.vlgmr.msra.gmra.mxu1 %v6012_v8 }
 0x71d   :  { %1873 = vmatpush1.msra.mxu0 %v1852_v55  ;;  %4326 = vmatpush3.msra.mxu1 %v1854_v45  ;;  %v1819_v45 = vld [vmem:[#allocation10 + $0x60] sm:$0xff]  ;;  %v6072_v55 = vld [vmem:[#allocation12 + $0xf0] sm:$0xff] }
 0x71e   :  { %1874 = vmatprep.subr.mxu0 %v1850_v12  ;;  %4327 = vmatprep.subr.mxu1 %v1851_v56  ;;  %v6075_v12 = vld [vmem:[#allocation12 + $0xe0] sm:$0xff] }
 0x71f   :  { %4357 = vmatprep.mubr.f32.mxu1 %v7089_v16  ;;  %1875 = vmatpush1.msra.mxu0 %v1849_v13  ;;  %v6081_v13 = vld [vmem:[#allocation12 + $0xc8] sm:$0xff] }
 0x720   :  { %4328 = vmatpush3.msra.mxu1 %v1851_v56  ;;  %1876 = vmatprep.subr.mxu0 %v1847_v57  ;;  %v6078_v56 = vld [vmem:[#allocation12 + $0xd8] sm:$0xff]  ;;  %v6084_v57 = vld [vmem:[#allocation12 + $0xc0] sm:$0xff] }
 0x721   :  { %4329 = vmatprep.subr.mxu1 %v1848_v15  ;;  %1877 = vmatpush1.msra.mxu0 %v1846_v6  ;;  %v6090_v6 = vld [vmem:[#allocation12 + $0xa8] sm:$0xff] }
 0x722   :  { %4330 = vmatpush3.msra.mxu1 %v1848_v15  ;;  %1878 = vmatprep.subr.mxu0 %v1844_v17  ;;  %v6087_v15 = vld [vmem:[#allocation12 + $0xb0] sm:$0xff] }
 0x723   :  { %4331 = vmatprep.subr.mxu1 %v1845_v19  ;;  %1879 = vmatpush1.msra.mxu0 %v1843_v21  ;;  %v6096_v17 = vld [vmem:[#allocation12 + $0x90] sm:$0xff]  ;;  %v6102_v21 = vld [vmem:[#allocation12 + $0x78] sm:$0xff] }
 0x724   :  { %4332 = vmatpush3.msra.mxu1 %v1845_v19  ;;  %1880 = vmatprep.subr.mxu0 %v1841_v22  ;;  %v6099_v19 = vld [vmem:[#allocation12 + $0x80] sm:$0xff]  ;;  %v6105_v22 = vld [vmem:[#allocation12 + $0x68] sm:$0xff] }
 0x725   :  { %4333 = vmatprep.subr.mxu1 %v1842_v23  ;;  %1881 = vmatpush1.msra.mxu0 %v1840_v24  ;;  %v6111_v24 = vld [vmem:[#allocation12 + $0x50] sm:$0xff] }
 0x726   :  { %4334 = vmatpush3.msra.mxu1 %v1842_v23  ;;  %1882 = vmatprep.subr.mxu0 %v1838_v26  ;;  %v6108_v23 = vld [vmem:[#allocation12 + $0x60] sm:$0xff]  ;;  %v6114_v26 = vld [vmem:[#allocation12 + $0x48] sm:$0xff] }
 0x727   :  { %4335 = vmatprep.subr.mxu1 %v1839_v10  ;;  %1883 = vmatpush1.msra.mxu0 %v1837_v27  ;;  %v6120_v27 = vld [vmem:[#allocation12 + $0x30] sm:$0xff] }
 0x728   :  { %4336 = vmatpush3.msra.mxu1 %v1839_v10  ;;  %1884 = vmatprep.subr.mxu0 %v1835_v28  ;;  %v6117_v10 = vld [vmem:[#allocation12 + $0x38] sm:$0xff]  ;;  %v6123_v28 = vld [vmem:[#allocation12 + $0x20] sm:$0xff] }
 0x729   :  { %4337 = vmatprep.subr.mxu1 %v1836_v29  ;;  %1885 = vmatpush1.msra.mxu0 %v1834_v32  ;;  %7094 = vst [vmem:[#allocation18_spill] sm:$0xff] %v6123_v28  ;;  %v6129_v32 = vld [vmem:[#allocation12 + $0x8] sm:$0xff] }
 0x72a   :  { %4338 = vmatpush3.msra.mxu1 %v1836_v29  ;;  %1886 = vmatprep.subr.mxu0 %v1832_v40  ;;  %v6126_v29 = vld [vmem:[#allocation12 + $0x18] sm:$0xff]  ;;  %7096 = vst [vmem:[#allocation21_spill] sm:$0xff] %v6129_v32  ;;  %v6131_v40 = vld [vmem:[#allocation12] sm:$0xff] }
 0x72b   :  { %4339 = vmatprep.subr.mxu1 %v1833_v41  ;;  %1887 = vmatpush1.msra.mxu0 %v1831_v11  ;;  %7095 = vst [vmem:[#allocation19_spill] sm:$0xff] %v6126_v29  ;;  %7097 = vst [vmem:[#allocation27_spill] sm:$0xff] %v6131_v40  ;;  %v6136_v11 = vld [vmem:[#allocation12 + $0x160] sm:$0xff] }
 0x72c   :  { %4340 = vmatpush3.msra.mxu1 %v1833_v41  ;;  %1888 = vmatprep.subr.mxu0 %v1829_v30  ;;  %v6134_v41 = vld [vmem:[#allocation12 + $0x178] sm:$0xff]  ;;  %v6141_v30 = vld [vmem:[#allocation12 + $0x148] sm:$0xff] }
 0x72d   :  { %4341 = vmatprep.subr.mxu1 %v1830_v33  ;;  %1889 = vmatpush1.msra.mxu0 %v1828_v34  ;;  %v6150_v34 = vld [vmem:[#allocation12 + $0x118] sm:$0xff] }
 0x72e   :  { %4342 = vmatpush3.msra.mxu1 %v1830_v33  ;;  %1890 = vmatprep.subr.mxu0 %v1826_v35  ;;  %v6146_v33 = vld [vmem:[#allocation12 + $0x130] sm:$0xff]  ;;  %v6154_v35 = vld [vmem:[#allocation12 + $0x100] sm:$0xff] }
 0x72f   :  { %4343 = vmatprep.subr.mxu1 %v1827_v36  ;;  %1891 = vmatpush1.msra.mxu0 %v1825_v38  ;;  %v6162_v38 = vld [vmem:[#allocation12 + $0xd0] sm:$0xff] }
 0x730   :  { %4344 = vmatpush3.msra.mxu1 %v1827_v36  ;;  %1892 = vmatprep.subr.mxu0 %v1823_v59  ;;  %v6158_v36 = vld [vmem:[#allocation12 + $0xe8] sm:$0xff]  ;;  %v6166_v59 = vld [vmem:[#allocation12 + $0xb8] sm:$0xff] }
 0x731   :  { %4345 = vmatprep.subr.mxu1 %v1824_v20  ;;  %1893 = vmatpush1.msra.mxu0 %v1822_v2  ;;  %v6174_v2 = vld [vmem:[#allocation12 + $0x88] sm:$0xff] }
 0x732   :  { %4346 = vmatpush3.msra.mxu1 %v1824_v20  ;;  %1894 = vmatprep.subr.mxu0 %v1820_v42  ;;  %v6170_v20 = vld [vmem:[#allocation12 + $0xa0] sm:$0xff]  ;;  %v6178_v42 = vld [vmem:[#allocation12 + $0x70] sm:$0xff] }
 0x733   :  { %4347 = vmatprep.subr.mxu1 %v1821_v44  ;;  %1895 = vmatpush1.msra.mxu0 %v1819_v45  ;;  %v6186_v45 = vld [vmem:[#allocation12 + $0x40] sm:$0xff] }
 0x734   :  { %4348 = vmatpush3.msra.mxu1 %v1821_v44  ;;  %1896 = vmatprep.subr.mxu0 %v1817_v48  ;;  %v6182_v44 = vld [vmem:[#allocation12 + $0x58] sm:$0xff]  ;;  %v6190_v48 = vld [vmem:[#allocation12 + $0x28] sm:$0xff] }
 0x735   :  { %4349 = vmatprep.subr.mxu1 %v1818_v62  ;;  %1897 = vmatpush1.msra.mxu0 %v1816_v3  ;;  %7098 = vst [vmem:[#allocation28_spill] sm:$0xff] %v6190_v48 }
 0x736   :  { %4350 = vmatpush3.msra.mxu1 %v1818_v62  ;;  %1898 = vmatprep.subr.mxu0 %v1814_v9  ;;  %v6194_v62 = vld [vmem:[#allocation12 + $0x10] sm:$0xff] }
 0x737   :  { %4351 = vmatprep.subr.mxu1 %v1815_v1  ;;  %1899 = vmatpush1.msra.mxu0 %v1813_v0  ;;  %7099 = vst [vmem:[#allocation38_spill] sm:$0xff] %v6194_v62 }
 0x738   :  { %4352 = vmatpush3.msra.mxu1 %v1815_v1  ;;  %1900 = vmatprep.subr.mxu0 %v1811_v46  ;;  %v7100_v1 = vld [vmem:[#allocation36_spill] sm:$0xff] }
 0x739   :  { %4353 = vmatprep.subr.mxu1 %v1812_v61  ;;  %1901 = vmatpush1.msra.mxu0 %v1810_v25 }
 0x73a   :  { %4354 = vmatpush3.msra.mxu1 %v1812_v61  ;;  %1902 = vmatprep.subr.mxu0 %v1808_v4  ;;  %v7101_v4 = vld [vmem:[#allocation37_spill] sm:$0xff] }
 0x73b   :  { %4355 = vmatprep.subr.mxu1 %v1809_v37  ;;  %1903 = vmatpush1.msra.mxu0 %v1807_v18 }
 0x73c   :  { %1936 = vmatprep.mubr.f32.mxu0 %v7045_v63  ;;  %4356 = vmatpush3.msra.mxu1 %v1809_v37 }
 0x73d   :  { %1937 = vmatmul.mubr.f32.vlgmr.msra.gmra.mxu0 %v7089_v16  ;;  %4358 = vmatmul.mubr.f32.vlgmr.msra.gmra.mxu1 %v7090_v47  ;;  %v6093_v16 = vld [vmem:[#allocation12 + $0x98] sm:$0xff] }
 0x73e   :  { %4360 = vmatprep.mubr.f32.mxu1 %v7091_v60  ;;  %1942 = vmatprep.mubr.f32.mxu0 %v7045_v63 }
 0x73f   :  { %4369 = vmatprep.subr.mxu1 %v7045_v63  ;;  %2170 = vmatprep.subr.mxu0 %v6039_v50 }
 0x740   :  { %2171 = vmatpush1.msra.mxu0 %v6042_v5  ;;  %4370 = vmatpush3.msra.mxu1 %v6134_v41 }
 0x741   :  { %1943 = vmatmul.mubr.f32.gmra.mxu0 %v7090_v47  ;;  %4361 = vmatmul.mubr.f32.gmra.mxu1 %v7092_v14 }
 0x742   :  { %4363 = vmatprep.mubr.f32.mxu1 %v5831_v58  ;;  %1948 = vmatprep.mubr.f32.mxu0 %v7045_v63 }
 0x743   :  { %2172 = vmatprep.subr.mxu0 %v6045_v51  ;;  %4371 = vmatprep.subr.mxu1 %v7045_v63 }
 0x744   :  { %4372 = vmatpush3.msra.mxu1 %v6136_v11 }
 0x745   :  { %1949 = vmatmul.mubr.f32.gmra.mxu0 %v7091_v60  ;;  %4364 = vmatmul.mubr.f32.gmra.mxu1 %v5933_v39 }
 0x746   :  { %4366 = vmatprep.mubr.f32.mxu1 %v6012_v8  ;;  %1954 = vmatprep.mubr.f32.mxu0 %v7045_v63 }
 0x747   :  { %4373 = vmatprep.subr.mxu1 %v7045_v63 }
 0x748   :  { %4374 = vmatpush3.msra.mxu1 %v6141_v30 }
 0x749   :  { %1955 = vmatmul.mubr.f32.gmra.mxu0 %v7092_v14  ;;  %4375 = vmatprep.subr.mxu1 %v7045_v63 }
 0x74a   :  { %1960 = vmatprep.mubr.f32.mxu0 %v7045_v63  ;;  %4376 = vmatpush3.msra.mxu1 %v6146_v33 }
 0x74b   :  { %4377 = vmatprep.subr.mxu1 %v7045_v63 }
 0x74c   :  { %4378 = vmatpush3.msra.mxu1 %v6150_v34 }
 0x74d   :  { %1961 = vmatmul.mubr.f32.gmra.mxu0 %v5831_v58  ;;  %v6048_v58 = vld [vmem:[#allocation12 + $0x150] sm:$0xff]  ;;  %4379 = vmatprep.subr.mxu1 %v7045_v63 }
 0x74e   :  { %1966 = vmatprep.mubr.f32.mxu0 %v7045_v63  ;;  %2173 = vmatpush1.msra.mxu0 %v6048_v58 }
 0x74f   :  { %4380 = vmatpush3.msra.mxu1 %v6154_v35 }
 0x750   :  { %4381 = vmatprep.subr.mxu1 %v7045_v63 }
 0x751   :  { %1967 = vmatmul.mubr.f32.gmra.mxu0 %v5933_v39  ;;  %v6051_v39 = vld [vmem:[#allocation12 + $0x140] sm:$0xff]  ;;  %4382 = vmatpush3.msra.mxu1 %v6158_v36 }
 0x752   :  { %1972 = vmatprep.mubr.f32.mxu0 %v7045_v63  ;;  %2174 = vmatprep.subr.mxu0 %v6051_v39 }
 0x753   :  { %2175 = vmatpush1.msra.mxu0 %v6054_v31  ;;  %4383 = vmatprep.subr.mxu1 %v7045_v63 }
 0x754   :  { %2176 = vmatprep.subr.mxu0 %v6057_v52  ;;  %4384 = vmatpush3.msra.mxu1 %v6162_v38 }
 0x755   :  { %1973 = vmatmul.mubr.f32.gmra.mxu0 %v6012_v8  ;;  %4385 = vmatprep.subr.mxu1 %v7045_v63 }
 0x756   :  { %1978 = vmatprep.mubr.f32.mxu0 %v7045_v63  ;;  %2177 = vmatpush1.msra.mxu0 %v6060_v43 }
 0x757   :  { %2178 = vmatprep.subr.mxu0 %v6063_v53  ;;  %4386 = vmatpush3.msra.mxu1 %v6166_v59 }
 0x758   :  { %2179 = vmatpush1.msra.mxu0 %v6066_v7  ;;  %4387 = vmatprep.subr.mxu1 %v7045_v63 }
 0x759   :  { %2180 = vmatprep.subr.mxu0 %v6069_v54  ;;  %4388 = vmatpush3.msra.mxu1 %v6170_v20 }
 0x75a   :  { %2181 = vmatpush1.msra.mxu0 %v6072_v55  ;;  %4389 = vmatprep.subr.mxu1 %v7045_v63 }
 0x75b   :  { %2182 = vmatprep.subr.mxu0 %v6075_v12  ;;  %4390 = vmatpush3.msra.mxu1 %v6174_v2 }
 0x75c   :  { %2183 = vmatpush1.msra.mxu0 %v6078_v56  ;;  %4391 = vmatprep.subr.mxu1 %v7045_v63 }
 0x75d   :  { %2184 = vmatprep.subr.mxu0 %v6081_v13  ;;  %4392 = vmatpush3.msra.mxu1 %v6178_v42 }
 0x75e   :  { %2185 = vmatpush1.msra.mxu0 %v6084_v57  ;;  %4393 = vmatprep.subr.mxu1 %v7045_v63 }
 0x75f   :  { %2186 = vmatprep.subr.mxu0 %v6087_v15  ;;  %4394 = vmatpush3.msra.mxu1 %v6182_v44 }
 0x760   :  { %2187 = vmatpush1.msra.mxu0 %v6090_v6  ;;  %4395 = vmatprep.subr.mxu1 %v7045_v63 }
 0x761   :  { %2188 = vmatprep.subr.mxu0 %v6093_v16  ;;  %4396 = vmatpush3.msra.mxu1 %v6186_v45 }
 0x762   :  { %2189 = vmatpush1.msra.mxu0 %v6096_v17  ;;  %4397 = vmatprep.subr.mxu1 %v7045_v63 }
 0x763   :  { %2190 = vmatprep.subr.mxu0 %v6099_v19  ;;  %4398 = vmatpush3.msra.mxu1 %v6190_v48  ;;  %v7102_v48 = vld [vmem:[#allocation42_spill] sm:$0xff] }
 0x764   :  { %2191 = vmatpush1.msra.mxu0 %v6102_v21  ;;  %4399 = vmatprep.subr.mxu1 %v7045_v63 }
 0x765   :  { %2192 = vmatprep.subr.mxu0 %v6105_v22  ;;  %4400 = vmatpush3.msra.mxu1 %v6194_v62 }
 0x766   :  { %2193 = vmatpush1.msra.mxu0 %v6108_v23  ;;  %4404 = vmatprep.subr.mxu1 %v7045_v63 }
 0x767   :  { %2194 = vmatprep.subr.mxu0 %v6111_v24 }
 0x768   :  { %2195 = vmatpush1.msra.mxu0 %v6114_v26 }
 0x769   :  { %2196 = vmatprep.subr.mxu0 %v6117_v10 }
 0x76a   :  { %2197 = vmatpush1.msra.mxu0 %v6120_v27 }
 0x76b   :  { %2198 = vmatprep.subr.mxu0 %v6123_v28 }
 0x76c   :  { %2199 = vmatpush1.msra.mxu0 %v6126_v29 }
 0x76d   :  { %2200 = vmatprep.subr.mxu0 %v6129_v32 }
 0x76e   :  { %2201 = vmatpush1.msra.mxu0 %v6131_v40 }
 0x76f   :  { %2337 = vmatprep.subr.mxu0 %v6039_v50 }
 0x7dc   :  { %v1695_v3 = vpop.f32.mrf.mxu0  ;;  %v1766_v9 = vpop.f32.mrf.mxu1 }
 0x7dd   :  { %v1774_v0 = vadd.f32 %v1695_v3, %v7100_v1  ;;  %v1788_v62 = vadd.f32 %v6007_v49, %v1766_v9  ;;  %v7103_v49 = vld [vmem:[#allocation28_spill] sm:$0xff] }
 0x7de   :  { %v4324_v46 = vpop.f32.mrf.mxu1  ;;  %v1697_v25 = vpop.f32.mrf.mxu0 }
 0x7df   :  { %v3705_v61 = vmul.f32 -1.442695, %v1774_v0  ;;  %v1781_v37 = vadd.f32 %v1697_v25, %v7101_v4 }
 0x7e1   :  { %4730 = vpow2.f32 %v3705_v61  ;;  %v3706_v18 = vmul.f32 -1.442695, %v1781_v37 }
 0x7e3   :  { %4732 = vpow2.f32 %v3706_v18 }
 0x7ee   :  { %v4731_v47 = vpop.eup %4730 }
 0x7ef   :  { %v1778_v60 = vadd.f32 1.0, %v4731_v47 }
 0x7f0   :  { %v4733_v14 = vpop.eup %4732 }
 0x7f1   :  { %4734 = vrcp.f32 %v1778_v60  ;;  %v1785_v50 = vadd.f32 1.0, %v4733_v14 }
 0x7f3   :  { %4736 = vrcp.f32 %v1785_v50  ;;  %v7105_v50 = vld [vmem:[#allocation27_spill] sm:$0xff] }
 0x7fe   :  { %v4735_v40 = vpop.eup %4734 }
 0x7ff   :  { %v1789_v32 = vmul.f32 %v4735_v40, %v1788_v62  ;;  %v7107_v40 = vld [vmem:[#allocation20_spill] sm:$0xff] }
 0x800   :  { %v4737_v1 = vpop.eup %4736 }
 0x801   :  { %v1790_v3 = vadd.f32 %v1789_v32, %v7102_v48  ;;  %v1792_v0 = vsub.f32 1.0, %v4737_v1  ;;  %v1794_v25 = vmul.f32 %v4737_v1, %v6012_v8  ;;  %v7104_v8 = vld [vmem:[#allocation21_spill] sm:$0xff]  ;;  %v7106_v32 = vld [vmem:[#allocation38_spill] sm:$0xff]  ;;  %v1938_v48 = vpop.f32.mrf.mxu0 }
 0x803   :  { %4738 = vtanh.f32 %v1790_v3  ;;  %v1940_v62 = vpop.f32.mrf.mxu0  ;;  %v6289_v3 = vpop.f32.mrf.mxu1 }
 0x804   :  { %7114 = vst [vmem:[#allocation26_spill] sm:$0xff] %v6289_v3 }
 0x805   :  { %v6277_v9 = vpop.f32.mrf.mxu0 }
 0x806   :  { %7108 = vst [vmem:[#allocation30_spill] sm:$0xff] %v6277_v9 }
 0x807   :  { %v6279_v37 = vpop.f32.mrf.mxu0 }
 0x808   :  { %7109 = vst [vmem:[#allocation31_spill] sm:$0xff] %v6279_v37 }
 0x809   :  { %v6281_v18 = vpop.f32.mrf.mxu0 }
 0x80a   :  { %7110 = vst [vmem:[#allocation41_spill] sm:$0xff] %v6281_v18 }
 0x80b   :  { %v6283_v47 = vpop.f32.mrf.mxu0 }
 0x80c   :  { %7111 = vst [vmem:[#allocation32_spill] sm:$0xff] %v6283_v47 }
 0x80d   :  { %v6285_v60 = vpop.f32.mrf.mxu0 }
 0x80e   :  { %7112 = vst [vmem:[#allocation33_spill] sm:$0xff] %v6285_v60 }
 0x80f   :  { %v6287_v14 = vpop.f32.mrf.mxu0 }
 0x810   :  { %v4739_v46 = vpop.eup %4738  ;;  %7113 = vst [vmem:[#allocation40_spill] sm:$0xff] %v6287_v14  ;;  %v1855_v14 = vld [vmem:[%s6950_s6] sm:$0x7] }
 0x811   :  { %v1793_v61 = vmul.f32 %v4739_v46, %v1792_v0  ;;  %v6291_v1 = vpop.f32.mrf.mxu0  ;;  %v2051_v0 = vpop.f32.mrf.mxu1 }
 0x812   :  { %7115 = vst [vmem:[#allocation17_spill] sm:$0xff] %v6291_v1 }
 0x813   :  { %v1795_v4 = vadd.f32 %v1794_v25, %v1793_v61  ;;  %v6293_v46 = vpop.f32.mrf.mxu0  ;;  %v6295_v61 = vpop.f32.mrf.mxu1 }
 0x814   :  { %7116 = vst [vmem:[#allocation25_spill] sm:$0xff] %v6293_v46  ;;  %7117 = vst [vmem:[#allocation39_spill] sm:$0xff] %v6295_v61  ;;  %v7125_v46 = vld [vmem:[#allocation22_spill] sm:$0xff] }
 0x815   :  { %1979 = vmatmul.mubr.f32.gmra.mxu0 %v1795_v4  ;;  %4367 = vmatmul.mubr.f32.gmra.mxu1 %v1795_v4  ;;  %v6297_v25 = vpop.f32.mrf.mxu0  ;;  %v6299_v4 = vpop.f32.mrf.mxu1  ;;  %v7126_v61 = vsub.s32 0, %v7125_v46 }
 0x816   :  { %2234 = vmatprep.mubr.f32.mxu0 %v7045_v63  ;;  %4401 = vmatprep.mubr.msk.f32.mxu1 %vm5011_vm2, %v7045_v63  ;;  %7118 = vst [vmem:[#allocation34_spill] sm:$0xff] %v6297_v25  ;;  %7119 = vst [vmem:[#allocation35_spill] sm:$0xff] %v6299_v4 }
 0x817   :  { %v6301_v18 = vpop.f32.mrf.mxu0  ;;  %v6303_v47 = vpop.f32.mrf.mxu1  ;;  %v6316_v37 = vrot.slane %v1855_v14, %v7126_v61 }
 0x818   :  { %7120 = vst [vmem:[#allocation43_spill] sm:$0xff] %v6301_v18  ;;  %7121 = vst [vmem:[#allocation44_spill] sm:$0xff] %v6303_v47 }
 0x819   :  { %2235 = vmatmul.mubr.f32.vlgmr.msra.gmra.mxu0 %v7045_v63  ;;  %4402 = vmatmul.mubr.f32.vlgmr.msra.gmra.mxu1 %v7045_v63  ;;  %v6305_v60 = vpop.f32.mrf.mxu0  ;;  %v6310_v1 = vpop.f32.mrf.mxu1  ;;  %7127 = vst [vmem:[#allocation36_spill] sm:$0xff] %v6316_v37 }
 0x81a   :  { %2338 = vmatpush1.msra.mxu0 %v6042_v5  ;;  %4405 = vmatpush3.msra.mxu1 %v6134_v41  ;;  %7122 = vst [vmem:[#allocation23_spill] sm:$0xff] %v6305_v60  ;;  %7123 = vst [vmem:[#allocation24_spill] sm:$0xff] %v6310_v1  ;;  %v1939_v60 = vadd.f32 %v1938_v48, %v6316_v37  ;;  %v7132_v1 = vsub.s32 1, %v7125_v46  ;;  %v6335_v37 = vld [vmem:[%s6952_s8] ss:$0 sm:$0xff] }
 0x81b   :  { %2339 = vmatprep.subr.mxu0 %v6045_v51  ;;  %4406 = vmatprep.subr.mxu1 %v7045_v63  ;;  %v6312_v3 = vpop.f32.mrf.mxu0 }
 0x81c   :  { %2340 = vmatpush1.msra.mxu0 %v6048_v58  ;;  %4407 = vmatpush3.msra.mxu1 %v6136_v11  ;;  %7124 = vst [vmem:[#allocation29_spill] sm:$0xff] %v6312_v3 }
 0x81d   :  { %2341 = vmatprep.subr.mxu0 %v6051_v39  ;;  %4408 = vmatprep.subr.mxu1 %v7045_v63 }
 0x81e   :  { %2342 = vmatpush1.msra.mxu0 %v6054_v31  ;;  %4409 = vmatpush3.msra.mxu1 %v6141_v30 }
 0x81f   :  { %2343 = vmatprep.subr.mxu0 %v6057_v52  ;;  %4410 = vmatprep.subr.mxu1 %v7045_v63 }
 0x820   :  { %2344 = vmatpush1.msra.mxu0 %v6060_v43  ;;  %4411 = vmatpush3.msra.mxu1 %v6146_v33 }
 0x821   :  { %2345 = vmatprep.subr.mxu0 %v6063_v53  ;;  %4412 = vmatprep.subr.mxu1 %v7045_v63 }
 0x822   :  { %2346 = vmatpush1.msra.mxu0 %v6066_v7  ;;  %4413 = vmatpush3.msra.mxu1 %v6150_v34 }
 0x823   :  { %2347 = vmatprep.subr.mxu0 %v6069_v54  ;;  %4414 = vmatprep.subr.mxu1 %v7045_v63 }
 0x824   :  { %2348 = vmatpush1.msra.mxu0 %v6072_v55  ;;  %4415 = vmatpush3.msra.mxu1 %v6154_v35 }
 0x825   :  { %2349 = vmatprep.subr.mxu0 %v6075_v12  ;;  %4416 = vmatprep.subr.mxu1 %v7045_v63 }
 0x826   :  { %2350 = vmatpush1.msra.mxu0 %v6078_v56  ;;  %4417 = vmatpush3.msra.mxu1 %v6158_v36 }
 0x827   :  { %2351 = vmatprep.subr.mxu0 %v6081_v13  ;;  %4418 = vmatprep.subr.mxu1 %v7045_v63 }
 0x828   :  { %2352 = vmatpush1.msra.mxu0 %v6084_v57  ;;  %4419 = vmatpush3.msra.mxu1 %v6162_v38 }
 0x829   :  { %2353 = vmatprep.subr.mxu0 %v6087_v15  ;;  %4420 = vmatprep.subr.mxu1 %v7045_v63 }
 0x82a   :  { %2354 = vmatpush1.msra.mxu0 %v6090_v6  ;;  %4421 = vmatpush3.msra.mxu1 %v6166_v59 }
 0x82b   :  { %2355 = vmatprep.subr.mxu0 %v6093_v16  ;;  %4422 = vmatprep.subr.mxu1 %v7045_v63 }
 0x82c   :  { %2356 = vmatpush1.msra.mxu0 %v6096_v17  ;;  %4423 = vmatpush3.msra.mxu1 %v6170_v20 }
 0x82d   :  { %2357 = vmatprep.subr.mxu0 %v6099_v19  ;;  %4424 = vmatprep.subr.mxu1 %v7045_v63 }
 0x82e   :  { %2358 = vmatpush1.msra.mxu0 %v6102_v21  ;;  %4425 = vmatpush3.msra.mxu1 %v6174_v2 }
 0x82f   :  { %2359 = vmatprep.subr.mxu0 %v6105_v22  ;;  %4426 = vmatprep.subr.mxu1 %v7045_v63 }
 0x830   :  { %2360 = vmatpush1.msra.mxu0 %v6108_v23  ;;  %4427 = vmatpush3.msra.mxu1 %v6178_v42 }
 0x831   :  { %2361 = vmatprep.subr.mxu0 %v6111_v24  ;;  %4428 = vmatprep.subr.mxu1 %v7045_v63 }
 0x832   :  { %2362 = vmatpush1.msra.mxu0 %v6114_v26  ;;  %4429 = vmatpush3.msra.mxu1 %v6182_v44 }
 0x833   :  { %2363 = vmatprep.subr.mxu0 %v6117_v10  ;;  %4430 = vmatprep.subr.mxu1 %v7045_v63 }
 0x834   :  { %2364 = vmatpush1.msra.mxu0 %v6120_v27  ;;  %4431 = vmatpush3.msra.mxu1 %v6186_v45 }
 0x835   :  { %2365 = vmatprep.subr.mxu0 %v6123_v28  ;;  %4432 = vmatprep.subr.mxu1 %v7045_v63 }
 0x836   :  { %2366 = vmatpush1.msra.mxu0 %v6126_v29  ;;  %4433 = vmatpush3.msra.mxu1 %v7103_v49 }
 0x837   :  { %2367 = vmatprep.subr.mxu0 %v7104_v8  ;;  %4434 = vmatprep.subr.mxu1 %v7045_v63 }
 0x838   :  { %2368 = vmatpush1.msra.mxu0 %v7105_v50  ;;  %2401 = vmatprep.mubr.f32.mxu0 %v7045_v63 }
 0x839   :  { %4435 = vmatpush3.msra.mxu1 %v7106_v32  ;;  %4436 = vmatprep.mubr.msk.f32.mxu1 %vm5011_vm2, %v7045_v63  ;;  %v6329_v32 = vrot.slane %v1855_v14, %v7132_v1 }
 0x83a   :  { %2504 = vmatprep.subr.mxu0 %v7107_v40  ;;  %4439 = vmatprep.subr.mxu1 %v7045_v63 }
 0x8d5   :  { %v6318_v25 = vpop.f32.mrf.mxu0  ;;  %v6320_v4 = vpop.f32.mrf.mxu1 }
 0x8d6   :  { %7128 = vst [vmem:[#allocation37_spill] sm:$0xff] %v6318_v25  ;;  %7129 = vst [vmem:[#allocation42_spill] sm:$0xff] %v6320_v4  ;;  %v1941_v25 = vadd.f32 %v1940_v62, %v6329_v32 }
 0x8d7   :  { %v6322_v18 = vpop.f32.mrf.mxu0  ;;  %v6324_v47 = vpop.f32.mrf.mxu1 }
 0x8d8   :  { %7130 = vst [vmem:[#allocation45_spill] sm:$0xff] %v6322_v18  ;;  %7131 = vst [vmem:[#allocation46_spill] sm:$0xff] %v6324_v47 }
 0x8d9   :  { %v2236_v9 = vpop.f32.mrf.mxu0  ;;  %v2307_v40 = vpop.f32.mrf.mxu1 }
 0x8da   :  { %v2314_v3 = vadd.f32 %v2236_v9, %v1939_v60  ;;  %v7133_v9 = vsub.s32 2, %v7125_v46  ;;  %v7141_v46 = vld [vmem:[#allocation31_spill] sm:$0xff] }
 0x8db   :  { %v4403_v50 = vpop.f32.mrf.mxu1  ;;  %v2238_v8 = vpop.f32.mrf.mxu0 }
 0x8dc   :  { %v3708_v61 = vmul.f32 -1.442695, %v2314_v3  ;;  %v2321_v4 = vadd.f32 %v2238_v8, %v1941_v25  ;;  %v2328_v50 = vadd.f32 %v6335_v37, %v2307_v40  ;;  %v6340_v60 = vrot.slane %v1855_v14, %v7133_v9  ;;  %v6346_v40 = vld [vmem:[%s6953_s9] ss:$0 sm:$0xff]  ;;  %v7137_v9 = vld [vmem:[#allocation38_spill] sm:$0xff] }
 0x8de   :  { %4740 = vpow2.f32 %v3708_v61  ;;  %v3709_v49 = vmul.f32 -1.442695, %v2321_v4  ;;  %v2052_v8 = vadd.f32 %v2051_v0, %v6340_v60  ;;  %v7134_v0 = vld [vmem:[#allocation28_spill] sm:$0xff] }
 0x8e0   :  { %4742 = vpow2.f32 %v3709_v49 }
 0x8eb   :  { %v4741_v18 = vpop.eup %4740 }
 0x8ec   :  { %v2318_v47 = vadd.f32 1.0, %v4741_v18 }
 0x8ed   :  { %v4743_v48 = vpop.eup %4742 }
 0x8ee   :  { %4744 = vrcp.f32 %v2318_v47  ;;  %v2325_v1 = vadd.f32 1.0, %v4743_v48 }
 0x8f0   :  { %4746 = vrcp.f32 %v2325_v1  ;;  %v7135_v1 = vld [vmem:[#allocation21_spill] sm:$0xff] }
 0x8fb   :  { %v4745_v62 = vpop.eup %4744 }
 0x8fc   :  { %v2329_v49 = vmul.f32 %v4745_v62, %v2328_v50  ;;  %v7136_v50 = vld [vmem:[#allocation27_spill] sm:$0xff]  ;;  %v7138_v62 = vld [vmem:[#allocation20_spill] sm:$0xff] }
 0x8fd   :  { %v4747_v47 = vpop.eup %4746 }
 0x8fe   :  { %v2330_v18 = vadd.f32 %v2329_v49, %v2052_v8  ;;  %v2332_v3 = vsub.f32 1.0, %v4747_v47  ;;  %v2334_v61 = vmul.f32 0.0, %v4747_v47  ;;  %v7139_v8 = vld [vmem:[#allocation36_spill] sm:$0xff]  ;;  %v7140_v49 = vld [vmem:[#allocation30_spill] sm:$0xff] }
 0x900   :  { %4748 = vtanh.f32 %v2330_v18  ;;  %v1945_v18 = vadd.f32 %v7140_v49, %v7139_v8 }
 0x90d   :  { %v4749_v25 = vpop.eup %4748 }
 0x90e   :  { %v2333_v4 = vmul.f32 %v4749_v25, %v2332_v3 }
 0x910   :  { %v6348_v48 = vadd.f32 %v2334_v61, %v2333_v4 }
 0x912   :  { %2402 = vmatmul.mubr.f32.vlgmr.msra.gmra.mxu0 %v6348_v48  ;;  %4437 = vmatmul.mubr.f32.vlgmr.msra.gmra.mxu1 %v6348_v48  ;;  %v3522_v14 = vmul.f32 %v6346_v40, %v6348_v48 }
 0x913   :  { %2505 = vmatpush1.msra.mxu0 %v6042_v5  ;;  %4440 = vmatpush3.msra.mxu1 %v6134_v41 }
 0x914   :  { %3530 = vadd.xlane.f32.xlu0 %v3522_v14  ;;  %2506 = vmatprep.subr.mxu0 %v6045_v51 }
 0x915   :  { %4441 = vmatprep.subr.mxu1 %v7045_v63  ;;  %2507 = vmatpush1.msra.mxu0 %v6048_v58 }
 0x916   :  { %4442 = vmatpush3.msra.mxu1 %v6136_v11  ;;  %2508 = vmatprep.subr.mxu0 %v6051_v39 }
 0x917   :  { %4443 = vmatprep.subr.mxu1 %v7045_v63  ;;  %2509 = vmatpush1.msra.mxu0 %v6054_v31 }
 0x918   :  { %4444 = vmatpush3.msra.mxu1 %v6141_v30  ;;  %2510 = vmatprep.subr.mxu0 %v6057_v52 }
 0x919   :  { %4445 = vmatprep.subr.mxu1 %v7045_v63  ;;  %2511 = vmatpush1.msra.mxu0 %v6060_v43 }
 0x91a   :  { %4446 = vmatpush3.msra.mxu1 %v6146_v33  ;;  %2512 = vmatprep.subr.mxu0 %v6063_v53 }
 0x91b   :  { %4447 = vmatprep.subr.mxu1 %v7045_v63  ;;  %2513 = vmatpush1.msra.mxu0 %v6066_v7 }
 0x91c   :  { %4448 = vmatpush3.msra.mxu1 %v6150_v34  ;;  %2514 = vmatprep.subr.mxu0 %v6069_v54 }
 0x91d   :  { %4449 = vmatprep.subr.mxu1 %v7045_v63  ;;  %2515 = vmatpush1.msra.mxu0 %v6072_v55 }
 0x91e   :  { %4450 = vmatpush3.msra.mxu1 %v6154_v35  ;;  %2516 = vmatprep.subr.mxu0 %v6075_v12 }
 0x91f   :  { %4451 = vmatprep.subr.mxu1 %v7045_v63  ;;  %2517 = vmatpush1.msra.mxu0 %v6078_v56 }
 0x920   :  { %4452 = vmatpush3.msra.mxu1 %v6158_v36  ;;  %2518 = vmatprep.subr.mxu0 %v6081_v13 }
 0x921   :  { %4453 = vmatprep.subr.mxu1 %v7045_v63  ;;  %2519 = vmatpush1.msra.mxu0 %v6084_v57 }
 0x922   :  { %4454 = vmatpush3.msra.mxu1 %v6162_v38  ;;  %2520 = vmatprep.subr.mxu0 %v6087_v15 }
 0x923   :  { %4455 = vmatprep.subr.mxu1 %v7045_v63  ;;  %2521 = vmatpush1.msra.mxu0 %v6090_v6 }
 0x924   :  { %4456 = vmatpush3.msra.mxu1 %v6166_v59  ;;  %2522 = vmatprep.subr.mxu0 %v6093_v16 }
 0x925   :  { %4457 = vmatprep.subr.mxu1 %v7045_v63  ;;  %2523 = vmatpush1.msra.mxu0 %v6096_v17 }
 0x926   :  { %4458 = vmatpush3.msra.mxu1 %v6170_v20  ;;  %2524 = vmatprep.subr.mxu0 %v6099_v19 }
 0x927   :  { %4459 = vmatprep.subr.mxu1 %v7045_v63  ;;  %2525 = vmatpush1.msra.mxu0 %v6102_v21 }
 0x928   :  { %4460 = vmatpush3.msra.mxu1 %v6174_v2  ;;  %2526 = vmatprep.subr.mxu0 %v6105_v22 }
 0x929   :  { %4461 = vmatprep.subr.mxu1 %v7045_v63  ;;  %2527 = vmatpush1.msra.mxu0 %v6108_v23 }
 0x92a   :  { %4462 = vmatpush3.msra.mxu1 %v6178_v42  ;;  %2528 = vmatprep.subr.mxu0 %v6111_v24 }
 0x92b   :  { %4463 = vmatprep.subr.mxu1 %v7045_v63  ;;  %2529 = vmatpush1.msra.mxu0 %v6114_v26 }
 0x92c   :  { %4464 = vmatpush3.msra.mxu1 %v6182_v44  ;;  %2530 = vmatprep.subr.mxu0 %v6117_v10 }
 0x92d   :  { %4465 = vmatprep.subr.mxu1 %v7045_v63  ;;  %2531 = vmatpush1.msra.mxu0 %v6120_v27 }
 0x92e   :  { %4466 = vmatpush3.msra.mxu1 %v6186_v45  ;;  %2532 = vmatprep.subr.mxu0 %v6123_v28 }
 0x92f   :  { %4467 = vmatprep.subr.mxu1 %v7045_v63  ;;  %2533 = vmatpush1.msra.mxu0 %v6126_v29 }
 0x930   :  { %4468 = vmatpush3.msra.mxu1 %v7134_v0  ;;  %2534 = vmatprep.subr.mxu0 %v7135_v1 }
 0x931   :  { %4469 = vmatprep.subr.mxu1 %v7045_v63  ;;  %2535 = vmatpush1.msra.mxu0 %v7136_v50  ;;  %v1947_v50 = vadd.f32 %v7141_v46, %v6329_v32 }
 0x932   :  { %2568 = vmatprep.mubr.f32.mxu0 %v7045_v63  ;;  %4470 = vmatpush3.msra.mxu1 %v7137_v9 }
 0x933   :  { %4471 = vmatprep.mubr.msk.f32.mxu1 %vm5011_vm2, %v7045_v63  ;;  %2671 = vmatprep.subr.mxu0 %v7138_v62 }
 0x934   :  { %4474 = vmatprep.subr.mxu1 %v7045_v63 }
 0x9d2   :  { %v2403_v47 = vpop.f32.mrf.mxu0  ;;  %v2474_v3 = vpop.f32.mrf.mxu1 }
 0x9d3   :  { %v2481_v25 = vadd.f32 %v2403_v47, %v1945_v18  ;;  %v2495_v49 = vadd.f32 %v6335_v37, %v2474_v3  ;;  %v7142_v18 = vld [vmem:[#allocation26_spill] sm:$0xff]  ;;  %v7147_v3 = vld [vmem:[#allocation27_spill] sm:$0xff] }
 0x9d4   :  { %v4438_v4 = vpop.f32.mrf.mxu1  ;;  %v2405_v14 = vpop.f32.mrf.mxu0  ;;  %v2057_v47 = vadd.f32 %v7142_v18, %v6340_v60  ;;  %v7150_v18 = vld [vmem:[#allocation36_spill] sm:$0xff] }
 0x9d5   :  { %v3710_v61 = vmul.f32 -1.442695, %v2481_v25  ;;  %v2488_v9 = vadd.f32 %v2405_v14, %v1947_v50  ;;  %v7148_v14 = vld [vmem:[#allocation38_spill] sm:$0xff] }
 0x9d7   :  { %4750 = vpow2.f32 %v3710_v61  ;;  %v3711_v1 = vmul.f32 -1.442695, %v2488_v9 }
 0x9d9   :  { %4752 = vpow2.f32 %v3711_v1 }
 0x9e4   :  { %v4751_v0 = vpop.eup %4750 }
 0x9e5   :  { %v2485_v62 = vadd.f32 1.0, %v4751_v0 }
 0x9e6   :  { %v4753_v29 = vpop.eup %4752 }
 0x9e7   :  { %4754 = vrcp.f32 %v2485_v62  ;;  %v2492_v28 = vadd.f32 1.0, %v4753_v29  ;;  %v7145_v62 = vld [vmem:[#allocation28_spill] sm:$0xff] }
 0x9e9   :  { %4756 = vrcp.f32 %v2492_v28  ;;  %v7143_v28 = vld [vmem:[#allocation18_spill] sm:$0xff] }
 0x9f4   :  { %v4755_v8 = vpop.eup %4754 }
 0x9f5   :  { %v2496_v25 = vmul.f32 %v4755_v8, %v2495_v49  ;;  %v7146_v8 = vld [vmem:[#allocation21_spill] sm:$0xff]  ;;  %v7149_v49 = vld [vmem:[#allocation20_spill] sm:$0xff] }
 0x9f6   :  { %v4757_v46 = vpop.eup %4756 }
 0x9f7   :  { %v2497_v4 = vadd.f32 %v2496_v25, %v2057_v47  ;;  %v2499_v61 = vsub.f32 1.0, %v4757_v46  ;;  %v2501_v1 = vmul.f32 %v4757_v46, %v6348_v48  ;;  %v7144_v48 = vld [vmem:[#allocation19_spill] sm:$0xff]  ;;  %v7151_v47 = vld [vmem:[#allocation41_spill] sm:$0xff] }
 0x9f8   :  { %v1951_v25 = vadd.f32 %v7151_v47, %v7150_v18 }
 0x9f9   :  { %4758 = vtanh.f32 %v2497_v4 }
 0xa06   :  { %v4759_v50 = vpop.eup %4758 }
 0xa07   :  { %v2500_v9 = vmul.f32 %v4759_v50, %v2499_v61 }
 0xa09   :  { %v6429_v0 = vadd.f32 %v2501_v1, %v2500_v9 }
 0xa0b   :  { %2569 = vmatmul.mubr.f32.vlgmr.msra.gmra.mxu0 %v6429_v0  ;;  %4472 = vmatmul.mubr.f32.vlgmr.msra.gmra.mxu1 %v6429_v0  ;;  %v3523_v29 = vmul.f32 %v6346_v40, %v6429_v0 }
 0xa0c   :  { %2672 = vmatpush1.msra.mxu0 %v6042_v5  ;;  %4475 = vmatpush3.msra.mxu1 %v6134_v41 }
 0xa0d   :  { %3532 = vadd.xlane.f32.xlu0 %v3523_v29  ;;  %2673 = vmatprep.subr.mxu0 %v6045_v51  ;;  %v7152_v29 = vld [vmem:[#allocation32_spill] sm:$0xff] }
 0xa0e   :  { %4476 = vmatprep.subr.mxu1 %v7045_v63  ;;  %2674 = vmatpush1.msra.mxu0 %v6048_v58 }
 0xa0f   :  { %4477 = vmatpush3.msra.mxu1 %v6136_v11  ;;  %2675 = vmatprep.subr.mxu0 %v6051_v39 }
 0xa10   :  { %4478 = vmatprep.subr.mxu1 %v7045_v63  ;;  %2676 = vmatpush1.msra.mxu0 %v6054_v31 }
 0xa11   :  { %4479 = vmatpush3.msra.mxu1 %v6141_v30  ;;  %2677 = vmatprep.subr.mxu0 %v6057_v52 }
 0xa12   :  { %4480 = vmatprep.subr.mxu1 %v7045_v63  ;;  %2678 = vmatpush1.msra.mxu0 %v6060_v43 }
 0xa13   :  { %4481 = vmatpush3.msra.mxu1 %v6146_v33  ;;  %2679 = vmatprep.subr.mxu0 %v6063_v53 }
 0xa14   :  { %4482 = vmatprep.subr.mxu1 %v7045_v63  ;;  %2680 = vmatpush1.msra.mxu0 %v6066_v7 }
 0xa15   :  { %4483 = vmatpush3.msra.mxu1 %v6150_v34  ;;  %2681 = vmatprep.subr.mxu0 %v6069_v54 }
 0xa16   :  { %4484 = vmatprep.subr.mxu1 %v7045_v63  ;;  %2682 = vmatpush1.msra.mxu0 %v6072_v55 }
 0xa17   :  { %4485 = vmatpush3.msra.mxu1 %v6154_v35  ;;  %2683 = vmatprep.subr.mxu0 %v6075_v12 }
 0xa18   :  { %4486 = vmatprep.subr.mxu1 %v7045_v63  ;;  %2684 = vmatpush1.msra.mxu0 %v6078_v56 }
 0xa19   :  { %4487 = vmatpush3.msra.mxu1 %v6158_v36  ;;  %2685 = vmatprep.subr.mxu0 %v6081_v13 }
 0xa1a   :  { %4488 = vmatprep.subr.mxu1 %v7045_v63  ;;  %2686 = vmatpush1.msra.mxu0 %v6084_v57 }
 0xa1b   :  { %4489 = vmatpush3.msra.mxu1 %v6162_v38  ;;  %2687 = vmatprep.subr.mxu0 %v6087_v15 }
 0xa1c   :  { %4490 = vmatprep.subr.mxu1 %v7045_v63  ;;  %2688 = vmatpush1.msra.mxu0 %v6090_v6 }
 0xa1d   :  { %4491 = vmatpush3.msra.mxu1 %v6166_v59  ;;  %2689 = vmatprep.subr.mxu0 %v6093_v16 }
 0xa1e   :  { %4492 = vmatprep.subr.mxu1 %v7045_v63  ;;  %2690 = vmatpush1.msra.mxu0 %v6096_v17 }
 0xa1f   :  { %4493 = vmatpush3.msra.mxu1 %v6170_v20  ;;  %2691 = vmatprep.subr.mxu0 %v6099_v19 }
 0xa20   :  { %4494 = vmatprep.subr.mxu1 %v7045_v63  ;;  %2692 = vmatpush1.msra.mxu0 %v6102_v21 }
 0xa21   :  { %4495 = vmatpush3.msra.mxu1 %v6174_v2  ;;  %2693 = vmatprep.subr.mxu0 %v6105_v22 }
 0xa22   :  { %4496 = vmatprep.subr.mxu1 %v7045_v63  ;;  %2694 = vmatpush1.msra.mxu0 %v6108_v23 }
 0xa23   :  { %4497 = vmatpush3.msra.mxu1 %v6178_v42  ;;  %2695 = vmatprep.subr.mxu0 %v6111_v24 }
 0xa24   :  { %4498 = vmatprep.subr.mxu1 %v7045_v63  ;;  %2696 = vmatpush1.msra.mxu0 %v6114_v26 }
 0xa25   :  { %4499 = vmatpush3.msra.mxu1 %v6182_v44  ;;  %2697 = vmatprep.subr.mxu0 %v6117_v10 }
 0xa26   :  { %4500 = vmatprep.subr.mxu1 %v7045_v63  ;;  %2698 = vmatpush1.msra.mxu0 %v6120_v27 }
 0xa27   :  { %4501 = vmatpush3.msra.mxu1 %v6186_v45  ;;  %2699 = vmatprep.subr.mxu0 %v7143_v28 }
 0xa28   :  { %4502 = vmatprep.subr.mxu1 %v7045_v63  ;;  %2700 = vmatpush1.msra.mxu0 %v7144_v48 }
 0xa29   :  { %4503 = vmatpush3.msra.mxu1 %v7145_v62  ;;  %2701 = vmatprep.subr.mxu0 %v7146_v8 }
 0xa2a   :  { %4504 = vmatprep.subr.mxu1 %v7045_v63  ;;  %2702 = vmatpush1.msra.mxu0 %v7147_v3  ;;  %v1953_v3 = vadd.f32 %v7152_v29, %v6329_v32 }
 0xa2b   :  { %2735 = vmatprep.mubr.f32.mxu0 %v7045_v63  ;;  %4505 = vmatpush3.msra.mxu1 %v7148_v14 }
 0xa2c   :  { %4506 = vmatprep.mubr.msk.f32.mxu1 %vm5011_vm2, %v7045_v63  ;;  %2838 = vmatprep.subr.mxu0 %v7149_v49 }
 0xa2d   :  { %4509 = vmatprep.subr.mxu1 %v7045_v63 }
 0xacb   :  { %v2570_v4 = vpop.f32.mrf.mxu0  ;;  %v2641_v46 = vpop.f32.mrf.mxu1 }
 0xacc   :  { %v2648_v61 = vadd.f32 %v2570_v4, %v1951_v25  ;;  %v2662_v47 = vadd.f32 %v6335_v37, %v2641_v46  ;;  %v7153_v25 = vld [vmem:[#allocation35_spill] sm:$0xff]  ;;  %v6622_v46 = vld [vmem:[#allocation12 + $0x148] sm:$0xff] }
 0xacd   :  { %v4473_v50 = vpop.f32.mrf.mxu1  ;;  %v2572_v1 = vpop.f32.mrf.mxu0  ;;  %v2062_v4 = vadd.f32 %v7153_v25, %v6340_v60  ;;  %v6635_v25 = vld [vmem:[#allocation12 + $0x110] sm:$0xff] }
 0xace   :  { %v3712_v9 = vmul.f32 -1.442695, %v2648_v61  ;;  %v2655_v14 = vadd.f32 %v2572_v1, %v1953_v3  ;;  %v6625_v1 = vld [vmem:[#allocation12 + $0x128] sm:$0xff] }
 0xad0   :  { %4760 = vpow2.f32 %v3712_v9  ;;  %v3713_v8 = vmul.f32 -1.442695, %v2655_v14 }
 0xad2   :  { %4762 = vpow2.f32 %v3713_v8 }
 0xadd   :  { %v4761_v62 = vpop.eup %4760 }
 0xade   :  { %v2652_v49 = vadd.f32 1.0, %v4761_v62 }
 0xadf   :  { %v4763_v48 = vpop.eup %4762 }
 0xae0   :  { %4764 = vrcp.f32 %v2652_v49  ;;  %v2659_v28 = vadd.f32 1.0, %v4763_v48  ;;  %v6629_v49 = vld [vmem:[#allocation12 + $0x120] sm:$0xff] }
 0xae2   :  { %4766 = vrcp.f32 %v2659_v28  ;;  %v6615_v28 = vld [vmem:[#allocation12 + $0x140] sm:$0xff] }
 0xaed   :  { %v4765_v18 = vpop.eup %4764 }
 0xaee   :  { %v2663_v61 = vmul.f32 %v4765_v18, %v2662_v47  ;;  %v6619_v18 = vld [vmem:[#allocation12 + $0x138] sm:$0xff]  ;;  %v6632_v47 = vld [vmem:[#allocation12 + $0x130] sm:$0xff] }
 0xaef   :  { %v4767_v29 = vpop.eup %4766 }
 0xaf0   :  { %v2664_v50 = vadd.f32 %v2663_v61, %v2062_v4  ;;  %v2666_v9 = vsub.f32 1.0, %v4767_v29  ;;  %v2668_v8 = vmul.f32 %v4767_v29, %v6429_v0  ;;  %v6612_v0 = vld [vmem:[#allocation12 + $0x160] sm:$0xff]  ;;  %v6639_v4 = vld [vmem:[#allocation12 + $0x108] sm:$0xff]  ;;  %v6642_v61 = vld [vmem:[#allocation12 + $0x118] sm:$0xff] }
 0xaf1   :  { %v6649_v29 = vld [vmem:[#allocation12 + $0xf0] sm:$0xff] }
 0xaf2   :  { %4768 = vtanh.f32 %v2664_v50  ;;  %v6645_v50 = vld [vmem:[#allocation12 + $0xf8] sm:$0xff] }
 0xaff   :  { %v4769_v3 = vpop.eup %4768 }
 0xb00   :  { %v2667_v14 = vmul.f32 %v4769_v3, %v2666_v9  ;;  %v6652_v9 = vld [vmem:[#allocation12 + $0x100] sm:$0xff] }
 0xb01   :  { %v6655_v3 = vld [vmem:[#allocation12 + $0xe0] sm:$0xff] }
 0xb02   :  { %v6510_v62 = vadd.f32 %v2668_v8, %v2667_v14  ;;  %v6659_v14 = vld [vmem:[#allocation12 + $0xd8] sm:$0xff]  ;;  %v6662_v8 = vld [vmem:[#allocation12 + $0xe8] sm:$0xff] }
 0xb04   :  { %2736 = vmatmul.mubr.f32.vlgmr.msra.gmra.mxu0 %v6510_v62  ;;  %4507 = vmatmul.mubr.f32.vlgmr.msra.gmra.mxu1 %v6510_v62  ;;  %v3524_v48 = vmul.f32 %v6346_v40, %v6510_v62 }
 0xb05   :  { %2839 = vmatpush1.msra.mxu0 %v6042_v5  ;;  %4510 = vmatpush3.msra.mxu1 %v6134_v41  ;;  %v7154_v5 = vld [vmem:[#allocation18_spill] sm:$0xff] }
 0xb06   :  { %3534 = vadd.xlane.f32.xlu1 %v3524_v48  ;;  %2840 = vmatprep.subr.mxu0 %v6045_v51  ;;  %v7155_v51 = vld [vmem:[#allocation19_spill] sm:$0xff]  ;;  %v6669_v48 = vld [vmem:[#allocation12 + $0xc0] sm:$0xff] }
 0xb07   :  { %4511 = vmatprep.subr.mxu1 %v7045_v63  ;;  %2841 = vmatpush1.msra.mxu0 %v6048_v58  ;;  %v7156_v58 = vld [vmem:[#allocation28_spill] sm:$0xff] }
 0xb08   :  { %4512 = vmatpush3.msra.mxu1 %v6136_v11  ;;  %2842 = vmatprep.subr.mxu0 %v6051_v39  ;;  %v7157_v39 = vld [vmem:[#allocation21_spill] sm:$0xff] }
 0xb09   :  { %4513 = vmatprep.subr.mxu1 %v7045_v63  ;;  %2843 = vmatpush1.msra.mxu0 %v6054_v31  ;;  %v7158_v31 = vld [vmem:[#allocation27_spill] sm:$0xff] }
 0xb0a   :  { %4514 = vmatpush3.msra.mxu1 %v6141_v30  ;;  %2844 = vmatprep.subr.mxu0 %v6057_v52  ;;  %v7159_v52 = vld [vmem:[#allocation38_spill] sm:$0xff] }
 0xb0b   :  { %4515 = vmatprep.subr.mxu1 %v7045_v63  ;;  %2845 = vmatpush1.msra.mxu0 %v6060_v43  ;;  %v6581_v43 = vld [vmem:[#allocation12 + $0x170] sm:$0xff] }
 0xb0c   :  { %4516 = vmatpush3.msra.mxu1 %v6146_v33  ;;  %2846 = vmatprep.subr.mxu0 %v6063_v53  ;;  %7160 = vst [vmem:[#allocation30_spill] sm:$0xff] %v6581_v43  ;;  %v7161_v53 = vld [vmem:[#allocation36_spill] sm:$0xff] }
 0xb0d   :  { %4517 = vmatprep.subr.mxu1 %v7045_v63  ;;  %2847 = vmatpush1.msra.mxu0 %v6066_v7  ;;  %v7162_v7 = vld [vmem:[#allocation33_spill] sm:$0xff] }
 0xb0e   :  { %4518 = vmatpush3.msra.mxu1 %v6150_v34  ;;  %2848 = vmatprep.subr.mxu0 %v6069_v54  ;;  %v1957_v54 = vadd.f32 %v7162_v7, %v7161_v53  ;;  %v6692_v7 = vld [vmem:[#allocation12 + $0xa0] sm:$0xff] }
 0xb0f   :  { %4519 = vmatprep.subr.mxu1 %v7045_v63  ;;  %2849 = vmatpush1.msra.mxu0 %v6072_v55 }
 0xb10   :  { %4520 = vmatpush3.msra.mxu1 %v6154_v35  ;;  %2850 = vmatprep.subr.mxu0 %v6075_v12 }
 0xb11   :  { %4521 = vmatprep.subr.mxu1 %v7045_v63  ;;  %2851 = vmatpush1.msra.mxu0 %v6078_v56 }
 0xb12   :  { %4522 = vmatpush3.msra.mxu1 %v6158_v36  ;;  %2852 = vmatprep.subr.mxu0 %v6081_v13 }
 0xb13   :  { %4523 = vmatprep.subr.mxu1 %v7045_v63  ;;  %2853 = vmatpush1.msra.mxu0 %v6084_v57 }
 0xb14   :  { %4524 = vmatpush3.msra.mxu1 %v6162_v38  ;;  %2854 = vmatprep.subr.mxu0 %v6087_v15 }
 0xb15   :  { %4525 = vmatprep.subr.mxu1 %v7045_v63  ;;  %2855 = vmatpush1.msra.mxu0 %v6090_v6  ;;  %v7163_v6 = vld [vmem:[#allocation40_spill] sm:$0xff] }
 0xb16   :  { %4526 = vmatpush3.msra.mxu1 %v6166_v59  ;;  %2856 = vmatprep.subr.mxu0 %v6093_v16  ;;  %v1959_v16 = vadd.f32 %v7163_v6, %v6329_v32  ;;  %v6719_v6 = vld [vmem:[#allocation12 + $0x48] sm:$0xff] }
 0xb17   :  { %4527 = vmatprep.subr.mxu1 %v7045_v63  ;;  %2857 = vmatpush1.msra.mxu0 %v6096_v17 }
 0xb18   :  { %4528 = vmatpush3.msra.mxu1 %v6170_v20  ;;  %2858 = vmatprep.subr.mxu0 %v6099_v19 }
 0xb19   :  { %4529 = vmatprep.subr.mxu1 %v7045_v63  ;;  %2859 = vmatpush1.msra.mxu0 %v6102_v21 }
 0xb1a   :  { %4530 = vmatpush3.msra.mxu1 %v6174_v2  ;;  %2860 = vmatprep.subr.mxu0 %v6105_v22  ;;  %v6599_v2 = vld [vmem:[#allocation12 + $0x168] sm:$0xff] }
 0xb1b   :  { %4531 = vmatprep.subr.mxu1 %v7045_v63  ;;  %2861 = vmatpush1.msra.mxu0 %v6108_v23 }
 0xb1c   :  { %4532 = vmatpush3.msra.mxu1 %v6178_v42  ;;  %2862 = vmatprep.subr.mxu0 %v6111_v24  ;;  %v6602_v42 = vld [vmem:[#allocation12 + $0x178] sm:$0xff] }
 0xb1d   :  { %4533 = vmatprep.subr.mxu1 %v7045_v63  ;;  %2863 = vmatpush1.msra.mxu0 %v6114_v26 }
 0xb1e   :  { %4534 = vmatpush3.msra.mxu1 %v6182_v44  ;;  %2864 = vmatprep.subr.mxu0 %v6117_v10  ;;  %v6605_v44 = vld [vmem:[#allocation12 + $0x158] sm:$0xff] }
 0xb1f   :  { %4535 = vmatprep.subr.mxu1 %v7045_v63  ;;  %2865 = vmatpush1.msra.mxu0 %v6120_v27  ;;  %v7164_v27 = vld [vmem:[#allocation39_spill] sm:$0xff] }
 0xb20   :  { %4536 = vmatpush3.msra.mxu1 %v6186_v45  ;;  %2866 = vmatprep.subr.mxu0 %v7154_v5  ;;  %v2067_v41 = vadd.f32 %v7164_v27, %v6340_v60  ;;  %v6609_v45 = vld [vmem:[#allocation12 + $0x150] sm:$0xff] }
 0xb21   :  { %4537 = vmatprep.subr.mxu1 %v7045_v63  ;;  %2867 = vmatpush1.msra.mxu0 %v7155_v51  ;;  %v6672_v5 = vld [vmem:[#allocation12 + $0xd0] sm:$0xff] }
 0xb22   :  { %4538 = vmatpush3.msra.mxu1 %v7156_v58  ;;  %2868 = vmatprep.subr.mxu0 %v7157_v39  ;;  %v6675_v51 = vld [vmem:[#allocation12 + $0xb0] sm:$0xff]  ;;  %v6679_v58 = vld [vmem:[#allocation12 + $0xa8] sm:$0xff]  ;;  %v6682_v39 = vld [vmem:[#allocation12 + $0xb8] sm:$0xff] }
 0xb23   :  { %4539 = vmatprep.subr.mxu1 %v7045_v63  ;;  %2869 = vmatpush1.msra.mxu0 %v7158_v31  ;;  %v6685_v31 = vld [vmem:[#allocation12 + $0x98] sm:$0xff]  ;;  %v6753_v27 = vld [vmem:[#allocation12 + $0x10] sm:$0xff] }
 0xb24   :  { %2902 = vmatprep.mubr.f32.mxu0 %v7045_v63  ;;  %4540 = vmatpush3.msra.mxu1 %v7159_v52  ;;  %v6689_v52 = vld [vmem:[#allocation12 + $0x90] sm:$0xff]  ;;  %7170 = vst [vmem:[#allocation35_spill] sm:$0xff] %v6753_v27 }
 0xb25   :  { %4541 = vmatprep.mubr.msk.f32.mxu1 %vm5011_vm2, %v7045_v63  ;;  %3005 = vmatprep.subr.mxu0 %v6581_v43 }
 0xb26   :  { %4544 = vmatprep.subr.mxu1 %v7045_v63 }
 0xbc4   :  { %v2737_v55 = vpop.f32.mrf.mxu0  ;;  %v2808_v12 = vpop.f32.mrf.mxu1 }
 0xbc5   :  { %v2815_v56 = vadd.f32 %v2737_v55, %v1957_v54  ;;  %v2829_v26 = vadd.f32 %v6335_v37, %v2808_v12  ;;  %v6695_v54 = vld [vmem:[#allocation12 + $0x80] sm:$0xff]  ;;  %v6699_v55 = vld [vmem:[#allocation12 + $0x78] sm:$0xff]  ;;  %v6702_v12 = vld [vmem:[#allocation12 + $0x88] sm:$0xff] }
 0xbc6   :  { %v4508_v13 = vpop.f32.mrf.mxu1  ;;  %v2739_v15 = vpop.f32.mrf.mxu0 }
 0xbc7   :  { %v3714_v57 = vmul.f32 -1.442695, %v2815_v56  ;;  %v2822_v17 = vadd.f32 %v2739_v15, %v1959_v16  ;;  %v6705_v56 = vld [vmem:[#allocation12 + $0x68] sm:$0xff]  ;;  %v6709_v13 = vld [vmem:[#allocation12 + $0x60] sm:$0xff]  ;;  %v6715_v15 = vld [vmem:[#allocation12 + $0x50] sm:$0xff] }
 0xbc8   :  { %v6722_v16 = vld [vmem:[#allocation12 + $0x58] sm:$0xff] }
 0xbc9   :  { %4770 = vpow2.f32 %v3714_v57  ;;  %v3715_v19 = vmul.f32 -1.442695, %v2822_v17  ;;  %v6712_v57 = vld [vmem:[#allocation12 + $0x70] sm:$0xff]  ;;  %v6725_v17 = vld [vmem:[#allocation12 + $0x38] sm:$0xff] }
 0xbcb   :  { %4772 = vpow2.f32 %v3715_v19  ;;  %v6729_v19 = vld [vmem:[#allocation12 + $0x30] sm:$0xff] }
 0xbd6   :  { %v4771_v21 = vpop.eup %4770 }
 0xbd7   :  { %v2819_v22 = vadd.f32 1.0, %v4771_v21  ;;  %v6732_v21 = vld [vmem:[#allocation12 + $0x40] sm:$0xff] }
 0xbd8   :  { %v4773_v23 = vpop.eup %4772 }
 0xbd9   :  { %4774 = vrcp.f32 %v2819_v22  ;;  %v2826_v24 = vadd.f32 1.0, %v4773_v23  ;;  %v6735_v22 = vld [vmem:[#allocation12 + $0x20] sm:$0xff]  ;;  %v6739_v23 = vld [vmem:[#allocation12 + $0x18] sm:$0xff] }
 0xbda   :  { %7165 = vst [vmem:[#allocation31_spill] sm:$0xff] %v6735_v22  ;;  %7166 = vst [vmem:[#allocation26_spill] sm:$0xff] %v6739_v23 }
 0xbdb   :  { %4776 = vrcp.f32 %v2826_v24  ;;  %v6742_v24 = vld [vmem:[#allocation12 + $0x28] sm:$0xff] }
 0xbdc   :  { %7167 = vst [vmem:[#allocation20_spill] sm:$0xff] %v6742_v24 }
 0xbe6   :  { %v4775_v10 = vpop.eup %4774 }
 0xbe7   :  { %v2830_v11 = vmul.f32 %v4775_v10, %v2829_v26  ;;  %v6745_v26 = vld [vmem:[#allocation12 + $0x8] sm:$0xff]  ;;  %v6749_v10 = vld [vmem:[#allocation12] sm:$0xff] }
 0xbe8   :  { %v4777_v33 = vpop.eup %4776  ;;  %7168 = vst [vmem:[#allocation41_spill] sm:$0xff] %v6745_v26  ;;  %7169 = vst [vmem:[#allocation32_spill] sm:$0xff] %v6749_v10 }
 0xbe9   :  { %v2831_v30 = vadd.f32 %v2830_v11, %v2067_v41  ;;  %v2833_v34 = vsub.f32 1.0, %v4777_v33  ;;  %v2835_v38 = vmul.f32 %v4777_v33, %v6510_v62  ;;  %v6665_v62 = vld [vmem:[#allocation12 + $0xc8] sm:$0xff] }
 0xbea   :  { %v7171_v41 = vld [vmem:[#allocation17_spill] sm:$0xff] }
 0xbeb   :  { %4778 = vtanh.f32 %v2831_v30  ;;  %v1963_v11 = vadd.f32 %v7171_v41, %v7161_v53 }
 0xbf8   :  { %v4779_v35 = vpop.eup %4778 }
 0xbf9   :  { %v2834_v36 = vmul.f32 %v4779_v35, %v2833_v34 }
 0xbfb   :  { %v6593_v59 = vadd.f32 %v2835_v38, %v2834_v36 }
 0xbfd   :  { %2903 = vmatmul.mubr.f32.vlgmr.msra.gmra.mxu0 %v6593_v59  ;;  %4542 = vmatmul.mubr.f32.vlgmr.msra.gmra.mxu1 %v6593_v59  ;;  %v3525_v20 = vmul.f32 %v6346_v40, %v6593_v59 }
 0xbfe   :  { %3006 = vmatpush1.msra.mxu0 %v6599_v2  ;;  %4545 = vmatpush3.msra.mxu1 %v6602_v42 }
 0xbff   :  { %3536 = vadd.xlane.f32.xlu1 %v3525_v20  ;;  %3007 = vmatprep.subr.mxu0 %v6605_v44  ;;  %v7172_v20 = vld [vmem:[#allocation25_spill] sm:$0xff] }
 0xc00   :  { %4546 = vmatprep.subr.mxu1 %v7045_v63  ;;  %3008 = vmatpush1.msra.mxu0 %v6609_v45 }
 0xc01   :  { %4547 = vmatpush3.msra.mxu1 %v6612_v0  ;;  %3009 = vmatprep.subr.mxu0 %v6615_v28 }
 0xc02   :  { %4548 = vmatprep.subr.mxu1 %v7045_v63  ;;  %3010 = vmatpush1.msra.mxu0 %v6619_v18 }
 0xc03   :  { %4549 = vmatpush3.msra.mxu1 %v6622_v46  ;;  %3011 = vmatprep.subr.mxu0 %v6625_v1 }
 0xc04   :  { %4550 = vmatprep.subr.mxu1 %v7045_v63  ;;  %3012 = vmatpush1.msra.mxu0 %v6629_v49 }
 0xc05   :  { %4551 = vmatpush3.msra.mxu1 %v6632_v47  ;;  %3013 = vmatprep.subr.mxu0 %v6635_v25 }
 0xc06   :  { %4552 = vmatprep.subr.mxu1 %v7045_v63  ;;  %3014 = vmatpush1.msra.mxu0 %v6639_v4 }
 0xc07   :  { %4553 = vmatpush3.msra.mxu1 %v6642_v61  ;;  %3015 = vmatprep.subr.mxu0 %v6645_v50 }
 0xc08   :  { %4554 = vmatprep.subr.mxu1 %v7045_v63  ;;  %3016 = vmatpush1.msra.mxu0 %v6649_v29 }
 0xc09   :  { %4555 = vmatpush3.msra.mxu1 %v6652_v9  ;;  %3017 = vmatprep.subr.mxu0 %v6655_v3 }
 0xc0a   :  { %4556 = vmatprep.subr.mxu1 %v7045_v63  ;;  %3018 = vmatpush1.msra.mxu0 %v6659_v14 }
 0xc0b   :  { %4557 = vmatpush3.msra.mxu1 %v6662_v8  ;;  %3019 = vmatprep.subr.mxu0 %v6665_v62 }
 0xc0c   :  { %4558 = vmatprep.subr.mxu1 %v7045_v63  ;;  %3020 = vmatpush1.msra.mxu0 %v6669_v48 }
 0xc0d   :  { %4559 = vmatpush3.msra.mxu1 %v6672_v5  ;;  %3021 = vmatprep.subr.mxu0 %v6675_v51 }
 0xc0e   :  { %4560 = vmatprep.subr.mxu1 %v7045_v63  ;;  %3022 = vmatpush1.msra.mxu0 %v6679_v58 }
 0xc0f   :  { %4561 = vmatpush3.msra.mxu1 %v6682_v39  ;;  %3023 = vmatprep.subr.mxu0 %v6685_v31 }
 0xc10   :  { %4562 = vmatprep.subr.mxu1 %v7045_v63  ;;  %3024 = vmatpush1.msra.mxu0 %v6689_v52 }
 0xc11   :  { %4563 = vmatpush3.msra.mxu1 %v6692_v7  ;;  %3025 = vmatprep.subr.mxu0 %v6695_v54 }
 0xc12   :  { %4564 = vmatprep.subr.mxu1 %v7045_v63  ;;  %3026 = vmatpush1.msra.mxu0 %v6699_v55 }
 0xc13   :  { %4565 = vmatpush3.msra.mxu1 %v6702_v12  ;;  %3027 = vmatprep.subr.mxu0 %v6705_v56 }
 0xc14   :  { %4566 = vmatprep.subr.mxu1 %v7045_v63  ;;  %3028 = vmatpush1.msra.mxu0 %v6709_v13 }
 0xc15   :  { %4567 = vmatpush3.msra.mxu1 %v6712_v57  ;;  %3029 = vmatprep.subr.mxu0 %v6715_v15 }
 0xc16   :  { %4568 = vmatprep.subr.mxu1 %v7045_v63  ;;  %3030 = vmatpush1.msra.mxu0 %v6719_v6 }
 0xc17   :  { %4569 = vmatpush3.msra.mxu1 %v6722_v16  ;;  %3031 = vmatprep.subr.mxu0 %v6725_v17 }
 0xc18   :  { %4570 = vmatprep.subr.mxu1 %v7045_v63  ;;  %3032 = vmatpush1.msra.mxu0 %v6729_v19 }
 0xc19   :  { %4571 = vmatpush3.msra.mxu1 %v6732_v21  ;;  %3033 = vmatprep.subr.mxu0 %v6735_v22 }
 0xc1a   :  { %4572 = vmatprep.subr.mxu1 %v7045_v63  ;;  %3034 = vmatpush1.msra.mxu0 %v6739_v23 }
 0xc1b   :  { %4573 = vmatpush3.msra.mxu1 %v6742_v24  ;;  %3035 = vmatprep.subr.mxu0 %v6745_v26 }
 0xc1c   :  { %4574 = vmatprep.subr.mxu1 %v7045_v63  ;;  %3036 = vmatpush1.msra.mxu0 %v6749_v10  ;;  %v1965_v10 = vadd.f32 %v7172_v20, %v6329_v32 }
 0xc1d   :  { %3069 = vmatprep.mubr.f32.mxu0 %v7045_v63  ;;  %4575 = vmatpush3.msra.mxu1 %v6753_v27 }
 0xc1e   :  { %4576 = vmatprep.mubr.msk.f32.mxu1 %vm5011_vm2, %v7045_v63  ;;  %3172 = vmatprep.subr.mxu0 %v6581_v43 }
 0xc1f   :  { %4579 = vmatprep.subr.mxu1 %v7045_v63 }
 0xcbd   :  { %v2904_v30 = vpop.f32.mrf.mxu0  ;;  %v2975_v33 = vpop.f32.mrf.mxu1 }
 0xcbe   :  { %v2982_v34 = vadd.f32 %v2904_v30, %v1963_v11  ;;  %v2996_v41 = vadd.f32 %v6335_v37, %v2975_v33  ;;  %v7173_v11 = vld [vmem:[#allocation24_spill] sm:$0xff] }
 0xcbf   :  { %v4543_v35 = vpop.f32.mrf.mxu1  ;;  %v2906_v38 = vpop.f32.mrf.mxu0  ;;  %v2072_v30 = vadd.f32 %v7173_v11, %v6340_v60  ;;  %v7178_v33 = vld [vmem:[#allocation32_spill] sm:$0xff] }
 0xcc0   :  { %v3716_v36 = vmul.f32 -1.442695, %v2982_v34  ;;  %v2989_v27 = vadd.f32 %v2906_v38, %v1965_v10  ;;  %v7179_v38 = vld [vmem:[#allocation35_spill] sm:$0xff]  ;;  %v7181_v11 = vld [vmem:[#allocation36_spill] sm:$0xff] }
 0xcc2   :  { %4780 = vpow2.f32 %v3716_v36  ;;  %v3717_v26 = vmul.f32 -1.442695, %v2989_v27 }
 0xcc4   :  { %4782 = vpow2.f32 %v3717_v26 }
 0xccf   :  { %v4781_v24 = vpop.eup %4780 }
 0xcd0   :  { %v2986_v43 = vadd.f32 1.0, %v4781_v24 }
 0xcd1   :  { %v4783_v23 = vpop.eup %4782 }
 0xcd2   :  { %4784 = vrcp.f32 %v2986_v43  ;;  %v2993_v22 = vadd.f32 1.0, %v4783_v23  ;;  %v7177_v23 = vld [vmem:[#allocation41_spill] sm:$0xff] }
 0xcd4   :  { %4786 = vrcp.f32 %v2993_v22  ;;  %v7176_v22 = vld [vmem:[#allocation20_spill] sm:$0xff] }
 0xcdf   :  { %v4785_v53 = vpop.eup %4784 }
 0xce0   :  { %v2997_v34 = vmul.f32 %v4785_v53, %v2996_v41  ;;  %v7174_v53 = vld [vmem:[#allocation31_spill] sm:$0xff]  ;;  %v7180_v41 = vld [vmem:[#allocation30_spill] sm:$0xff] }
 0xce1   :  { %v4787_v20 = vpop.eup %4786 }
 0xce2   :  { %v2998_v35 = vadd.f32 %v2997_v34, %v2072_v30  ;;  %v3000_v36 = vsub.f32 1.0, %v4787_v20  ;;  %v3002_v26 = vmul.f32 %v4787_v20, %v6593_v59  ;;  %v7175_v59 = vld [vmem:[#allocation26_spill] sm:$0xff] }
 0xce3   :  { %v7182_v30 = vld [vmem:[#allocation34_spill] sm:$0xff] }
 0xce4   :  { %4788 = vtanh.f32 %v2998_v35  ;;  %v1969_v34 = vadd.f32 %v7182_v30, %v7181_v11 }
 0xcf1   :  { %v4789_v10 = vpop.eup %4788 }
 0xcf2   :  { %v3001_v27 = vmul.f32 %v4789_v10, %v3000_v36 }
 0xcf4   :  { %v6768_v24 = vadd.f32 %v3002_v26, %v3001_v27 }
 0xcf6   :  { %3070 = vmatmul.mubr.f32.vlgmr.msra.gmra.mxu0 %v6768_v24  ;;  %4577 = vmatmul.mubr.f32.vlgmr.msra.gmra.mxu1 %v6768_v24  ;;  %v3526_v43 = vmul.f32 %v6346_v40, %v6768_v24 }
 0xcf7   :  { %3173 = vmatpush1.msra.mxu0 %v6599_v2  ;;  %4580 = vmatpush3.msra.mxu1 %v6602_v42 }
 0xcf8   :  { %3538 = vadd.xlane.f32.xlu0 %v3526_v43  ;;  %3174 = vmatprep.subr.mxu0 %v6605_v44  ;;  %v7183_v43 = vld [vmem:[#allocation43_spill] sm:$0xff] }
 0xcf9   :  { %4581 = vmatprep.subr.mxu1 %v7045_v63  ;;  %3175 = vmatpush1.msra.mxu0 %v6609_v45 }
 0xcfa   :  { %4582 = vmatpush3.msra.mxu1 %v6612_v0  ;;  %3176 = vmatprep.subr.mxu0 %v6615_v28 }
 0xcfb   :  { %4583 = vmatprep.subr.mxu1 %v7045_v63  ;;  %3177 = vmatpush1.msra.mxu0 %v6619_v18 }
 0xcfc   :  { %4584 = vmatpush3.msra.mxu1 %v6622_v46  ;;  %3178 = vmatprep.subr.mxu0 %v6625_v1 }
 0xcfd   :  { %4585 = vmatprep.subr.mxu1 %v7045_v63  ;;  %3179 = vmatpush1.msra.mxu0 %v6629_v49 }
 0xcfe   :  { %4586 = vmatpush3.msra.mxu1 %v6632_v47  ;;  %3180 = vmatprep.subr.mxu0 %v6635_v25 }
 0xcff   :  { %4587 = vmatprep.subr.mxu1 %v7045_v63  ;;  %3181 = vmatpush1.msra.mxu0 %v6639_v4 }
 0xd00   :  { %4588 = vmatpush3.msra.mxu1 %v6642_v61  ;;  %3182 = vmatprep.subr.mxu0 %v6645_v50 }
 0xd01   :  { %4589 = vmatprep.subr.mxu1 %v7045_v63  ;;  %3183 = vmatpush1.msra.mxu0 %v6649_v29 }
 0xd02   :  { %4590 = vmatpush3.msra.mxu1 %v6652_v9  ;;  %3184 = vmatprep.subr.mxu0 %v6655_v3 }
 0xd03   :  { %4591 = vmatprep.subr.mxu1 %v7045_v63  ;;  %3185 = vmatpush1.msra.mxu0 %v6659_v14 }
 0xd04   :  { %4592 = vmatpush3.msra.mxu1 %v6662_v8  ;;  %3186 = vmatprep.subr.mxu0 %v6665_v62 }
 0xd05   :  { %4593 = vmatprep.subr.mxu1 %v7045_v63  ;;  %3187 = vmatpush1.msra.mxu0 %v6669_v48 }
 0xd06   :  { %4594 = vmatpush3.msra.mxu1 %v6672_v5  ;;  %3188 = vmatprep.subr.mxu0 %v6675_v51 }
 0xd07   :  { %4595 = vmatprep.subr.mxu1 %v7045_v63  ;;  %3189 = vmatpush1.msra.mxu0 %v6679_v58 }
 0xd08   :  { %4596 = vmatpush3.msra.mxu1 %v6682_v39  ;;  %3190 = vmatprep.subr.mxu0 %v6685_v31 }
 0xd09   :  { %4597 = vmatprep.subr.mxu1 %v7045_v63  ;;  %3191 = vmatpush1.msra.mxu0 %v6689_v52 }
 0xd0a   :  { %4598 = vmatpush3.msra.mxu1 %v6692_v7  ;;  %3192 = vmatprep.subr.mxu0 %v6695_v54 }
 0xd0b   :  { %4599 = vmatprep.subr.mxu1 %v7045_v63  ;;  %3193 = vmatpush1.msra.mxu0 %v6699_v55 }
 0xd0c   :  { %4600 = vmatpush3.msra.mxu1 %v6702_v12  ;;  %3194 = vmatprep.subr.mxu0 %v6705_v56 }
 0xd0d   :  { %4601 = vmatprep.subr.mxu1 %v7045_v63  ;;  %3195 = vmatpush1.msra.mxu0 %v6709_v13 }
 0xd0e   :  { %4602 = vmatpush3.msra.mxu1 %v6712_v57  ;;  %3196 = vmatprep.subr.mxu0 %v6715_v15 }
 0xd0f   :  { %4603 = vmatprep.subr.mxu1 %v7045_v63  ;;  %3197 = vmatpush1.msra.mxu0 %v6719_v6 }
 0xd10   :  { %4604 = vmatpush3.msra.mxu1 %v6722_v16  ;;  %3198 = vmatprep.subr.mxu0 %v6725_v17 }
 0xd11   :  { %4605 = vmatprep.subr.mxu1 %v7045_v63  ;;  %3199 = vmatpush1.msra.mxu0 %v6729_v19 }
 0xd12   :  { %4606 = vmatpush3.msra.mxu1 %v6732_v21  ;;  %3200 = vmatprep.subr.mxu0 %v7174_v53 }
 0xd13   :  { %4607 = vmatprep.subr.mxu1 %v7045_v63  ;;  %3201 = vmatpush1.msra.mxu0 %v7175_v59 }
 0xd14   :  { %4608 = vmatpush3.msra.mxu1 %v7176_v22  ;;  %3202 = vmatprep.subr.mxu0 %v7177_v23 }
 0xd15   :  { %4609 = vmatprep.subr.mxu1 %v7045_v63  ;;  %3203 = vmatpush1.msra.mxu0 %v7178_v33  ;;  %v1971_v33 = vadd.f32 %v7183_v43, %v6329_v32 }
 0xd16   :  { %3236 = vmatprep.mubr.f32.mxu0 %v7045_v63  ;;  %4610 = vmatpush3.msra.mxu1 %v7179_v38 }
 0xd17   :  { %4611 = vmatprep.mubr.msk.f32.mxu1 %vm5011_vm2, %v7045_v63  ;;  %3339 = vmatprep.subr.mxu0 %v7180_v41 }
 0xd18   :  { %4614 = vmatprep.subr.mxu1 %v7045_v63 }
 0xdb6   :  { %v3071_v35 = vpop.f32.mrf.mxu0  ;;  %v3142_v20 = vpop.f32.mrf.mxu1 }
 0xdb7   :  { %v3149_v36 = vadd.f32 %v3071_v35, %v1969_v34  ;;  %v3163_v30 = vadd.f32 %v6335_v37, %v3142_v20  ;;  %v7184_v34 = vld [vmem:[#allocation44_spill] sm:$0xff] }
 0xdb8   :  { %v4578_v10 = vpop.f32.mrf.mxu1  ;;  %v3073_v26 = vpop.f32.mrf.mxu0  ;;  %v2077_v35 = vadd.f32 %v7184_v34, %v6340_v60 }
 0xdb9   :  { %v3718_v27 = vmul.f32 -1.442695, %v3149_v36  ;;  %v3156_v38 = vadd.f32 %v3073_v26, %v1971_v33  ;;  %v7196_v26 = vld [vmem:[#allocation45_spill] sm:$0xff] }
 0xdbb   :  { %4790 = vpow2.f32 %v3718_v27  ;;  %v3719_v23 = vmul.f32 -1.442695, %v3156_v38 }
 0xdbd   :  { %4792 = vpow2.f32 %v3719_v23 }
 0xdc8   :  { %v4791_v22 = vpop.eup %4790 }
 0xdc9   :  { %v3153_v41 = vadd.f32 1.0, %v4791_v22 }
 0xdca   :  { %v4793_v59 = vpop.eup %4792 }
 0xdcb   :  { %4794 = vrcp.f32 %v3153_v41  ;;  %v3160_v53 = vadd.f32 1.0, %v4793_v59  ;;  %v1983_v41 = vadd.f32 %v7196_v26, %v6329_v32 }
 0xdcd   :  { %4796 = vrcp.f32 %v3160_v53 }
 0xdd8   :  { %v4795_v11 = vpop.eup %4794 }
 0xdd9   :  { %v3164_v36 = vmul.f32 %v4795_v11, %v3163_v30 }
 0xdda   :  { %v4797_v43 = vpop.eup %4796 }
 0xddb   :  { %v3165_v10 = vadd.f32 %v3164_v36, %v2077_v35  ;;  %v3167_v27 = vsub.f32 1.0, %v4797_v43  ;;  %v3169_v23 = vmul.f32 %v4797_v43, %v6768_v24 }
 0xddd   :  { %4798 = vtanh.f32 %v3165_v10 }
 0xdea   :  { %v4799_v33 = vpop.eup %4798 }
 0xdeb   :  { %v3168_v38 = vmul.f32 %v4799_v33, %v3167_v27 }
 0xded   :  { %v6849_v22 = vadd.f32 %v3169_v23, %v3168_v38  ;;  %v7197_v38 = vld [vmem:[#allocation42_spill] sm:$0xff] }
 0xdee   :  { %v2087_v23 = vadd.f32 %v7197_v38, %v6340_v60 }
 0xdef   :  { %3237 = vmatmul.mubr.f32.vlgmr.msra.gmra.mxu0 %v6849_v22  ;;  %4612 = vmatmul.mubr.f32.vlgmr.msra.gmra.mxu1 %v6849_v22  ;;  %v3527_v37 = vmul.f32 %v6346_v40, %v6849_v22  ;;  %v7185_v40 = vld [vmem:[#allocation31_spill] sm:$0xff] }
 0xdf0   :  { %3340 = vmatpush1.msra.mxu0 %v6599_v2  ;;  %4615 = vmatpush3.msra.mxu1 %v6602_v42  ;;  %v7186_v2 = vld [vmem:[#allocation26_spill] sm:$0xff]  ;;  %v7187_v42 = vld [vmem:[#allocation20_spill] sm:$0xff] }
 0xdf1   :  { %3540 = vadd.xlane.f32.xlu1 %v3527_v37  ;;  %3341 = vmatprep.subr.mxu0 %v6605_v44  ;;  %v7188_v44 = vld [vmem:[#allocation41_spill] sm:$0xff] }
 0xdf2   :  { %4616 = vmatprep.subr.mxu1 %v7045_v63  ;;  %3342 = vmatpush1.msra.mxu0 %v6609_v45  ;;  %v7189_v45 = vld [vmem:[#allocation32_spill] sm:$0xff] }
 0xdf3   :  { %4617 = vmatpush3.msra.mxu1 %v6612_v0  ;;  %3343 = vmatprep.subr.mxu0 %v6615_v28  ;;  %v7190_v0 = vld [vmem:[#allocation35_spill] sm:$0xff]  ;;  %v5012_v28 = vmov 0  }
 0xdf4   :  { %4618 = vmatprep.subr.mxu1 %v7045_v63  ;;  %3344 = vmatpush1.msra.mxu0 %v6619_v18  ;;  %v7191_v18 = vld [vmem:[#allocation36_spill] sm:$0xff] }
 0xdf5   :  { %4619 = vmatpush3.msra.mxu1 %v6622_v46  ;;  %3345 = vmatprep.subr.mxu0 %v6625_v1  ;;  %v7192_v46 = vld [vmem:[#allocation23_spill] sm:$0xff] }
 0xdf6   :  { %4620 = vmatprep.subr.mxu1 %v7045_v63  ;;  %3346 = vmatpush1.msra.mxu0 %v6629_v49  ;;  %v1975_v1 = vadd.f32 %v7192_v46, %v7191_v18 }
 0xdf7   :  { %4621 = vmatpush3.msra.mxu1 %v6632_v47  ;;  %3347 = vmatprep.subr.mxu0 %v6635_v25 }
 0xdf8   :  { %4622 = vmatprep.subr.mxu1 %v7045_v63  ;;  %3348 = vmatpush1.msra.mxu0 %v6639_v4 }
 0xdf9   :  { %4623 = vmatpush3.msra.mxu1 %v6642_v61  ;;  %3349 = vmatprep.subr.mxu0 %v6645_v50 }
 0xdfa   :  { %4624 = vmatprep.subr.mxu1 %v7045_v63  ;;  %3350 = vmatpush1.msra.mxu0 %v6649_v29  ;;  %v7193_v29 = vld [vmem:[#allocation29_spill] sm:$0xff] }
 0xdfb   :  { %4625 = vmatpush3.msra.mxu1 %v6652_v9  ;;  %3351 = vmatprep.subr.mxu0 %v6655_v3  ;;  %v1977_v9 = vadd.f32 %v7193_v29, %v6329_v32  ;;  %v3535_v29 = vpop.xlane.xlu1 %3534 }
 0xdfc   :  { %4626 = vmatprep.subr.mxu1 %v7045_v63  ;;  %3352 = vmatpush1.msra.mxu0 %v6659_v14 }
 0xdfd   :  { %4627 = vmatpush3.msra.mxu1 %v6662_v8  ;;  %3353 = vmatprep.subr.mxu0 %v6665_v62 }
 0xdfe   :  { %4628 = vmatprep.subr.mxu1 %v7045_v63  ;;  %3354 = vmatpush1.msra.mxu0 %v6669_v48 }
 0xdff   :  { %4629 = vmatpush3.msra.mxu1 %v6672_v5  ;;  %3355 = vmatprep.subr.mxu0 %v6675_v51  ;;  %v4917_v5 = vld [vmem:[%s6952_s8] ss:$0 sm:$0xff] }
 0xe00   :  { %4630 = vmatprep.subr.mxu1 %v7045_v63  ;;  %3356 = vmatpush1.msra.mxu0 %v6679_v58 }
 0xe01   :  { %4631 = vmatpush3.msra.mxu1 %v6682_v39  ;;  %3357 = vmatprep.subr.mxu0 %v6685_v31  ;;  %v7194_v39 = vld [vmem:[#allocation46_spill] sm:$0xff] }
 0xe02   :  { %4632 = vmatprep.subr.mxu1 %v7045_v63  ;;  %3358 = vmatpush1.msra.mxu0 %v6689_v52  ;;  %v2082_v31 = vadd.f32 %v7194_v39, %v6340_v60  ;;  %v7199_v60 = vld [vmem:[#allocation22_spill] sm:$0xff] }
 0xe03   :  { %4633 = vmatpush3.msra.mxu1 %v6692_v7  ;;  %3359 = vmatprep.subr.mxu0 %v6695_v54 }
 0xe04   :  { %4634 = vmatprep.subr.mxu1 %v7045_v63  ;;  %3360 = vmatpush1.msra.mxu0 %v6699_v55 }
 0xe05   :  { %4635 = vmatpush3.msra.mxu1 %v6702_v12  ;;  %3361 = vmatprep.subr.mxu0 %v6705_v56 }
 0xe06   :  { %4636 = vmatprep.subr.mxu1 %v7045_v63  ;;  %3362 = vmatpush1.msra.mxu0 %v6709_v13 }
 0xe07   :  { %4637 = vmatpush3.msra.mxu1 %v6712_v57  ;;  %3363 = vmatprep.subr.mxu0 %v6715_v15  ;;  %v4918_v15 = vld [vmem:[%s6953_s9] ss:$0 sm:$0xff]  ;;  %s5013_s9 = smov [#allocation13]  }
 0xe08   :  { %4638 = vmatprep.subr.mxu1 %v7045_v63  ;;  %3364 = vmatpush1.msra.mxu0 %v6719_v6  ;;  %s3661_s20 = sshll.u32 %s5013_s9, 4  ;;  %s3662_s20 = int_to_ptr.vmem [resolvable:$true] %s3661_s20 }
 0xe09   :  { %4639 = vmatpush3.msra.mxu1 %v6722_v16  ;;  %3365 = vmatprep.subr.mxu0 %v6725_v17  ;;  %v3725_v16 = vld [vmem:[#allocation6] ss:$0 sm:$0xff]  ;;  %v7195_v17 = vld [vmem:[#allocation37_spill] sm:$0xff]  ;;  %s4979_s21 = scalar_lea.vmem %s3662_s20, 128  ;;  %p4984_p2 = scmp.lt.s32.totalorder %s3662_s20, %s3662_s20 }
 0xe0a   :  { %4640 = vmatprep.subr.mxu1 %v7045_v63  ;;  %3366 = vmatpush1.msra.mxu0 %v6729_v19  ;;  %v1981_v19 = vadd.f32 %v7195_v17, %v7191_v18  ;;  %p4980_p1 = scmp.ne.s32.totalorder %s3662_s20, %s4979_s21  ;;  %p4985_p3 = scmp.lt.s32.totalorder %s4979_s21, %s4979_s21 }
 0xe0b   :  { %4641 = vmatpush3.msra.mxu1 %v6732_v21  ;;  %3367 = vmatprep.subr.mxu0 %v7185_v40 }
 0xe0c   :  { %4642 = vmatprep.subr.mxu1 %v7045_v63  ;;  %3368 = vmatpush1.msra.mxu0 %v7186_v2  ;;  %p4986_p4 = por %p4985_p3, %p4984_p2 }
 0xe0d   :  { %4643 = vmatpush3.msra.mxu1 %v7187_v42  ;;  %3369 = vmatprep.subr.mxu0 %v7188_v44 }
 0xe0e   :  { %4644 = vmatprep.subr.mxu1 %v7045_v63  ;;  %3370 = vmatpush1.msra.mxu0 %v7189_v45  ;;  %p4987_p5 = pnand %p4986_p4, %p4980_p1 }
 0xe0f   :  { %3403 = vmatprep.mubr.f32.mxu0 %v7045_v63  ;;  %4645 = vmatpush3.msra.mxu1 %v7190_v0 }
 0xe10   :  { %4646 = vmatprep.mubr.msk.f32.mxu1 %vm5011_vm2, %v7045_v63  ;;  %4658 = vset.pattern.permute.xlu0 %v5012_v28  ;;  %v3531_v28 = vpop.xlane.xlu0 %3530 }
 0xe14   :  { %v3533_v18 = vpop.xlane.xlu0 %3532 }
 0xe18   :  { %v3539_v46 = vpop.xlane.xlu0 %3538 }
 0xeaf   :  { %v3238_v49 = vpop.f32.mrf.mxu0  ;;  %v3309_v47 = vpop.f32.mrf.mxu1 }
 0xeb0   :  { %v3316_v25 = vadd.f32 %v3238_v49, %v1975_v1  ;;  %v3330_v51 = vadd.f32 %v4917_v5, %v3309_v47  ;;  %v7198_v49 = vlaneseq }
 0xeb1   :  { %v4613_v4 = vpop.f32.mrf.mxu1  ;;  %v3240_v50 = vpop.f32.mrf.mxu0 }
 0xeb2   :  { %v3720_v61 = vmul.f32 -1.442695, %v3316_v25  ;;  %v3323_v3 = vadd.f32 %v3240_v50, %v1977_v9  ;;  %v3573_v47 = vand.u32 127, %v7198_v49 }
 0xeb4   :  { %4800 = vpow2.f32 %v3720_v61  ;;  %v3721_v14 = vmul.f32 -1.442695, %v3323_v3  ;;  %v3576_v4 = vsub.s32 %v3573_v47, %v7199_v60 }
 0xeb6   :  { %4802 = vpow2.f32 %v3721_v14 }
 0xec1   :  { %v4801_v8 = vpop.eup %4800 }
 0xec2   :  { %v3320_v63 = vadd.f32 1.0, %v4801_v8  ;;  %v3537_v8 = vpop.xlane.xlu1 %3536 }
 0xec3   :  { %v4803_v62 = vpop.eup %4802 }
 0xec4   :  { %4804 = vrcp.f32 %v3320_v63  ;;  %v3327_v48 = vadd.f32 1.0, %v4803_v62 }
 0xec6   :  { %4806 = vrcp.f32 %v3327_v48  ;;  %v3541_v39 = vpop.xlane.xlu1 %3540 }
 0xed1   :  { %v4805_v58 = vpop.eup %4804 }
 0xed2   :  { %v3331_v52 = vmul.f32 %v4805_v58, %v3330_v51 }
 0xed3   :  { %v4807_v54 = vpop.eup %4806 }
 0xed4   :  { %v3332_v7 = vadd.f32 %v3331_v52, %v2082_v31  ;;  %v3334_v55 = vsub.f32 1.0, %v4807_v54  ;;  %v3336_v13 = vmul.f32 %v4807_v54, %v6849_v22 }
 0xed6   :  { %4808 = vtanh.f32 %v3332_v7 }
 0xee3   :  { %v4809_v12 = vpop.eup %4808 }
 0xee4   :  { %v3335_v56 = vmul.f32 %v4809_v12, %v3334_v55 }
 0xee6   :  { %v3337_v57 = vadd.f32 %v3336_v13, %v3335_v56 }
 0xee8   :  { %3404 = vmatmul.mubr.f32.vlgmr.msra.gmra.mxu0 %v3337_v57  ;;  %4647 = vmatmul.mubr.f32.vlgmr.msra.gmra.mxu1 %v3337_v57  ;;  %v3528_v6 = vmul.f32 %v4918_v15, %v3337_v57 }
 0xeea   :  { %3542 = vadd.xlane.f32.xlu0 %v3528_v6 }
 0xf00   :  { %3553 = vperm.xlu0 %4658, %v3725_v16  }
 0xf73   :  { %v3543_v1 = vpop.xlane.xlu0 %3542 }
 0xf7b   :  { %v3554_v25 = vpop.permute.xlu0 %3553 }
 0xf7c   :  { %v3556_v61 = vadd.f32 %v3554_v25, %v3531_v28  ;;  %v3557_v50 = vadd.f32 %v3554_v25, %v3533_v18  ;;  %v3558_v9 = vadd.f32 %v3554_v25, %v3535_v29  ;;  %v3559_v62 = vadd.f32 %v3554_v25, %v3537_v8 }
 0xf7d   :  { %v3561_v31 = vadd.f32 %v3554_v25, %v3541_v39  ;;  %v3562_v54 = vadd.f32 %v3554_v25, %v3543_v1 }
 0xf7e   :  { %v3577_v3 = vrot.slane %v3556_v61, %v3576_v4  ;;  %v3581_v14 = vrot.slane %v3557_v50, %v3576_v4  ;;  %v3585_v63 = vrot.slane %v3558_v9, %v3576_v4  ;;  %v3589_v58 = vrot.slane %v3559_v62, %v3576_v4 }
 0xf7f   :  { %v3597_v12 = vrot.slane %v3561_v31, %v3576_v4 }
 0xf80   :  { %v3607_v48 = vsel %vm3606_vm3, %v3581_v14, %v3577_v3 }
 0xf81   :  { %v3609_v51 = vsel %vm3608_vm4, %v3585_v63, %v3607_v48 }
 0xf82   :  { %v3611_v52 = vsel %vm3610_vm5, %v3589_v58, %v3609_v51 }
 0xfa8   :  { %v3405_v21 = vpop.f32.mrf.mxu0  ;;  %v3476_v24 = vpop.f32.mrf.mxu1 }
 0xfa9   :  { %v3483_v53 = vadd.f32 %v3405_v21, %v1981_v19  ;;  %v3497_v27 = vadd.f32 %v4917_v5, %v3476_v24  ;;  %v3560_v5 = vadd.f32 %v3554_v25, %v3539_v46 }
 0xfaa   :  { %v4648_v59 = vpop.f32.mrf.mxu1  ;;  %v3407_v20 = vpop.f32.mrf.mxu0 }
 0xfab   :  { %v3722_v11 = vmul.f32 -1.442695, %v3483_v53  ;;  %v3490_v30 = vadd.f32 %v3407_v20, %v1983_v41  ;;  %v3593_v7 = vrot.slane %v3560_v5, %v3576_v4 }
 0xfad   :  { %4810 = vpow2.f32 %v3722_v11  ;;  %v3723_v34 = vmul.f32 -1.442695, %v3490_v30  ;;  %v3613_v55 = vsel %vm3612_vm6, %v3593_v7, %v3611_v52 }
 0xfaf   :  { %4812 = vpow2.f32 %v3723_v34 }
 0xfba   :  { %v4811_v35 = vpop.eup %4810 }
 0xfbb   :  { %v3487_v36 = vadd.f32 1.0, %v4811_v35 }
 0xfbc   :  { %v4813_v10 = vpop.eup %4812 }
 0xfbd   :  { %4814 = vrcp.f32 %v3487_v36  ;;  %v3494_v43 = vadd.f32 1.0, %v4813_v10 }
 0xfbf   :  { %4816 = vrcp.f32 %v3494_v43 }
 0xfca   :  { %v4815_v33 = vpop.eup %4814 }
 0xfcb   :  { %v3498_v22 = vmul.f32 %v4815_v33, %v3497_v27 }
 0xfcc   :  { %v4817_v40 = vpop.eup %4816 }
 0xfcd   :  { %v3499_v37 = vadd.f32 %v3498_v22, %v2087_v23  ;;  %v3501_v32 = vsub.f32 1.0, %v4817_v40  ;;  %v3503_v44 = vmul.f32 %v4817_v40, %v3337_v57  ;;  %v3615_v57 = vsel %vm3614_vm7, %v3597_v12, %v3613_v55 }
 0xfcf   :  { %4818 = vtanh.f32 %v3499_v37 }
 0xfdc   :  { %v4819_v2 = vpop.eup %4818 }
 0xfdd   :  { %v3502_v42 = vmul.f32 %v4819_v2, %v3501_v32 }
 0xfdf   :  { %v3504_v45 = vadd.f32 %v3503_v44, %v3502_v42 }
 0xfe1   :  { %v3529_v0 = vmul.f32 %v4918_v15, %v3504_v45  ;;  %v3601_v15 = vrot.slane %v3562_v54, %v3576_v4 }
 0xfe3   :  { %3544 = vadd.xlane.f32.xlu1 %v3529_v0  ;;  %v3617_v16 = vsel %vm3616_vm8, %v3601_v15, %v3615_v57 }
0x106c   :  { %v3545_v56 = vpop.xlane.xlu1 %3544 }
0x106d   :  { %v3563_v13 = vadd.f32 %v3554_v25, %v3545_v56 }
0x106f   :  { %v3605_v6 = vrot.slane %v3563_v13, %v3576_v4 }
0x1071   :  { %v3619_v17 = vsel %vm3618_vm9, %v3605_v6, %v3617_v16 }
0x1072   :  { %3621 = vxpose.xlu1.b32.start.end [1/1] (short) (narrow) %v3619_v17, 8 }
0x10ee   :  { %v3637_v19 = vpop.trf.xlu1 }
0x10ef   :  { %3654 = vst.msk [vmem:[#allocation13] sm:$0xff] %vm3653_vm10, %v3637_v19 }
0x10f0   :  { %4990 = shalt.err (!%p4987_p5)
}
0x10f1   :  { %3664 = dma.vmem_to_hbm [thread:$0]  %s3662_s20, 128, %s6955_s11, [#allocation9]  }
0x10f2   :  { %5003 = dma.done.wait [#allocation9], 128  }
0x10f3   :  { %5004 = vsyncadd [#allocation9], 4294967168 }
0x10f4   :  { %3668 = vsyncpa [#allocation8], 1 }
0x10f5   :  { %3669 = vsyncpa [#allocation11], 1 }
0x10f6   :  { %3670 = vsyncpa [#allocation9], 1 }

</bundles_post_ra>
